<compile_context>
chip_gen: v6e
topology: v6e:2x2x1
jax: 0.10.0
libtpu: 0.0.40
codegen_flags: <defaults>
</compile_context>

<pallas_src>
import functools

import jax
import jax.numpy as jnp
from jax import lax
from jax.experimental import pallas as pl
from jax.experimental.pallas import tpu as pltpu


# ----------------------------------------------------------------------------
# Fused autoencoder kernel (all layers in one pallas_call, no grid)
# ----------------------------------------------------------------------------
def _fused_ae_kernel(*refs, T, B, n_enc, n_gru):
    """Fused GRU autoencoder forward.

    refs layout: [x, (w_ih_t, w_hh_t, b_gi, b_hn) * n_gru, lin_w_t, lin_b, out]
      x        : (T*B, F)    time-major flat input (batch padded to B)
      w_ih_t   : (D, 3H)     transposed weight_ih (gate order r, z, n)
      w_hh_t   : (H, 3H)     transposed weight_hh
      b_gi     : (1, 3H)     b_ih with b_hh folded into the r and z gates
      b_hn     : (1, H)      b_hh of the n gate (stays inside the r*(...) term)
      lin_w_t  : (H_last, F), lin_b: (1, F)
      out      : (T*B, F)    time-major flat output
    """
    x_ref = refs[0]
    out_ref = refs[-1]
    w = [r[...] for r in refs[1:-1]]          # everything is tiny; load once
    lin_w_t = w[4 * n_gru]
    lin_b = w[4 * n_gru + 1]

    cur = x_ref[...]                          # (T*B, D0), time-major flat

    for li in range(n_gru):
        w_ih_t, w_hh_t, b_gi, b_hn = w[4 * li: 4 * li + 4]
        H = w_hh_t.shape[0]
        const_input = (li == n_enc)           # first decoder layer: repeated
                                              # bottleneck vector (constant in t)

        # Hoisted input projection: one batched matmul over all timesteps, or
        # a single one when the layer input is constant in time.
        src = cur[(T - 1) * B:, :] if const_input else cur
        gi = jnp.dot(src, w_ih_t, preferred_element_type=jnp.float32) + b_gi
        # Gate lane-slices hoisted out of the time loop.
        gi_r, gi_z, gi_n = gi[:, :H], gi[:, H:2 * H], gi[:, 2 * H:]

        def gate(gx, t):
            return gx if const_input else gx[t * B:(t + 1) * B, :]

        outs = []
        # t == 0: h == 0, so h @ w_hh == 0 and the z*h term vanishes.
        r = jax.nn.sigmoid(gate(gi_r, 0))
        z = jax.nn.sigmoid(gate(gi_z, 0))
        n = jnp.tanh(gate(gi_n, 0) + r * b_hn)
        h = (1.0 - z) * n
        outs.append(h)

        for t in range(1, T):                 # statically unrolled recurrence
            gh = jnp.dot(h, w_hh_t, preferred_element_type=jnp.float32)
            r = jax.nn.sigmoid(gate(gi_r, t) + gh[:, :H])
            z = jax.nn.sigmoid(gate(gi_z, t) + gh[:, H:2 * H])
            n = jnp.tanh(gate(gi_n, t) + r * (gh[:, 2 * H:] + b_hn))
            h = (1.0 - z) * n + z * h
            outs.append(h)
        cur = jnp.concatenate(outs, axis=0)   # (T*B, H), time-major flat

    # TimeDistributed Linear over all timesteps as one matmul.
    y = jnp.dot(cur, lin_w_t, preferred_element_type=jnp.float32) + lin_b
    out_ref[...] = y.astype(out_ref.dtype)


@jax.jit
def lstm_ae_forward(x_btf, enc_params, dec_params, lin_params):
    """x_btf: (B, T, F) batch-first. Returns (B, T, F)."""
    B, T, F = x_btf.shape
    B_pad = ((B + 7) // 8) * 8                # fill sublanes / MXU rows

    gru_params = list(enc_params) + list(dec_params)
    n_gru = len(gru_params)
    n_enc = len(enc_params)

    args = []
    for p in gru_params:
        w_ih = jnp.asarray(p["w_ih"], jnp.float32)           # (3H, D)
        w_hh = jnp.asarray(p["w_hh"], jnp.float32)           # (3H, H)
        b_ih = jnp.asarray(p["b_ih"], jnp.float32)           # (3H,)
        b_hh = jnp.asarray(p["b_hh"], jnp.float32)           # (3H,)
        H = w_hh.shape[1]
        # Fold the hidden bias of the r and z gates into the input bias; the
        # n-gate hidden bias stays separate (it sits inside r * (...)).
        b_gi = b_ih + jnp.concatenate(
            [b_hh[:2 * H], jnp.zeros((H,), jnp.float32)])
        args.append(w_ih.T)                                   # (D, 3H)
        args.append(w_hh.T)                                   # (H, 3H)
        args.append(b_gi.reshape(1, -1))                      # (1, 3H)
        args.append(b_hh[2 * H:].reshape(1, -1))              # (1, H)
    args.append(jnp.asarray(lin_params["weight"], jnp.float32).T)   # (H, F)
    args.append(jnp.asarray(lin_params["bias"], jnp.float32).reshape(1, -1))

    # Pad batch to a sublane multiple and flatten to time-major (T*B_pad, F).
    xp = jnp.pad(x_btf.astype(jnp.float32), ((0, B_pad - B), (0, 0), (0, 0)))
    x_flat = jnp.transpose(xp, (1, 0, 2)).reshape(T * B_pad, F)

    kernel = functools.partial(_fused_ae_kernel, T=T, B=B_pad,
                               n_enc=n_enc, n_gru=n_gru)
    n_in = 1 + len(args)
    y_flat = pl.pallas_call(
        kernel,
        out_shape=jax.ShapeDtypeStruct((T * B_pad, F), jnp.float32),
        in_specs=[pl.BlockSpec(memory_space=pltpu.MemorySpace.VMEM)] * n_in,
        out_specs=pl.BlockSpec(memory_space=pltpu.MemorySpace.VMEM),
    )(x_flat, *args)

    return jnp.transpose(y_flat.reshape(T, B_pad, F)[:, :B, :], (1, 0, 2))


# ----------------------------------------------------------------------------
# Parameter init (deterministic, PyTorch-like U(-1/sqrt(H), 1/sqrt(H)))
# ----------------------------------------------------------------------------
def init_gru_params(key, input_size, hidden_size):
    k = jax.random.split(key, 4)
    s = 1.0 / float(hidden_size) ** 0.5
    return dict(
        w_ih=jax.random.uniform(k[0], (3 * hidden_size, input_size),
                                jnp.float32, -s, s),
        w_hh=jax.random.uniform(k[1], (3 * hidden_size, hidden_size),
                                jnp.float32, -s, s),
        b_ih=jax.random.uniform(k[2], (3 * hidden_size,), jnp.float32, -s, s),
        b_hh=jax.random.uniform(k[3], (3 * hidden_size,), jnp.float32, -s, s),
    )


def init_linear_params(key, in_features, out_features):
    k = jax.random.split(key, 2)
    s = 1.0 / float(in_features) ** 0.5
    return dict(
        weight=jax.random.uniform(k[0], (out_features, in_features),
                                  jnp.float32, -s, s),
        bias=jax.random.uniform(k[1], (out_features,), jnp.float32, -s, s),
    )


class LSTM_AE_Pallas:
    """Pallas port of LSTM_AE(seq_len, n_features, hidden_layer_list)."""

    def __init__(self, seq_len, n_features, hidden_layer_list, key):
        assert isinstance(hidden_layer_list, list) and len(hidden_layer_list) > 0
        self.seq_len = seq_len
        self.n_features = n_features

        hiddens = list(hidden_layer_list)
        keys = jax.random.split(key, 2 * len(hiddens) + 1)
        ki = 0

        # encoder GRUs
        self.enc_params = []
        in_dim = n_features
        for h in hiddens:
            self.enc_params.append(init_gru_params(keys[ki], in_dim, h))
            ki += 1
            in_dim = h

        # decoder GRUs (reversed hidden list, as in the PyTorch module)
        rev = list(reversed(hiddens))
        self.dec_params = []
        in_dim = rev[0]
        for h in rev:
            self.dec_params.append(init_gru_params(keys[ki], in_dim, h))
            ki += 1
            in_dim = h

        # TimeDistributed Linear(rev[-1] -> n_features)
        self.lin_params = init_linear_params(keys[ki], rev[-1], n_features)

    def __call__(self, x_btf):
        B, T, F = x_btf.shape
        assert T == self.seq_len and F == self.n_features
        return lstm_ae_forward(x_btf, self.enc_params, self.dec_params,
                               self.lin_params)


# ----------------------------------------------------------------------------
# Pure-JAX reference (lax.scan GRU) for correctness check
# ----------------------------------------------------------------------------
def gru_layer_ref(x_tbd, w_ih, w_hh, b_ih, b_hh):
    H = w_hh.shape[1]
    B = x_tbd.shape[1]

    def step(h, x_t):
        gi = x_t @ w_ih.T + b_ih
        gh = h @ w_hh.T + b_hh
        r = jax.nn.sigmoid(gi[:, :H] + gh[:, :H])
        z = jax.nn.sigmoid(gi[:, H:2 * H] + gh[:, H:2 * H])
        n = jnp.tanh(gi[:, 2 * H:] + r * gh[:, 2 * H:])
        h_new = (1 - z) * n + z * h
        return h_new, h_new

    h0 = jnp.zeros((B, H), jnp.float32)
    _, ys = lax.scan(step, h0, x_tbd)
    return ys


def forward_ref(model, x_btf):
    T = model.seq_len
    h = jnp.transpose(x_btf, (1, 0, 2)).astype(jnp.float32)
    for p in model.enc_params:
        h = gru_layer_ref(h, p["w_ih"], p["w_hh"], p["b_ih"], p["b_hh"])
    last = h[T - 1]
    h = jnp.broadcast_to(last[None, :, :], (T,) + last.shape)
    for p in model.dec_params:
        h = gru_layer_ref(h, p["w_ih"], p["w_hh"], p["b_ih"], p["b_hh"])
    y = h @ model.lin_params["weight"].T + model.lin_params["bias"]
    return jnp.transpose(y, (1, 0, 2))


if __name__ == "__main__":
    key = jax.random.PRNGKey(0)
    k_param, k_data = jax.random.split(key)

    batch, seq_len, n_features = 2, 8, 4
    hidden_layer_list = [32, 16]

    model = LSTM_AE_Pallas(seq_len, n_features, hidden_layer_list, k_param)

    x = jax.random.normal(k_data, (batch, seq_len, n_features), jnp.float32)

    out = jax.block_until_ready(model(x))
    assert out.shape == (batch, seq_len, n_features)

    ref = jax.block_until_ready(forward_ref(model, x))
    assert jnp.allclose(out, ref, atol=1e-4, rtol=1e-4), (
        f"max abs err {jnp.max(jnp.abs(out - ref))}")

    print("KERNEL_OK")
</pallas_src>

<mosaic_0001>
module attributes {stable_mosaic.version = 11 : i64} {
  func.func @_fused_ae_kernel(%arg0: memref<64x4xf32, #tpu.memory_space<vmem>>, %arg1: memref<4x96xf32, #tpu.memory_space<vmem>>, %arg2: memref<32x96xf32, #tpu.memory_space<vmem>>, %arg3: memref<1x96xf32, #tpu.memory_space<vmem>>, %arg4: memref<1x32xf32, #tpu.memory_space<vmem>>, %arg5: memref<32x48xf32, #tpu.memory_space<vmem>>, %arg6: memref<16x48xf32, #tpu.memory_space<vmem>>, %arg7: memref<1x48xf32, #tpu.memory_space<vmem>>, %arg8: memref<1x16xf32, #tpu.memory_space<vmem>>, %arg9: memref<16x48xf32, #tpu.memory_space<vmem>>, %arg10: memref<16x48xf32, #tpu.memory_space<vmem>>, %arg11: memref<1x48xf32, #tpu.memory_space<vmem>>, %arg12: memref<1x16xf32, #tpu.memory_space<vmem>>, %arg13: memref<16x96xf32, #tpu.memory_space<vmem>>, %arg14: memref<32x96xf32, #tpu.memory_space<vmem>>, %arg15: memref<1x96xf32, #tpu.memory_space<vmem>>, %arg16: memref<1x32xf32, #tpu.memory_space<vmem>>, %arg17: memref<32x4xf32, #tpu.memory_space<vmem>>, %arg18: memref<1x4xf32, #tpu.memory_space<vmem>>, %arg19: memref<64x4xf32, #tpu.memory_space<vmem>>) attributes {dimension_semantics = [], scalar_prefetch = 0 : i64, scratch_operands = 0 : i64, tpu.core_type = #tpu.core_type<tc>} {
    %c0 = arith.constant 0 : index
    %c0_0 = arith.constant 0 : index
    %0 = vector.load %arg1[%c0, %c0_0] : memref<4x96xf32, #tpu.memory_space<vmem>>, vector<4x96xf32>
    %c0_1 = arith.constant 0 : index
    %c0_2 = arith.constant 0 : index
    %1 = vector.load %arg2[%c0_1, %c0_2] : memref<32x96xf32, #tpu.memory_space<vmem>>, vector<32x96xf32>
    %c0_3 = arith.constant 0 : index
    %c0_4 = arith.constant 0 : index
    %2 = vector.load %arg3[%c0_3, %c0_4] : memref<1x96xf32, #tpu.memory_space<vmem>>, vector<1x96xf32>
    %c0_5 = arith.constant 0 : index
    %c0_6 = arith.constant 0 : index
    %3 = vector.load %arg4[%c0_5, %c0_6] : memref<1x32xf32, #tpu.memory_space<vmem>>, vector<1x32xf32>
    %c0_7 = arith.constant 0 : index
    %c0_8 = arith.constant 0 : index
    %4 = vector.load %arg5[%c0_7, %c0_8] : memref<32x48xf32, #tpu.memory_space<vmem>>, vector<32x48xf32>
    %c0_9 = arith.constant 0 : index
    %c0_10 = arith.constant 0 : index
    %5 = vector.load %arg6[%c0_9, %c0_10] : memref<16x48xf32, #tpu.memory_space<vmem>>, vector<16x48xf32>
    %c0_11 = arith.constant 0 : index
    %c0_12 = arith.constant 0 : index
    %6 = vector.load %arg7[%c0_11, %c0_12] : memref<1x48xf32, #tpu.memory_space<vmem>>, vector<1x48xf32>
    %c0_13 = arith.constant 0 : index
    %c0_14 = arith.constant 0 : index
    %7 = vector.load %arg8[%c0_13, %c0_14] : memref<1x16xf32, #tpu.memory_space<vmem>>, vector<1x16xf32>
    %c0_15 = arith.constant 0 : index
    %c0_16 = arith.constant 0 : index
    %8 = vector.load %arg9[%c0_15, %c0_16] : memref<16x48xf32, #tpu.memory_space<vmem>>, vector<16x48xf32>
    %c0_17 = arith.constant 0 : index
    %c0_18 = arith.constant 0 : index
    %9 = vector.load %arg10[%c0_17, %c0_18] : memref<16x48xf32, #tpu.memory_space<vmem>>, vector<16x48xf32>
    %c0_19 = arith.constant 0 : index
    %c0_20 = arith.constant 0 : index
    %10 = vector.load %arg11[%c0_19, %c0_20] : memref<1x48xf32, #tpu.memory_space<vmem>>, vector<1x48xf32>
    %c0_21 = arith.constant 0 : index
    %c0_22 = arith.constant 0 : index
    %11 = vector.load %arg12[%c0_21, %c0_22] : memref<1x16xf32, #tpu.memory_space<vmem>>, vector<1x16xf32>
    %c0_23 = arith.constant 0 : index
    %c0_24 = arith.constant 0 : index
    %12 = vector.load %arg13[%c0_23, %c0_24] : memref<16x96xf32, #tpu.memory_space<vmem>>, vector<16x96xf32>
    %c0_25 = arith.constant 0 : index
    %c0_26 = arith.constant 0 : index
    %13 = vector.load %arg14[%c0_25, %c0_26] : memref<32x96xf32, #tpu.memory_space<vmem>>, vector<32x96xf32>
    %c0_27 = arith.constant 0 : index
    %c0_28 = arith.constant 0 : index
    %14 = vector.load %arg15[%c0_27, %c0_28] : memref<1x96xf32, #tpu.memory_space<vmem>>, vector<1x96xf32>
    %c0_29 = arith.constant 0 : index
    %c0_30 = arith.constant 0 : index
    %15 = vector.load %arg16[%c0_29, %c0_30] : memref<1x32xf32, #tpu.memory_space<vmem>>, vector<1x32xf32>
    %c0_31 = arith.constant 0 : index
    %c0_32 = arith.constant 0 : index
    %16 = vector.load %arg17[%c0_31, %c0_32] : memref<32x4xf32, #tpu.memory_space<vmem>>, vector<32x4xf32>
    %c0_33 = arith.constant 0 : index
    %c0_34 = arith.constant 0 : index
    %17 = vector.load %arg18[%c0_33, %c0_34] : memref<1x4xf32, #tpu.memory_space<vmem>>, vector<1x4xf32>
    %c0_35 = arith.constant 0 : index
    %c0_36 = arith.constant 0 : index
    %18 = vector.load %arg0[%c0_35, %c0_36] : memref<64x4xf32, #tpu.memory_space<vmem>>, vector<64x4xf32>
    %cst = arith.constant dense<0.000000e+00> : vector<64x96xf32>
    %19 = tpu.matmul %18, %0, %cst {dimension_numbers = #tpu.dot_dimension_numbers<[1], [0], [0], [1], [0, 0, 1, 1], [], []>} : vector<64x4xf32>, vector<4x96xf32>, vector<64x96xf32> -> vector<64x96xf32>
    %20 = vector.broadcast %2 : vector<1x96xf32> to vector<64x96xf32>
    %21 = arith.addf %19, %20 : vector<64x96xf32>
    %22 = vector.extract_strided_slice %21 {offsets = [0, 0], sizes = [64, 32], strides = [1, 1]} : vector<64x96xf32> to vector<64x32xf32>
    %23 = vector.extract_strided_slice %21 {offsets = [0, 32], sizes = [64, 32], strides = [1, 1]} : vector<64x96xf32> to vector<64x32xf32>
    %24 = vector.extract_strided_slice %21 {offsets = [0, 64], sizes = [64, 32], strides = [1, 1]} : vector<64x96xf32> to vector<64x32xf32>
    %25 = vector.extract_strided_slice %22 {offsets = [0, 0], sizes = [8, 32], strides = [1, 1]} : vector<64x32xf32> to vector<8x32xf32>
    %26 = arith.negf %25 : vector<8x32xf32>
    %27 = math.exp %26 : vector<8x32xf32>
    %cst_37 = arith.constant 1.000000e+00 : f32
    %28 = vector.broadcast %cst_37 : f32 to vector<8x32xf32>
    %29 = arith.addf %28, %27 : vector<8x32xf32>
    %30 = arith.divf %28, %29 : vector<8x32xf32>
    %31 = vector.extract_strided_slice %23 {offsets = [0, 0], sizes = [8, 32], strides = [1, 1]} : vector<64x32xf32> to vector<8x32xf32>
    %32 = arith.negf %31 : vector<8x32xf32>
    %33 = math.exp %32 : vector<8x32xf32>
    %cst_38 = arith.constant 1.000000e+00 : f32
    %34 = vector.broadcast %cst_38 : f32 to vector<8x32xf32>
    %35 = arith.addf %34, %33 : vector<8x32xf32>
    %36 = arith.divf %34, %35 : vector<8x32xf32>
    %37 = vector.extract_strided_slice %24 {offsets = [0, 0], sizes = [8, 32], strides = [1, 1]} : vector<64x32xf32> to vector<8x32xf32>
    %38 = vector.broadcast %3 : vector<1x32xf32> to vector<8x32xf32>
    %39 = arith.mulf %30, %38 : vector<8x32xf32>
    %40 = arith.addf %37, %39 : vector<8x32xf32>
    %41 = math.tanh %40 : vector<8x32xf32>
    %cst_39 = arith.constant 1.000000e+00 : f32
    %42 = vector.broadcast %cst_39 : f32 to vector<8x32xf32>
    %43 = arith.subf %42, %36 : vector<8x32xf32>
    %44 = arith.mulf %43, %41 : vector<8x32xf32>
    %cst_40 = arith.constant dense<0.000000e+00> : vector<8x96xf32>
    %45 = tpu.matmul %44, %1, %cst_40 {dimension_numbers = #tpu.dot_dimension_numbers<[1], [0], [0], [1], [0, 0, 1, 1], [], []>} : vector<8x32xf32>, vector<32x96xf32>, vector<8x96xf32> -> vector<8x96xf32>
    %46 = vector.extract_strided_slice %22 {offsets = [8, 0], sizes = [8, 32], strides = [1, 1]} : vector<64x32xf32> to vector<8x32xf32>
    %47 = vector.extract_strided_slice %45 {offsets = [0, 0], sizes = [8, 32], strides = [1, 1]} : vector<8x96xf32> to vector<8x32xf32>
    %48 = arith.addf %46, %47 : vector<8x32xf32>
    %49 = arith.negf %48 : vector<8x32xf32>
    %50 = math.exp %49 : vector<8x32xf32>
    %cst_41 = arith.constant 1.000000e+00 : f32
    %51 = vector.broadcast %cst_41 : f32 to vector<8x32xf32>
    %52 = arith.addf %51, %50 : vector<8x32xf32>
    %53 = arith.divf %51, %52 : vector<8x32xf32>
    %54 = vector.extract_strided_slice %23 {offsets = [8, 0], sizes = [8, 32], strides = [1, 1]} : vector<64x32xf32> to vector<8x32xf32>
    %55 = vector.extract_strided_slice %45 {offsets = [0, 32], sizes = [8, 32], strides = [1, 1]} : vector<8x96xf32> to vector<8x32xf32>
    %56 = arith.addf %54, %55 : vector<8x32xf32>
    %57 = arith.negf %56 : vector<8x32xf32>
    %58 = math.exp %57 : vector<8x32xf32>
    %cst_42 = arith.constant 1.000000e+00 : f32
    %59 = vector.broadcast %cst_42 : f32 to vector<8x32xf32>
    %60 = arith.addf %59, %58 : vector<8x32xf32>
    %61 = arith.divf %59, %60 : vector<8x32xf32>
    %62 = vector.extract_strided_slice %24 {offsets = [8, 0], sizes = [8, 32], strides = [1, 1]} : vector<64x32xf32> to vector<8x32xf32>
    %63 = vector.extract_strided_slice %45 {offsets = [0, 64], sizes = [8, 32], strides = [1, 1]} : vector<8x96xf32> to vector<8x32xf32>
    %64 = vector.broadcast %3 : vector<1x32xf32> to vector<8x32xf32>
    %65 = arith.addf %63, %64 : vector<8x32xf32>
    %66 = arith.mulf %53, %65 : vector<8x32xf32>
    %67 = arith.addf %62, %66 : vector<8x32xf32>
    %68 = math.tanh %67 : vector<8x32xf32>
    %cst_43 = arith.constant 1.000000e+00 : f32
    %69 = vector.broadcast %cst_43 : f32 to vector<8x32xf32>
    %70 = arith.subf %69, %61 : vector<8x32xf32>
    %71 = arith.mulf %70, %68 : vector<8x32xf32>
    %72 = arith.mulf %61, %44 : vector<8x32xf32>
    %73 = arith.addf %71, %72 : vector<8x32xf32>
    %cst_44 = arith.constant dense<0.000000e+00> : vector<8x96xf32>
    %74 = tpu.matmul %73, %1, %cst_44 {dimension_numbers = #tpu.dot_dimension_numbers<[1], [0], [0], [1], [0, 0, 1, 1], [], []>} : vector<8x32xf32>, vector<32x96xf32>, vector<8x96xf32> -> vector<8x96xf32>
    %75 = vector.extract_strided_slice %22 {offsets = [16, 0], sizes = [8, 32], strides = [1, 1]} : vector<64x32xf32> to vector<8x32xf32>
    %76 = vector.extract_strided_slice %74 {offsets = [0, 0], sizes = [8, 32], strides = [1, 1]} : vector<8x96xf32> to vector<8x32xf32>
    %77 = arith.addf %75, %76 : vector<8x32xf32>
    %78 = arith.negf %77 : vector<8x32xf32>
    %79 = math.exp %78 : vector<8x32xf32>
    %cst_45 = arith.constant 1.000000e+00 : f32
    %80 = vector.broadcast %cst_45 : f32 to vector<8x32xf32>
    %81 = arith.addf %80, %79 : vector<8x32xf32>
    %82 = arith.divf %80, %81 : vector<8x32xf32>
    %83 = vector.extract_strided_slice %23 {offsets = [16, 0], sizes = [8, 32], strides = [1, 1]} : vector<64x32xf32> to vector<8x32xf32>
    %84 = vector.extract_strided_slice %74 {offsets = [0, 32], sizes = [8, 32], strides = [1, 1]} : vector<8x96xf32> to vector<8x32xf32>
    %85 = arith.addf %83, %84 : vector<8x32xf32>
    %86 = arith.negf %85 : vector<8x32xf32>
    %87 = math.exp %86 : vector<8x32xf32>
    %cst_46 = arith.constant 1.000000e+00 : f32
    %88 = vector.broadcast %cst_46 : f32 to vector<8x32xf32>
    %89 = arith.addf %88, %87 : vector<8x32xf32>
    %90 = arith.divf %88, %89 : vector<8x32xf32>
    %91 = vector.extract_strided_slice %24 {offsets = [16, 0], sizes = [8, 32], strides = [1, 1]} : vector<64x32xf32> to vector<8x32xf32>
    %92 = vector.extract_strided_slice %74 {offsets = [0, 64], sizes = [8, 32], strides = [1, 1]} : vector<8x96xf32> to vector<8x32xf32>
    %93 = vector.broadcast %3 : vector<1x32xf32> to vector<8x32xf32>
    %94 = arith.addf %92, %93 : vector<8x32xf32>
    %95 = arith.mulf %82, %94 : vector<8x32xf32>
    %96 = arith.addf %91, %95 : vector<8x32xf32>
    %97 = math.tanh %96 : vector<8x32xf32>
    %cst_47 = arith.constant 1.000000e+00 : f32
    %98 = vector.broadcast %cst_47 : f32 to vector<8x32xf32>
    %99 = arith.subf %98, %90 : vector<8x32xf32>
    %100 = arith.mulf %99, %97 : vector<8x32xf32>
    %101 = arith.mulf %90, %73 : vector<8x32xf32>
    %102 = arith.addf %100, %101 : vector<8x32xf32>
    %cst_48 = arith.constant dense<0.000000e+00> : vector<8x96xf32>
    %103 = tpu.matmul %102, %1, %cst_48 {dimension_numbers = #tpu.dot_dimension_numbers<[1], [0], [0], [1], [0, 0, 1, 1], [], []>} : vector<8x32xf32>, vector<32x96xf32>, vector<8x96xf32> -> vector<8x96xf32>
    %104 = vector.extract_strided_slice %22 {offsets = [24, 0], sizes = [8, 32], strides = [1, 1]} : vector<64x32xf32> to vector<8x32xf32>
    %105 = vector.extract_strided_slice %103 {offsets = [0, 0], sizes = [8, 32], strides = [1, 1]} : vector<8x96xf32> to vector<8x32xf32>
    %106 = arith.addf %104, %105 : vector<8x32xf32>
    %107 = arith.negf %106 : vector<8x32xf32>
    %108 = math.exp %107 : vector<8x32xf32>
    %cst_49 = arith.constant 1.000000e+00 : f32
    %109 = vector.broadcast %cst_49 : f32 to vector<8x32xf32>
    %110 = arith.addf %109, %108 : vector<8x32xf32>
    %111 = arith.divf %109, %110 : vector<8x32xf32>
    %112 = vector.extract_strided_slice %23 {offsets = [24, 0], sizes = [8, 32], strides = [1, 1]} : vector<64x32xf32> to vector<8x32xf32>
    %113 = vector.extract_strided_slice %103 {offsets = [0, 32], sizes = [8, 32], strides = [1, 1]} : vector<8x96xf32> to vector<8x32xf32>
    %114 = arith.addf %112, %113 : vector<8x32xf32>
    %115 = arith.negf %114 : vector<8x32xf32>
    %116 = math.exp %115 : vector<8x32xf32>
    %cst_50 = arith.constant 1.000000e+00 : f32
    %117 = vector.broadcast %cst_50 : f32 to vector<8x32xf32>
    %118 = arith.addf %117, %116 : vector<8x32xf32>
    %119 = arith.divf %117, %118 : vector<8x32xf32>
    %120 = vector.extract_strided_slice %24 {offsets = [24, 0], sizes = [8, 32], strides = [1, 1]} : vector<64x32xf32> to vector<8x32xf32>
    %121 = vector.extract_strided_slice %103 {offsets = [0, 64], sizes = [8, 32], strides = [1, 1]} : vector<8x96xf32> to vector<8x32xf32>
    %122 = vector.broadcast %3 : vector<1x32xf32> to vector<8x32xf32>
    %123 = arith.addf %121, %122 : vector<8x32xf32>
    %124 = arith.mulf %111, %123 : vector<8x32xf32>
    %125 = arith.addf %120, %124 : vector<8x32xf32>
    %126 = math.tanh %125 : vector<8x32xf32>
    %cst_51 = arith.constant 1.000000e+00 : f32
    %127 = vector.broadcast %cst_51 : f32 to vector<8x32xf32>
    %128 = arith.subf %127, %119 : vector<8x32xf32>
    %129 = arith.mulf %128, %126 : vector<8x32xf32>
    %130 = arith.mulf %119, %102 : vector<8x32xf32>
    %131 = arith.addf %129, %130 : vector<8x32xf32>
    %cst_52 = arith.constant dense<0.000000e+00> : vector<8x96xf32>
    %132 = tpu.matmul %131, %1, %cst_52 {dimension_numbers = #tpu.dot_dimension_numbers<[1], [0], [0], [1], [0, 0, 1, 1], [], []>} : vector<8x32xf32>, vector<32x96xf32>, vector<8x96xf32> -> vector<8x96xf32>
    %133 = vector.extract_strided_slice %22 {offsets = [32, 0], sizes = [8, 32], strides = [1, 1]} : vector<64x32xf32> to vector<8x32xf32>
    %134 = vector.extract_strided_slice %132 {offsets = [0, 0], sizes = [8, 32], strides = [1, 1]} : vector<8x96xf32> to vector<8x32xf32>
    %135 = arith.addf %133, %134 : vector<8x32xf32>
    %136 = arith.negf %135 : vector<8x32xf32>
    %137 = math.exp %136 : vector<8x32xf32>
    %cst_53 = arith.constant 1.000000e+00 : f32
    %138 = vector.broadcast %cst_53 : f32 to vector<8x32xf32>
    %139 = arith.addf %138, %137 : vector<8x32xf32>
    %140 = arith.divf %138, %139 : vector<8x32xf32>
    %141 = vector.extract_strided_slice %23 {offsets = [32, 0], sizes = [8, 32], strides = [1, 1]} : vector<64x32xf32> to vector<8x32xf32>
    %142 = vector.extract_strided_slice %132 {offsets = [0, 32], sizes = [8, 32], strides = [1, 1]} : vector<8x96xf32> to vector<8x32xf32>
    %143 = arith.addf %141, %142 : vector<8x32xf32>
    %144 = arith.negf %143 : vector<8x32xf32>
    %145 = math.exp %144 : vector<8x32xf32>
    %cst_54 = arith.constant 1.000000e+00 : f32
    %146 = vector.broadcast %cst_54 : f32 to vector<8x32xf32>
    %147 = arith.addf %146, %145 : vector<8x32xf32>
    %148 = arith.divf %146, %147 : vector<8x32xf32>
    %149 = vector.extract_strided_slice %24 {offsets = [32, 0], sizes = [8, 32], strides = [1, 1]} : vector<64x32xf32> to vector<8x32xf32>
    %150 = vector.extract_strided_slice %132 {offsets = [0, 64], sizes = [8, 32], strides = [1, 1]} : vector<8x96xf32> to vector<8x32xf32>
    %151 = vector.broadcast %3 : vector<1x32xf32> to vector<8x32xf32>
    %152 = arith.addf %150, %151 : vector<8x32xf32>
    %153 = arith.mulf %140, %152 : vector<8x32xf32>
    %154 = arith.addf %149, %153 : vector<8x32xf32>
    %155 = math.tanh %154 : vector<8x32xf32>
    %cst_55 = arith.constant 1.000000e+00 : f32
    %156 = vector.broadcast %cst_55 : f32 to vector<8x32xf32>
    %157 = arith.subf %156, %148 : vector<8x32xf32>
    %158 = arith.mulf %157, %155 : vector<8x32xf32>
    %159 = arith.mulf %148, %131 : vector<8x32xf32>
    %160 = arith.addf %158, %159 : vector<8x32xf32>
    %cst_56 = arith.constant dense<0.000000e+00> : vector<8x96xf32>
    %161 = tpu.matmul %160, %1, %cst_56 {dimension_numbers = #tpu.dot_dimension_numbers<[1], [0], [0], [1], [0, 0, 1, 1], [], []>} : vector<8x32xf32>, vector<32x96xf32>, vector<8x96xf32> -> vector<8x96xf32>
    %162 = vector.extract_strided_slice %22 {offsets = [40, 0], sizes = [8, 32], strides = [1, 1]} : vector<64x32xf32> to vector<8x32xf32>
    %163 = vector.extract_strided_slice %161 {offsets = [0, 0], sizes = [8, 32], strides = [1, 1]} : vector<8x96xf32> to vector<8x32xf32>
    %164 = arith.addf %162, %163 : vector<8x32xf32>
    %165 = arith.negf %164 : vector<8x32xf32>
    %166 = math.exp %165 : vector<8x32xf32>
    %cst_57 = arith.constant 1.000000e+00 : f32
    %167 = vector.broadcast %cst_57 : f32 to vector<8x32xf32>
    %168 = arith.addf %167, %166 : vector<8x32xf32>
    %169 = arith.divf %167, %168 : vector<8x32xf32>
    %170 = vector.extract_strided_slice %23 {offsets = [40, 0], sizes = [8, 32], strides = [1, 1]} : vector<64x32xf32> to vector<8x32xf32>
    %171 = vector.extract_strided_slice %161 {offsets = [0, 32], sizes = [8, 32], strides = [1, 1]} : vector<8x96xf32> to vector<8x32xf32>
    %172 = arith.addf %170, %171 : vector<8x32xf32>
    %173 = arith.negf %172 : vector<8x32xf32>
    %174 = math.exp %173 : vector<8x32xf32>
    %cst_58 = arith.constant 1.000000e+00 : f32
    %175 = vector.broadcast %cst_58 : f32 to vector<8x32xf32>
    %176 = arith.addf %175, %174 : vector<8x32xf32>
    %177 = arith.divf %175, %176 : vector<8x32xf32>
    %178 = vector.extract_strided_slice %24 {offsets = [40, 0], sizes = [8, 32], strides = [1, 1]} : vector<64x32xf32> to vector<8x32xf32>
    %179 = vector.extract_strided_slice %161 {offsets = [0, 64], sizes = [8, 32], strides = [1, 1]} : vector<8x96xf32> to vector<8x32xf32>
    %180 = vector.broadcast %3 : vector<1x32xf32> to vector<8x32xf32>
    %181 = arith.addf %179, %180 : vector<8x32xf32>
    %182 = arith.mulf %169, %181 : vector<8x32xf32>
    %183 = arith.addf %178, %182 : vector<8x32xf32>
    %184 = math.tanh %183 : vector<8x32xf32>
    %cst_59 = arith.constant 1.000000e+00 : f32
    %185 = vector.broadcast %cst_59 : f32 to vector<8x32xf32>
    %186 = arith.subf %185, %177 : vector<8x32xf32>
    %187 = arith.mulf %186, %184 : vector<8x32xf32>
    %188 = arith.mulf %177, %160 : vector<8x32xf32>
    %189 = arith.addf %187, %188 : vector<8x32xf32>
    %cst_60 = arith.constant dense<0.000000e+00> : vector<8x96xf32>
    %190 = tpu.matmul %189, %1, %cst_60 {dimension_numbers = #tpu.dot_dimension_numbers<[1], [0], [0], [1], [0, 0, 1, 1], [], []>} : vector<8x32xf32>, vector<32x96xf32>, vector<8x96xf32> -> vector<8x96xf32>
    %191 = vector.extract_strided_slice %22 {offsets = [48, 0], sizes = [8, 32], strides = [1, 1]} : vector<64x32xf32> to vector<8x32xf32>
    %192 = vector.extract_strided_slice %190 {offsets = [0, 0], sizes = [8, 32], strides = [1, 1]} : vector<8x96xf32> to vector<8x32xf32>
    %193 = arith.addf %191, %192 : vector<8x32xf32>
    %194 = arith.negf %193 : vector<8x32xf32>
    %195 = math.exp %194 : vector<8x32xf32>
    %cst_61 = arith.constant 1.000000e+00 : f32
    %196 = vector.broadcast %cst_61 : f32 to vector<8x32xf32>
    %197 = arith.addf %196, %195 : vector<8x32xf32>
    %198 = arith.divf %196, %197 : vector<8x32xf32>
    %199 = vector.extract_strided_slice %23 {offsets = [48, 0], sizes = [8, 32], strides = [1, 1]} : vector<64x32xf32> to vector<8x32xf32>
    %200 = vector.extract_strided_slice %190 {offsets = [0, 32], sizes = [8, 32], strides = [1, 1]} : vector<8x96xf32> to vector<8x32xf32>
    %201 = arith.addf %199, %200 : vector<8x32xf32>
    %202 = arith.negf %201 : vector<8x32xf32>
    %203 = math.exp %202 : vector<8x32xf32>
    %cst_62 = arith.constant 1.000000e+00 : f32
    %204 = vector.broadcast %cst_62 : f32 to vector<8x32xf32>
    %205 = arith.addf %204, %203 : vector<8x32xf32>
    %206 = arith.divf %204, %205 : vector<8x32xf32>
    %207 = vector.extract_strided_slice %24 {offsets = [48, 0], sizes = [8, 32], strides = [1, 1]} : vector<64x32xf32> to vector<8x32xf32>
    %208 = vector.extract_strided_slice %190 {offsets = [0, 64], sizes = [8, 32], strides = [1, 1]} : vector<8x96xf32> to vector<8x32xf32>
    %209 = vector.broadcast %3 : vector<1x32xf32> to vector<8x32xf32>
    %210 = arith.addf %208, %209 : vector<8x32xf32>
    %211 = arith.mulf %198, %210 : vector<8x32xf32>
    %212 = arith.addf %207, %211 : vector<8x32xf32>
    %213 = math.tanh %212 : vector<8x32xf32>
    %cst_63 = arith.constant 1.000000e+00 : f32
    %214 = vector.broadcast %cst_63 : f32 to vector<8x32xf32>
    %215 = arith.subf %214, %206 : vector<8x32xf32>
    %216 = arith.mulf %215, %213 : vector<8x32xf32>
    %217 = arith.mulf %206, %189 : vector<8x32xf32>
    %218 = arith.addf %216, %217 : vector<8x32xf32>
    %cst_64 = arith.constant dense<0.000000e+00> : vector<8x96xf32>
    %219 = tpu.matmul %218, %1, %cst_64 {dimension_numbers = #tpu.dot_dimension_numbers<[1], [0], [0], [1], [0, 0, 1, 1], [], []>} : vector<8x32xf32>, vector<32x96xf32>, vector<8x96xf32> -> vector<8x96xf32>
    %220 = vector.extract_strided_slice %22 {offsets = [56, 0], sizes = [8, 32], strides = [1, 1]} : vector<64x32xf32> to vector<8x32xf32>
    %221 = vector.extract_strided_slice %219 {offsets = [0, 0], sizes = [8, 32], strides = [1, 1]} : vector<8x96xf32> to vector<8x32xf32>
    %222 = arith.addf %220, %221 : vector<8x32xf32>
    %223 = arith.negf %222 : vector<8x32xf32>
    %224 = math.exp %223 : vector<8x32xf32>
    %cst_65 = arith.constant 1.000000e+00 : f32
    %225 = vector.broadcast %cst_65 : f32 to vector<8x32xf32>
    %226 = arith.addf %225, %224 : vector<8x32xf32>
    %227 = arith.divf %225, %226 : vector<8x32xf32>
    %228 = vector.extract_strided_slice %23 {offsets = [56, 0], sizes = [8, 32], strides = [1, 1]} : vector<64x32xf32> to vector<8x32xf32>
    %229 = vector.extract_strided_slice %219 {offsets = [0, 32], sizes = [8, 32], strides = [1, 1]} : vector<8x96xf32> to vector<8x32xf32>
    %230 = arith.addf %228, %229 : vector<8x32xf32>
    %231 = arith.negf %230 : vector<8x32xf32>
    %232 = math.exp %231 : vector<8x32xf32>
    %cst_66 = arith.constant 1.000000e+00 : f32
    %233 = vector.broadcast %cst_66 : f32 to vector<8x32xf32>
    %234 = arith.addf %233, %232 : vector<8x32xf32>
    %235 = arith.divf %233, %234 : vector<8x32xf32>
    %236 = vector.extract_strided_slice %24 {offsets = [56, 0], sizes = [8, 32], strides = [1, 1]} : vector<64x32xf32> to vector<8x32xf32>
    %237 = vector.extract_strided_slice %219 {offsets = [0, 64], sizes = [8, 32], strides = [1, 1]} : vector<8x96xf32> to vector<8x32xf32>
    %238 = vector.broadcast %3 : vector<1x32xf32> to vector<8x32xf32>
    %239 = arith.addf %237, %238 : vector<8x32xf32>
    %240 = arith.mulf %227, %239 : vector<8x32xf32>
    %241 = arith.addf %236, %240 : vector<8x32xf32>
    %242 = math.tanh %241 : vector<8x32xf32>
    %cst_67 = arith.constant 1.000000e+00 : f32
    %243 = vector.broadcast %cst_67 : f32 to vector<8x32xf32>
    %244 = arith.subf %243, %235 : vector<8x32xf32>
    %245 = arith.mulf %244, %242 : vector<8x32xf32>
    %246 = arith.mulf %235, %218 : vector<8x32xf32>
    %247 = arith.addf %245, %246 : vector<8x32xf32>
    %248 = tpu.concatenate %44, %73, %102, %131, %160, %189, %218, %247 in 0 : vector<8x32xf32>, vector<8x32xf32>, vector<8x32xf32>, vector<8x32xf32>, vector<8x32xf32>, vector<8x32xf32>, vector<8x32xf32>, vector<8x32xf32> -> vector<64x32xf32>
    %cst_68 = arith.constant dense<0.000000e+00> : vector<64x48xf32>
    %249 = tpu.matmul %248, %4, %cst_68 {dimension_numbers = #tpu.dot_dimension_numbers<[1], [0], [0], [1], [0, 0, 1, 1], [], []>} : vector<64x32xf32>, vector<32x48xf32>, vector<64x48xf32> -> vector<64x48xf32>
    %250 = vector.broadcast %6 : vector<1x48xf32> to vector<64x48xf32>
    %251 = arith.addf %249, %250 : vector<64x48xf32>
    %252 = vector.extract_strided_slice %251 {offsets = [0, 0], sizes = [64, 16], strides = [1, 1]} : vector<64x48xf32> to vector<64x16xf32>
    %253 = vector.extract_strided_slice %251 {offsets = [0, 16], sizes = [64, 16], strides = [1, 1]} : vector<64x48xf32> to vector<64x16xf32>
    %254 = vector.extract_strided_slice %251 {offsets = [0, 32], sizes = [64, 16], strides = [1, 1]} : vector<64x48xf32> to vector<64x16xf32>
    %255 = vector.extract_strided_slice %252 {offsets = [0, 0], sizes = [8, 16], strides = [1, 1]} : vector<64x16xf32> to vector<8x16xf32>
    %256 = arith.negf %255 : vector<8x16xf32>
    %257 = math.exp %256 : vector<8x16xf32>
    %cst_69 = arith.constant 1.000000e+00 : f32
    %258 = vector.broadcast %cst_69 : f32 to vector<8x16xf32>
    %259 = arith.addf %258, %257 : vector<8x16xf32>
    %260 = arith.divf %258, %259 : vector<8x16xf32>
    %261 = vector.extract_strided_slice %253 {offsets = [0, 0], sizes = [8, 16], strides = [1, 1]} : vector<64x16xf32> to vector<8x16xf32>
    %262 = arith.negf %261 : vector<8x16xf32>
    %263 = math.exp %262 : vector<8x16xf32>
    %cst_70 = arith.constant 1.000000e+00 : f32
    %264 = vector.broadcast %cst_70 : f32 to vector<8x16xf32>
    %265 = arith.addf %264, %263 : vector<8x16xf32>
    %266 = arith.divf %264, %265 : vector<8x16xf32>
    %267 = vector.extract_strided_slice %254 {offsets = [0, 0], sizes = [8, 16], strides = [1, 1]} : vector<64x16xf32> to vector<8x16xf32>
    %268 = vector.broadcast %7 : vector<1x16xf32> to vector<8x16xf32>
    %269 = arith.mulf %260, %268 : vector<8x16xf32>
    %270 = arith.addf %267, %269 : vector<8x16xf32>
    %271 = math.tanh %270 : vector<8x16xf32>
    %cst_71 = arith.constant 1.000000e+00 : f32
    %272 = vector.broadcast %cst_71 : f32 to vector<8x16xf32>
    %273 = arith.subf %272, %266 : vector<8x16xf32>
    %274 = arith.mulf %273, %271 : vector<8x16xf32>
    %cst_72 = arith.constant dense<0.000000e+00> : vector<8x48xf32>
    %275 = tpu.matmul %274, %5, %cst_72 {dimension_numbers = #tpu.dot_dimension_numbers<[1], [0], [0], [1], [0, 0, 1, 1], [], []>} : vector<8x16xf32>, vector<16x48xf32>, vector<8x48xf32> -> vector<8x48xf32>
    %276 = vector.extract_strided_slice %252 {offsets = [8, 0], sizes = [8, 16], strides = [1, 1]} : vector<64x16xf32> to vector<8x16xf32>
    %277 = vector.extract_strided_slice %275 {offsets = [0, 0], sizes = [8, 16], strides = [1, 1]} : vector<8x48xf32> to vector<8x16xf32>
    %278 = arith.addf %276, %277 : vector<8x16xf32>
    %279 = arith.negf %278 : vector<8x16xf32>
    %280 = math.exp %279 : vector<8x16xf32>
    %cst_73 = arith.constant 1.000000e+00 : f32
    %281 = vector.broadcast %cst_73 : f32 to vector<8x16xf32>
    %282 = arith.addf %281, %280 : vector<8x16xf32>
    %283 = arith.divf %281, %282 : vector<8x16xf32>
    %284 = vector.extract_strided_slice %253 {offsets = [8, 0], sizes = [8, 16], strides = [1, 1]} : vector<64x16xf32> to vector<8x16xf32>
    %285 = vector.extract_strided_slice %275 {offsets = [0, 16], sizes = [8, 16], strides = [1, 1]} : vector<8x48xf32> to vector<8x16xf32>
    %286 = arith.addf %284, %285 : vector<8x16xf32>
    %287 = arith.negf %286 : vector<8x16xf32>
    %288 = math.exp %287 : vector<8x16xf32>
    %cst_74 = arith.constant 1.000000e+00 : f32
    %289 = vector.broadcast %cst_74 : f32 to vector<8x16xf32>
    %290 = arith.addf %289, %288 : vector<8x16xf32>
    %291 = arith.divf %289, %290 : vector<8x16xf32>
    %292 = vector.extract_strided_slice %254 {offsets = [8, 0], sizes = [8, 16], strides = [1, 1]} : vector<64x16xf32> to vector<8x16xf32>
    %293 = vector.extract_strided_slice %275 {offsets = [0, 32], sizes = [8, 16], strides = [1, 1]} : vector<8x48xf32> to vector<8x16xf32>
    %294 = vector.broadcast %7 : vector<1x16xf32> to vector<8x16xf32>
    %295 = arith.addf %293, %294 : vector<8x16xf32>
    %296 = arith.mulf %283, %295 : vector<8x16xf32>
    %297 = arith.addf %292, %296 : vector<8x16xf32>
    %298 = math.tanh %297 : vector<8x16xf32>
    %cst_75 = arith.constant 1.000000e+00 : f32
    %299 = vector.broadcast %cst_75 : f32 to vector<8x16xf32>
    %300 = arith.subf %299, %291 : vector<8x16xf32>
    %301 = arith.mulf %300, %298 : vector<8x16xf32>
    %302 = arith.mulf %291, %274 : vector<8x16xf32>
    %303 = arith.addf %301, %302 : vector<8x16xf32>
    %cst_76 = arith.constant dense<0.000000e+00> : vector<8x48xf32>
    %304 = tpu.matmul %303, %5, %cst_76 {dimension_numbers = #tpu.dot_dimension_numbers<[1], [0], [0], [1], [0, 0, 1, 1], [], []>} : vector<8x16xf32>, vector<16x48xf32>, vector<8x48xf32> -> vector<8x48xf32>
    %305 = vector.extract_strided_slice %252 {offsets = [16, 0], sizes = [8, 16], strides = [1, 1]} : vector<64x16xf32> to vector<8x16xf32>
    %306 = vector.extract_strided_slice %304 {offsets = [0, 0], sizes = [8, 16], strides = [1, 1]} : vector<8x48xf32> to vector<8x16xf32>
    %307 = arith.addf %305, %306 : vector<8x16xf32>
    %308 = arith.negf %307 : vector<8x16xf32>
    %309 = math.exp %308 : vector<8x16xf32>
    %cst_77 = arith.constant 1.000000e+00 : f32
    %310 = vector.broadcast %cst_77 : f32 to vector<8x16xf32>
    %311 = arith.addf %310, %309 : vector<8x16xf32>
    %312 = arith.divf %310, %311 : vector<8x16xf32>
    %313 = vector.extract_strided_slice %253 {offsets = [16, 0], sizes = [8, 16], strides = [1, 1]} : vector<64x16xf32> to vector<8x16xf32>
    %314 = vector.extract_strided_slice %304 {offsets = [0, 16], sizes = [8, 16], strides = [1, 1]} : vector<8x48xf32> to vector<8x16xf32>
    %315 = arith.addf %313, %314 : vector<8x16xf32>
    %316 = arith.negf %315 : vector<8x16xf32>
    %317 = math.exp %316 : vector<8x16xf32>
    %cst_78 = arith.constant 1.000000e+00 : f32
    %318 = vector.broadcast %cst_78 : f32 to vector<8x16xf32>
    %319 = arith.addf %318, %317 : vector<8x16xf32>
    %320 = arith.divf %318, %319 : vector<8x16xf32>
    %321 = vector.extract_strided_slice %254 {offsets = [16, 0], sizes = [8, 16], strides = [1, 1]} : vector<64x16xf32> to vector<8x16xf32>
    %322 = vector.extract_strided_slice %304 {offsets = [0, 32], sizes = [8, 16], strides = [1, 1]} : vector<8x48xf32> to vector<8x16xf32>
    %323 = vector.broadcast %7 : vector<1x16xf32> to vector<8x16xf32>
    %324 = arith.addf %322, %323 : vector<8x16xf32>
    %325 = arith.mulf %312, %324 : vector<8x16xf32>
    %326 = arith.addf %321, %325 : vector<8x16xf32>
    %327 = math.tanh %326 : vector<8x16xf32>
    %cst_79 = arith.constant 1.000000e+00 : f32
    %328 = vector.broadcast %cst_79 : f32 to vector<8x16xf32>
    %329 = arith.subf %328, %320 : vector<8x16xf32>
    %330 = arith.mulf %329, %327 : vector<8x16xf32>
    %331 = arith.mulf %320, %303 : vector<8x16xf32>
    %332 = arith.addf %330, %331 : vector<8x16xf32>
    %cst_80 = arith.constant dense<0.000000e+00> : vector<8x48xf32>
    %333 = tpu.matmul %332, %5, %cst_80 {dimension_numbers = #tpu.dot_dimension_numbers<[1], [0], [0], [1], [0, 0, 1, 1], [], []>} : vector<8x16xf32>, vector<16x48xf32>, vector<8x48xf32> -> vector<8x48xf32>
    %334 = vector.extract_strided_slice %252 {offsets = [24, 0], sizes = [8, 16], strides = [1, 1]} : vector<64x16xf32> to vector<8x16xf32>
    %335 = vector.extract_strided_slice %333 {offsets = [0, 0], sizes = [8, 16], strides = [1, 1]} : vector<8x48xf32> to vector<8x16xf32>
    %336 = arith.addf %334, %335 : vector<8x16xf32>
    %337 = arith.negf %336 : vector<8x16xf32>
    %338 = math.exp %337 : vector<8x16xf32>
    %cst_81 = arith.constant 1.000000e+00 : f32
    %339 = vector.broadcast %cst_81 : f32 to vector<8x16xf32>
    %340 = arith.addf %339, %338 : vector<8x16xf32>
    %341 = arith.divf %339, %340 : vector<8x16xf32>
    %342 = vector.extract_strided_slice %253 {offsets = [24, 0], sizes = [8, 16], strides = [1, 1]} : vector<64x16xf32> to vector<8x16xf32>
    %343 = vector.extract_strided_slice %333 {offsets = [0, 16], sizes = [8, 16], strides = [1, 1]} : vector<8x48xf32> to vector<8x16xf32>
    %344 = arith.addf %342, %343 : vector<8x16xf32>
    %345 = arith.negf %344 : vector<8x16xf32>
    %346 = math.exp %345 : vector<8x16xf32>
    %cst_82 = arith.constant 1.000000e+00 : f32
    %347 = vector.broadcast %cst_82 : f32 to vector<8x16xf32>
    %348 = arith.addf %347, %346 : vector<8x16xf32>
    %349 = arith.divf %347, %348 : vector<8x16xf32>
    %350 = vector.extract_strided_slice %254 {offsets = [24, 0], sizes = [8, 16], strides = [1, 1]} : vector<64x16xf32> to vector<8x16xf32>
    %351 = vector.extract_strided_slice %333 {offsets = [0, 32], sizes = [8, 16], strides = [1, 1]} : vector<8x48xf32> to vector<8x16xf32>
    %352 = vector.broadcast %7 : vector<1x16xf32> to vector<8x16xf32>
    %353 = arith.addf %351, %352 : vector<8x16xf32>
    %354 = arith.mulf %341, %353 : vector<8x16xf32>
    %355 = arith.addf %350, %354 : vector<8x16xf32>
    %356 = math.tanh %355 : vector<8x16xf32>
    %cst_83 = arith.constant 1.000000e+00 : f32
    %357 = vector.broadcast %cst_83 : f32 to vector<8x16xf32>
    %358 = arith.subf %357, %349 : vector<8x16xf32>
    %359 = arith.mulf %358, %356 : vector<8x16xf32>
    %360 = arith.mulf %349, %332 : vector<8x16xf32>
    %361 = arith.addf %359, %360 : vector<8x16xf32>
    %cst_84 = arith.constant dense<0.000000e+00> : vector<8x48xf32>
    %362 = tpu.matmul %361, %5, %cst_84 {dimension_numbers = #tpu.dot_dimension_numbers<[1], [0], [0], [1], [0, 0, 1, 1], [], []>} : vector<8x16xf32>, vector<16x48xf32>, vector<8x48xf32> -> vector<8x48xf32>
    %363 = vector.extract_strided_slice %252 {offsets = [32, 0], sizes = [8, 16], strides = [1, 1]} : vector<64x16xf32> to vector<8x16xf32>
    %364 = vector.extract_strided_slice %362 {offsets = [0, 0], sizes = [8, 16], strides = [1, 1]} : vector<8x48xf32> to vector<8x16xf32>
    %365 = arith.addf %363, %364 : vector<8x16xf32>
    %366 = arith.negf %365 : vector<8x16xf32>
    %367 = math.exp %366 : vector<8x16xf32>
    %cst_85 = arith.constant 1.000000e+00 : f32
    %368 = vector.broadcast %cst_85 : f32 to vector<8x16xf32>
    %369 = arith.addf %368, %367 : vector<8x16xf32>
    %370 = arith.divf %368, %369 : vector<8x16xf32>
    %371 = vector.extract_strided_slice %253 {offsets = [32, 0], sizes = [8, 16], strides = [1, 1]} : vector<64x16xf32> to vector<8x16xf32>
    %372 = vector.extract_strided_slice %362 {offsets = [0, 16], sizes = [8, 16], strides = [1, 1]} : vector<8x48xf32> to vector<8x16xf32>
    %373 = arith.addf %371, %372 : vector<8x16xf32>
    %374 = arith.negf %373 : vector<8x16xf32>
    %375 = math.exp %374 : vector<8x16xf32>
    %cst_86 = arith.constant 1.000000e+00 : f32
    %376 = vector.broadcast %cst_86 : f32 to vector<8x16xf32>
    %377 = arith.addf %376, %375 : vector<8x16xf32>
    %378 = arith.divf %376, %377 : vector<8x16xf32>
    %379 = vector.extract_strided_slice %254 {offsets = [32, 0], sizes = [8, 16], strides = [1, 1]} : vector<64x16xf32> to vector<8x16xf32>
    %380 = vector.extract_strided_slice %362 {offsets = [0, 32], sizes = [8, 16], strides = [1, 1]} : vector<8x48xf32> to vector<8x16xf32>
    %381 = vector.broadcast %7 : vector<1x16xf32> to vector<8x16xf32>
    %382 = arith.addf %380, %381 : vector<8x16xf32>
    %383 = arith.mulf %370, %382 : vector<8x16xf32>
    %384 = arith.addf %379, %383 : vector<8x16xf32>
    %385 = math.tanh %384 : vector<8x16xf32>
    %cst_87 = arith.constant 1.000000e+00 : f32
    %386 = vector.broadcast %cst_87 : f32 to vector<8x16xf32>
    %387 = arith.subf %386, %378 : vector<8x16xf32>
    %388 = arith.mulf %387, %385 : vector<8x16xf32>
    %389 = arith.mulf %378, %361 : vector<8x16xf32>
    %390 = arith.addf %388, %389 : vector<8x16xf32>
    %cst_88 = arith.constant dense<0.000000e+00> : vector<8x48xf32>
    %391 = tpu.matmul %390, %5, %cst_88 {dimension_numbers = #tpu.dot_dimension_numbers<[1], [0], [0], [1], [0, 0, 1, 1], [], []>} : vector<8x16xf32>, vector<16x48xf32>, vector<8x48xf32> -> vector<8x48xf32>
    %392 = vector.extract_strided_slice %252 {offsets = [40, 0], sizes = [8, 16], strides = [1, 1]} : vector<64x16xf32> to vector<8x16xf32>
    %393 = vector.extract_strided_slice %391 {offsets = [0, 0], sizes = [8, 16], strides = [1, 1]} : vector<8x48xf32> to vector<8x16xf32>
    %394 = arith.addf %392, %393 : vector<8x16xf32>
    %395 = arith.negf %394 : vector<8x16xf32>
    %396 = math.exp %395 : vector<8x16xf32>
    %cst_89 = arith.constant 1.000000e+00 : f32
    %397 = vector.broadcast %cst_89 : f32 to vector<8x16xf32>
    %398 = arith.addf %397, %396 : vector<8x16xf32>
    %399 = arith.divf %397, %398 : vector<8x16xf32>
    %400 = vector.extract_strided_slice %253 {offsets = [40, 0], sizes = [8, 16], strides = [1, 1]} : vector<64x16xf32> to vector<8x16xf32>
    %401 = vector.extract_strided_slice %391 {offsets = [0, 16], sizes = [8, 16], strides = [1, 1]} : vector<8x48xf32> to vector<8x16xf32>
    %402 = arith.addf %400, %401 : vector<8x16xf32>
    %403 = arith.negf %402 : vector<8x16xf32>
    %404 = math.exp %403 : vector<8x16xf32>
    %cst_90 = arith.constant 1.000000e+00 : f32
    %405 = vector.broadcast %cst_90 : f32 to vector<8x16xf32>
    %406 = arith.addf %405, %404 : vector<8x16xf32>
    %407 = arith.divf %405, %406 : vector<8x16xf32>
    %408 = vector.extract_strided_slice %254 {offsets = [40, 0], sizes = [8, 16], strides = [1, 1]} : vector<64x16xf32> to vector<8x16xf32>
    %409 = vector.extract_strided_slice %391 {offsets = [0, 32], sizes = [8, 16], strides = [1, 1]} : vector<8x48xf32> to vector<8x16xf32>
    %410 = vector.broadcast %7 : vector<1x16xf32> to vector<8x16xf32>
    %411 = arith.addf %409, %410 : vector<8x16xf32>
    %412 = arith.mulf %399, %411 : vector<8x16xf32>
    %413 = arith.addf %408, %412 : vector<8x16xf32>
    %414 = math.tanh %413 : vector<8x16xf32>
    %cst_91 = arith.constant 1.000000e+00 : f32
    %415 = vector.broadcast %cst_91 : f32 to vector<8x16xf32>
    %416 = arith.subf %415, %407 : vector<8x16xf32>
    %417 = arith.mulf %416, %414 : vector<8x16xf32>
    %418 = arith.mulf %407, %390 : vector<8x16xf32>
    %419 = arith.addf %417, %418 : vector<8x16xf32>
    %cst_92 = arith.constant dense<0.000000e+00> : vector<8x48xf32>
    %420 = tpu.matmul %419, %5, %cst_92 {dimension_numbers = #tpu.dot_dimension_numbers<[1], [0], [0], [1], [0, 0, 1, 1], [], []>} : vector<8x16xf32>, vector<16x48xf32>, vector<8x48xf32> -> vector<8x48xf32>
    %421 = vector.extract_strided_slice %252 {offsets = [48, 0], sizes = [8, 16], strides = [1, 1]} : vector<64x16xf32> to vector<8x16xf32>
    %422 = vector.extract_strided_slice %420 {offsets = [0, 0], sizes = [8, 16], strides = [1, 1]} : vector<8x48xf32> to vector<8x16xf32>
    %423 = arith.addf %421, %422 : vector<8x16xf32>
    %424 = arith.negf %423 : vector<8x16xf32>
    %425 = math.exp %424 : vector<8x16xf32>
    %cst_93 = arith.constant 1.000000e+00 : f32
    %426 = vector.broadcast %cst_93 : f32 to vector<8x16xf32>
    %427 = arith.addf %426, %425 : vector<8x16xf32>
    %428 = arith.divf %426, %427 : vector<8x16xf32>
    %429 = vector.extract_strided_slice %253 {offsets = [48, 0], sizes = [8, 16], strides = [1, 1]} : vector<64x16xf32> to vector<8x16xf32>
    %430 = vector.extract_strided_slice %420 {offsets = [0, 16], sizes = [8, 16], strides = [1, 1]} : vector<8x48xf32> to vector<8x16xf32>
    %431 = arith.addf %429, %430 : vector<8x16xf32>
    %432 = arith.negf %431 : vector<8x16xf32>
    %433 = math.exp %432 : vector<8x16xf32>
    %cst_94 = arith.constant 1.000000e+00 : f32
    %434 = vector.broadcast %cst_94 : f32 to vector<8x16xf32>
    %435 = arith.addf %434, %433 : vector<8x16xf32>
    %436 = arith.divf %434, %435 : vector<8x16xf32>
    %437 = vector.extract_strided_slice %254 {offsets = [48, 0], sizes = [8, 16], strides = [1, 1]} : vector<64x16xf32> to vector<8x16xf32>
    %438 = vector.extract_strided_slice %420 {offsets = [0, 32], sizes = [8, 16], strides = [1, 1]} : vector<8x48xf32> to vector<8x16xf32>
    %439 = vector.broadcast %7 : vector<1x16xf32> to vector<8x16xf32>
    %440 = arith.addf %438, %439 : vector<8x16xf32>
    %441 = arith.mulf %428, %440 : vector<8x16xf32>
    %442 = arith.addf %437, %441 : vector<8x16xf32>
    %443 = math.tanh %442 : vector<8x16xf32>
    %cst_95 = arith.constant 1.000000e+00 : f32
    %444 = vector.broadcast %cst_95 : f32 to vector<8x16xf32>
    %445 = arith.subf %444, %436 : vector<8x16xf32>
    %446 = arith.mulf %445, %443 : vector<8x16xf32>
    %447 = arith.mulf %436, %419 : vector<8x16xf32>
    %448 = arith.addf %446, %447 : vector<8x16xf32>
    %cst_96 = arith.constant dense<0.000000e+00> : vector<8x48xf32>
    %449 = tpu.matmul %448, %5, %cst_96 {dimension_numbers = #tpu.dot_dimension_numbers<[1], [0], [0], [1], [0, 0, 1, 1], [], []>} : vector<8x16xf32>, vector<16x48xf32>, vector<8x48xf32> -> vector<8x48xf32>
    %450 = vector.extract_strided_slice %252 {offsets = [56, 0], sizes = [8, 16], strides = [1, 1]} : vector<64x16xf32> to vector<8x16xf32>
    %451 = vector.extract_strided_slice %449 {offsets = [0, 0], sizes = [8, 16], strides = [1, 1]} : vector<8x48xf32> to vector<8x16xf32>
    %452 = arith.addf %450, %451 : vector<8x16xf32>
    %453 = arith.negf %452 : vector<8x16xf32>
    %454 = math.exp %453 : vector<8x16xf32>
    %cst_97 = arith.constant 1.000000e+00 : f32
    %455 = vector.broadcast %cst_97 : f32 to vector<8x16xf32>
    %456 = arith.addf %455, %454 : vector<8x16xf32>
    %457 = arith.divf %455, %456 : vector<8x16xf32>
    %458 = vector.extract_strided_slice %253 {offsets = [56, 0], sizes = [8, 16], strides = [1, 1]} : vector<64x16xf32> to vector<8x16xf32>
    %459 = vector.extract_strided_slice %449 {offsets = [0, 16], sizes = [8, 16], strides = [1, 1]} : vector<8x48xf32> to vector<8x16xf32>
    %460 = arith.addf %458, %459 : vector<8x16xf32>
    %461 = arith.negf %460 : vector<8x16xf32>
    %462 = math.exp %461 : vector<8x16xf32>
    %cst_98 = arith.constant 1.000000e+00 : f32
    %463 = vector.broadcast %cst_98 : f32 to vector<8x16xf32>
    %464 = arith.addf %463, %462 : vector<8x16xf32>
    %465 = arith.divf %463, %464 : vector<8x16xf32>
    %466 = vector.extract_strided_slice %254 {offsets = [56, 0], sizes = [8, 16], strides = [1, 1]} : vector<64x16xf32> to vector<8x16xf32>
    %467 = vector.extract_strided_slice %449 {offsets = [0, 32], sizes = [8, 16], strides = [1, 1]} : vector<8x48xf32> to vector<8x16xf32>
    %468 = vector.broadcast %7 : vector<1x16xf32> to vector<8x16xf32>
    %469 = arith.addf %467, %468 : vector<8x16xf32>
    %470 = arith.mulf %457, %469 : vector<8x16xf32>
    %471 = arith.addf %466, %470 : vector<8x16xf32>
    %472 = math.tanh %471 : vector<8x16xf32>
    %cst_99 = arith.constant 1.000000e+00 : f32
    %473 = vector.broadcast %cst_99 : f32 to vector<8x16xf32>
    %474 = arith.subf %473, %465 : vector<8x16xf32>
    %475 = arith.mulf %474, %472 : vector<8x16xf32>
    %476 = arith.mulf %465, %448 : vector<8x16xf32>
    %477 = arith.addf %475, %476 : vector<8x16xf32>
    %478 = tpu.concatenate %274, %303, %332, %361, %390, %419, %448, %477 in 0 : vector<8x16xf32>, vector<8x16xf32>, vector<8x16xf32>, vector<8x16xf32>, vector<8x16xf32>, vector<8x16xf32>, vector<8x16xf32>, vector<8x16xf32> -> vector<64x16xf32>
    %479 = vector.extract_strided_slice %478 {offsets = [56, 0], sizes = [8, 16], strides = [1, 1]} : vector<64x16xf32> to vector<8x16xf32>
    %cst_100 = arith.constant dense<0.000000e+00> : vector<8x48xf32>
    %480 = tpu.matmul %479, %8, %cst_100 {dimension_numbers = #tpu.dot_dimension_numbers<[1], [0], [0], [1], [0, 0, 1, 1], [], []>} : vector<8x16xf32>, vector<16x48xf32>, vector<8x48xf32> -> vector<8x48xf32>
    %481 = vector.broadcast %10 : vector<1x48xf32> to vector<8x48xf32>
    %482 = arith.addf %480, %481 : vector<8x48xf32>
    %483 = vector.extract_strided_slice %482 {offsets = [0, 0], sizes = [8, 16], strides = [1, 1]} : vector<8x48xf32> to vector<8x16xf32>
    %484 = vector.extract_strided_slice %482 {offsets = [0, 16], sizes = [8, 16], strides = [1, 1]} : vector<8x48xf32> to vector<8x16xf32>
    %485 = vector.extract_strided_slice %482 {offsets = [0, 32], sizes = [8, 16], strides = [1, 1]} : vector<8x48xf32> to vector<8x16xf32>
    %486 = arith.negf %483 : vector<8x16xf32>
    %487 = math.exp %486 : vector<8x16xf32>
    %cst_101 = arith.constant 1.000000e+00 : f32
    %488 = vector.broadcast %cst_101 : f32 to vector<8x16xf32>
    %489 = arith.addf %488, %487 : vector<8x16xf32>
    %490 = arith.divf %488, %489 : vector<8x16xf32>
    %491 = arith.negf %484 : vector<8x16xf32>
    %492 = math.exp %491 : vector<8x16xf32>
    %cst_102 = arith.constant 1.000000e+00 : f32
    %493 = vector.broadcast %cst_102 : f32 to vector<8x16xf32>
    %494 = arith.addf %493, %492 : vector<8x16xf32>
    %495 = arith.divf %493, %494 : vector<8x16xf32>
    %496 = vector.broadcast %11 : vector<1x16xf32> to vector<8x16xf32>
    %497 = arith.mulf %490, %496 : vector<8x16xf32>
    %498 = arith.addf %485, %497 : vector<8x16xf32>
    %499 = math.tanh %498 : vector<8x16xf32>
    %cst_103 = arith.constant 1.000000e+00 : f32
    %500 = vector.broadcast %cst_103 : f32 to vector<8x16xf32>
    %501 = arith.subf %500, %495 : vector<8x16xf32>
    %502 = arith.mulf %501, %499 : vector<8x16xf32>
    %cst_104 = arith.constant dense<0.000000e+00> : vector<8x48xf32>
    %503 = tpu.matmul %502, %9, %cst_104 {dimension_numbers = #tpu.dot_dimension_numbers<[1], [0], [0], [1], [0, 0, 1, 1], [], []>} : vector<8x16xf32>, vector<16x48xf32>, vector<8x48xf32> -> vector<8x48xf32>
    %504 = vector.extract_strided_slice %503 {offsets = [0, 0], sizes = [8, 16], strides = [1, 1]} : vector<8x48xf32> to vector<8x16xf32>
    %505 = arith.addf %483, %504 : vector<8x16xf32>
    %506 = arith.negf %505 : vector<8x16xf32>
    %507 = math.exp %506 : vector<8x16xf32>
    %cst_105 = arith.constant 1.000000e+00 : f32
    %508 = vector.broadcast %cst_105 : f32 to vector<8x16xf32>
    %509 = arith.addf %508, %507 : vector<8x16xf32>
    %510 = arith.divf %508, %509 : vector<8x16xf32>
    %511 = vector.extract_strided_slice %503 {offsets = [0, 16], sizes = [8, 16], strides = [1, 1]} : vector<8x48xf32> to vector<8x16xf32>
    %512 = arith.addf %484, %511 : vector<8x16xf32>
    %513 = arith.negf %512 : vector<8x16xf32>
    %514 = math.exp %513 : vector<8x16xf32>
    %cst_106 = arith.constant 1.000000e+00 : f32
    %515 = vector.broadcast %cst_106 : f32 to vector<8x16xf32>
    %516 = arith.addf %515, %514 : vector<8x16xf32>
    %517 = arith.divf %515, %516 : vector<8x16xf32>
    %518 = vector.extract_strided_slice %503 {offsets = [0, 32], sizes = [8, 16], strides = [1, 1]} : vector<8x48xf32> to vector<8x16xf32>
    %519 = vector.broadcast %11 : vector<1x16xf32> to vector<8x16xf32>
    %520 = arith.addf %518, %519 : vector<8x16xf32>
    %521 = arith.mulf %510, %520 : vector<8x16xf32>
    %522 = arith.addf %485, %521 : vector<8x16xf32>
    %523 = math.tanh %522 : vector<8x16xf32>
    %cst_107 = arith.constant 1.000000e+00 : f32
    %524 = vector.broadcast %cst_107 : f32 to vector<8x16xf32>
    %525 = arith.subf %524, %517 : vector<8x16xf32>
    %526 = arith.mulf %525, %523 : vector<8x16xf32>
    %527 = arith.mulf %517, %502 : vector<8x16xf32>
    %528 = arith.addf %526, %527 : vector<8x16xf32>
    %cst_108 = arith.constant dense<0.000000e+00> : vector<8x48xf32>
    %529 = tpu.matmul %528, %9, %cst_108 {dimension_numbers = #tpu.dot_dimension_numbers<[1], [0], [0], [1], [0, 0, 1, 1], [], []>} : vector<8x16xf32>, vector<16x48xf32>, vector<8x48xf32> -> vector<8x48xf32>
    %530 = vector.extract_strided_slice %529 {offsets = [0, 0], sizes = [8, 16], strides = [1, 1]} : vector<8x48xf32> to vector<8x16xf32>
    %531 = arith.addf %483, %530 : vector<8x16xf32>
    %532 = arith.negf %531 : vector<8x16xf32>
    %533 = math.exp %532 : vector<8x16xf32>
    %cst_109 = arith.constant 1.000000e+00 : f32
    %534 = vector.broadcast %cst_109 : f32 to vector<8x16xf32>
    %535 = arith.addf %534, %533 : vector<8x16xf32>
    %536 = arith.divf %534, %535 : vector<8x16xf32>
    %537 = vector.extract_strided_slice %529 {offsets = [0, 16], sizes = [8, 16], strides = [1, 1]} : vector<8x48xf32> to vector<8x16xf32>
    %538 = arith.addf %484, %537 : vector<8x16xf32>
    %539 = arith.negf %538 : vector<8x16xf32>
    %540 = math.exp %539 : vector<8x16xf32>
    %cst_110 = arith.constant 1.000000e+00 : f32
    %541 = vector.broadcast %cst_110 : f32 to vector<8x16xf32>
    %542 = arith.addf %541, %540 : vector<8x16xf32>
    %543 = arith.divf %541, %542 : vector<8x16xf32>
    %544 = vector.extract_strided_slice %529 {offsets = [0, 32], sizes = [8, 16], strides = [1, 1]} : vector<8x48xf32> to vector<8x16xf32>
    %545 = vector.broadcast %11 : vector<1x16xf32> to vector<8x16xf32>
    %546 = arith.addf %544, %545 : vector<8x16xf32>
    %547 = arith.mulf %536, %546 : vector<8x16xf32>
    %548 = arith.addf %485, %547 : vector<8x16xf32>
    %549 = math.tanh %548 : vector<8x16xf32>
    %cst_111 = arith.constant 1.000000e+00 : f32
    %550 = vector.broadcast %cst_111 : f32 to vector<8x16xf32>
    %551 = arith.subf %550, %543 : vector<8x16xf32>
    %552 = arith.mulf %551, %549 : vector<8x16xf32>
    %553 = arith.mulf %543, %528 : vector<8x16xf32>
    %554 = arith.addf %552, %553 : vector<8x16xf32>
    %cst_112 = arith.constant dense<0.000000e+00> : vector<8x48xf32>
    %555 = tpu.matmul %554, %9, %cst_112 {dimension_numbers = #tpu.dot_dimension_numbers<[1], [0], [0], [1], [0, 0, 1, 1], [], []>} : vector<8x16xf32>, vector<16x48xf32>, vector<8x48xf32> -> vector<8x48xf32>
    %556 = vector.extract_strided_slice %555 {offsets = [0, 0], sizes = [8, 16], strides = [1, 1]} : vector<8x48xf32> to vector<8x16xf32>
    %557 = arith.addf %483, %556 : vector<8x16xf32>
    %558 = arith.negf %557 : vector<8x16xf32>
    %559 = math.exp %558 : vector<8x16xf32>
    %cst_113 = arith.constant 1.000000e+00 : f32
    %560 = vector.broadcast %cst_113 : f32 to vector<8x16xf32>
    %561 = arith.addf %560, %559 : vector<8x16xf32>
    %562 = arith.divf %560, %561 : vector<8x16xf32>
    %563 = vector.extract_strided_slice %555 {offsets = [0, 16], sizes = [8, 16], strides = [1, 1]} : vector<8x48xf32> to vector<8x16xf32>
    %564 = arith.addf %484, %563 : vector<8x16xf32>
    %565 = arith.negf %564 : vector<8x16xf32>
    %566 = math.exp %565 : vector<8x16xf32>
    %cst_114 = arith.constant 1.000000e+00 : f32
    %567 = vector.broadcast %cst_114 : f32 to vector<8x16xf32>
    %568 = arith.addf %567, %566 : vector<8x16xf32>
    %569 = arith.divf %567, %568 : vector<8x16xf32>
    %570 = vector.extract_strided_slice %555 {offsets = [0, 32], sizes = [8, 16], strides = [1, 1]} : vector<8x48xf32> to vector<8x16xf32>
    %571 = vector.broadcast %11 : vector<1x16xf32> to vector<8x16xf32>
    %572 = arith.addf %570, %571 : vector<8x16xf32>
    %573 = arith.mulf %562, %572 : vector<8x16xf32>
    %574 = arith.addf %485, %573 : vector<8x16xf32>
    %575 = math.tanh %574 : vector<8x16xf32>
    %cst_115 = arith.constant 1.000000e+00 : f32
    %576 = vector.broadcast %cst_115 : f32 to vector<8x16xf32>
    %577 = arith.subf %576, %569 : vector<8x16xf32>
    %578 = arith.mulf %577, %575 : vector<8x16xf32>
    %579 = arith.mulf %569, %554 : vector<8x16xf32>
    %580 = arith.addf %578, %579 : vector<8x16xf32>
    %cst_116 = arith.constant dense<0.000000e+00> : vector<8x48xf32>
    %581 = tpu.matmul %580, %9, %cst_116 {dimension_numbers = #tpu.dot_dimension_numbers<[1], [0], [0], [1], [0, 0, 1, 1], [], []>} : vector<8x16xf32>, vector<16x48xf32>, vector<8x48xf32> -> vector<8x48xf32>
    %582 = vector.extract_strided_slice %581 {offsets = [0, 0], sizes = [8, 16], strides = [1, 1]} : vector<8x48xf32> to vector<8x16xf32>
    %583 = arith.addf %483, %582 : vector<8x16xf32>
    %584 = arith.negf %583 : vector<8x16xf32>
    %585 = math.exp %584 : vector<8x16xf32>
    %cst_117 = arith.constant 1.000000e+00 : f32
    %586 = vector.broadcast %cst_117 : f32 to vector<8x16xf32>
    %587 = arith.addf %586, %585 : vector<8x16xf32>
    %588 = arith.divf %586, %587 : vector<8x16xf32>
    %589 = vector.extract_strided_slice %581 {offsets = [0, 16], sizes = [8, 16], strides = [1, 1]} : vector<8x48xf32> to vector<8x16xf32>
    %590 = arith.addf %484, %589 : vector<8x16xf32>
    %591 = arith.negf %590 : vector<8x16xf32>
    %592 = math.exp %591 : vector<8x16xf32>
    %cst_118 = arith.constant 1.000000e+00 : f32
    %593 = vector.broadcast %cst_118 : f32 to vector<8x16xf32>
    %594 = arith.addf %593, %592 : vector<8x16xf32>
    %595 = arith.divf %593, %594 : vector<8x16xf32>
    %596 = vector.extract_strided_slice %581 {offsets = [0, 32], sizes = [8, 16], strides = [1, 1]} : vector<8x48xf32> to vector<8x16xf32>
    %597 = vector.broadcast %11 : vector<1x16xf32> to vector<8x16xf32>
    %598 = arith.addf %596, %597 : vector<8x16xf32>
    %599 = arith.mulf %588, %598 : vector<8x16xf32>
    %600 = arith.addf %485, %599 : vector<8x16xf32>
    %601 = math.tanh %600 : vector<8x16xf32>
    %cst_119 = arith.constant 1.000000e+00 : f32
    %602 = vector.broadcast %cst_119 : f32 to vector<8x16xf32>
    %603 = arith.subf %602, %595 : vector<8x16xf32>
    %604 = arith.mulf %603, %601 : vector<8x16xf32>
    %605 = arith.mulf %595, %580 : vector<8x16xf32>
    %606 = arith.addf %604, %605 : vector<8x16xf32>
    %cst_120 = arith.constant dense<0.000000e+00> : vector<8x48xf32>
    %607 = tpu.matmul %606, %9, %cst_120 {dimension_numbers = #tpu.dot_dimension_numbers<[1], [0], [0], [1], [0, 0, 1, 1], [], []>} : vector<8x16xf32>, vector<16x48xf32>, vector<8x48xf32> -> vector<8x48xf32>
    %608 = vector.extract_strided_slice %607 {offsets = [0, 0], sizes = [8, 16], strides = [1, 1]} : vector<8x48xf32> to vector<8x16xf32>
    %609 = arith.addf %483, %608 : vector<8x16xf32>
    %610 = arith.negf %609 : vector<8x16xf32>
    %611 = math.exp %610 : vector<8x16xf32>
    %cst_121 = arith.constant 1.000000e+00 : f32
    %612 = vector.broadcast %cst_121 : f32 to vector<8x16xf32>
    %613 = arith.addf %612, %611 : vector<8x16xf32>
    %614 = arith.divf %612, %613 : vector<8x16xf32>
    %615 = vector.extract_strided_slice %607 {offsets = [0, 16], sizes = [8, 16], strides = [1, 1]} : vector<8x48xf32> to vector<8x16xf32>
    %616 = arith.addf %484, %615 : vector<8x16xf32>
    %617 = arith.negf %616 : vector<8x16xf32>
    %618 = math.exp %617 : vector<8x16xf32>
    %cst_122 = arith.constant 1.000000e+00 : f32
    %619 = vector.broadcast %cst_122 : f32 to vector<8x16xf32>
    %620 = arith.addf %619, %618 : vector<8x16xf32>
    %621 = arith.divf %619, %620 : vector<8x16xf32>
    %622 = vector.extract_strided_slice %607 {offsets = [0, 32], sizes = [8, 16], strides = [1, 1]} : vector<8x48xf32> to vector<8x16xf32>
    %623 = vector.broadcast %11 : vector<1x16xf32> to vector<8x16xf32>
    %624 = arith.addf %622, %623 : vector<8x16xf32>
    %625 = arith.mulf %614, %624 : vector<8x16xf32>
    %626 = arith.addf %485, %625 : vector<8x16xf32>
    %627 = math.tanh %626 : vector<8x16xf32>
    %cst_123 = arith.constant 1.000000e+00 : f32
    %628 = vector.broadcast %cst_123 : f32 to vector<8x16xf32>
    %629 = arith.subf %628, %621 : vector<8x16xf32>
    %630 = arith.mulf %629, %627 : vector<8x16xf32>
    %631 = arith.mulf %621, %606 : vector<8x16xf32>
    %632 = arith.addf %630, %631 : vector<8x16xf32>
    %cst_124 = arith.constant dense<0.000000e+00> : vector<8x48xf32>
    %633 = tpu.matmul %632, %9, %cst_124 {dimension_numbers = #tpu.dot_dimension_numbers<[1], [0], [0], [1], [0, 0, 1, 1], [], []>} : vector<8x16xf32>, vector<16x48xf32>, vector<8x48xf32> -> vector<8x48xf32>
    %634 = vector.extract_strided_slice %633 {offsets = [0, 0], sizes = [8, 16], strides = [1, 1]} : vector<8x48xf32> to vector<8x16xf32>
    %635 = arith.addf %483, %634 : vector<8x16xf32>
    %636 = arith.negf %635 : vector<8x16xf32>
    %637 = math.exp %636 : vector<8x16xf32>
    %cst_125 = arith.constant 1.000000e+00 : f32
    %638 = vector.broadcast %cst_125 : f32 to vector<8x16xf32>
    %639 = arith.addf %638, %637 : vector<8x16xf32>
    %640 = arith.divf %638, %639 : vector<8x16xf32>
    %641 = vector.extract_strided_slice %633 {offsets = [0, 16], sizes = [8, 16], strides = [1, 1]} : vector<8x48xf32> to vector<8x16xf32>
    %642 = arith.addf %484, %641 : vector<8x16xf32>
    %643 = arith.negf %642 : vector<8x16xf32>
    %644 = math.exp %643 : vector<8x16xf32>
    %cst_126 = arith.constant 1.000000e+00 : f32
    %645 = vector.broadcast %cst_126 : f32 to vector<8x16xf32>
    %646 = arith.addf %645, %644 : vector<8x16xf32>
    %647 = arith.divf %645, %646 : vector<8x16xf32>
    %648 = vector.extract_strided_slice %633 {offsets = [0, 32], sizes = [8, 16], strides = [1, 1]} : vector<8x48xf32> to vector<8x16xf32>
    %649 = vector.broadcast %11 : vector<1x16xf32> to vector<8x16xf32>
    %650 = arith.addf %648, %649 : vector<8x16xf32>
    %651 = arith.mulf %640, %650 : vector<8x16xf32>
    %652 = arith.addf %485, %651 : vector<8x16xf32>
    %653 = math.tanh %652 : vector<8x16xf32>
    %cst_127 = arith.constant 1.000000e+00 : f32
    %654 = vector.broadcast %cst_127 : f32 to vector<8x16xf32>
    %655 = arith.subf %654, %647 : vector<8x16xf32>
    %656 = arith.mulf %655, %653 : vector<8x16xf32>
    %657 = arith.mulf %647, %632 : vector<8x16xf32>
    %658 = arith.addf %656, %657 : vector<8x16xf32>
    %cst_128 = arith.constant dense<0.000000e+00> : vector<8x48xf32>
    %659 = tpu.matmul %658, %9, %cst_128 {dimension_numbers = #tpu.dot_dimension_numbers<[1], [0], [0], [1], [0, 0, 1, 1], [], []>} : vector<8x16xf32>, vector<16x48xf32>, vector<8x48xf32> -> vector<8x48xf32>
    %660 = vector.extract_strided_slice %659 {offsets = [0, 0], sizes = [8, 16], strides = [1, 1]} : vector<8x48xf32> to vector<8x16xf32>
    %661 = arith.addf %483, %660 : vector<8x16xf32>
    %662 = arith.negf %661 : vector<8x16xf32>
    %663 = math.exp %662 : vector<8x16xf32>
    %cst_129 = arith.constant 1.000000e+00 : f32
    %664 = vector.broadcast %cst_129 : f32 to vector<8x16xf32>
    %665 = arith.addf %664, %663 : vector<8x16xf32>
    %666 = arith.divf %664, %665 : vector<8x16xf32>
    %667 = vector.extract_strided_slice %659 {offsets = [0, 16], sizes = [8, 16], strides = [1, 1]} : vector<8x48xf32> to vector<8x16xf32>
    %668 = arith.addf %484, %667 : vector<8x16xf32>
    %669 = arith.negf %668 : vector<8x16xf32>
    %670 = math.exp %669 : vector<8x16xf32>
    %cst_130 = arith.constant 1.000000e+00 : f32
    %671 = vector.broadcast %cst_130 : f32 to vector<8x16xf32>
    %672 = arith.addf %671, %670 : vector<8x16xf32>
    %673 = arith.divf %671, %672 : vector<8x16xf32>
    %674 = vector.extract_strided_slice %659 {offsets = [0, 32], sizes = [8, 16], strides = [1, 1]} : vector<8x48xf32> to vector<8x16xf32>
    %675 = vector.broadcast %11 : vector<1x16xf32> to vector<8x16xf32>
    %676 = arith.addf %674, %675 : vector<8x16xf32>
    %677 = arith.mulf %666, %676 : vector<8x16xf32>
    %678 = arith.addf %485, %677 : vector<8x16xf32>
    %679 = math.tanh %678 : vector<8x16xf32>
    %cst_131 = arith.constant 1.000000e+00 : f32
    %680 = vector.broadcast %cst_131 : f32 to vector<8x16xf32>
    %681 = arith.subf %680, %673 : vector<8x16xf32>
    %682 = arith.mulf %681, %679 : vector<8x16xf32>
    %683 = arith.mulf %673, %658 : vector<8x16xf32>
    %684 = arith.addf %682, %683 : vector<8x16xf32>
    %685 = tpu.concatenate %502, %528, %554, %580, %606, %632, %658, %684 in 0 : vector<8x16xf32>, vector<8x16xf32>, vector<8x16xf32>, vector<8x16xf32>, vector<8x16xf32>, vector<8x16xf32>, vector<8x16xf32>, vector<8x16xf32> -> vector<64x16xf32>
    %cst_132 = arith.constant dense<0.000000e+00> : vector<64x96xf32>
    %686 = tpu.matmul %685, %12, %cst_132 {dimension_numbers = #tpu.dot_dimension_numbers<[1], [0], [0], [1], [0, 0, 1, 1], [], []>} : vector<64x16xf32>, vector<16x96xf32>, vector<64x96xf32> -> vector<64x96xf32>
    %687 = vector.broadcast %14 : vector<1x96xf32> to vector<64x96xf32>
    %688 = arith.addf %686, %687 : vector<64x96xf32>
    %689 = vector.extract_strided_slice %688 {offsets = [0, 0], sizes = [64, 32], strides = [1, 1]} : vector<64x96xf32> to vector<64x32xf32>
    %690 = vector.extract_strided_slice %688 {offsets = [0, 32], sizes = [64, 32], strides = [1, 1]} : vector<64x96xf32> to vector<64x32xf32>
    %691 = vector.extract_strided_slice %688 {offsets = [0, 64], sizes = [64, 32], strides = [1, 1]} : vector<64x96xf32> to vector<64x32xf32>
    %692 = vector.extract_strided_slice %689 {offsets = [0, 0], sizes = [8, 32], strides = [1, 1]} : vector<64x32xf32> to vector<8x32xf32>
    %693 = arith.negf %692 : vector<8x32xf32>
    %694 = math.exp %693 : vector<8x32xf32>
    %cst_133 = arith.constant 1.000000e+00 : f32
    %695 = vector.broadcast %cst_133 : f32 to vector<8x32xf32>
    %696 = arith.addf %695, %694 : vector<8x32xf32>
    %697 = arith.divf %695, %696 : vector<8x32xf32>
    %698 = vector.extract_strided_slice %690 {offsets = [0, 0], sizes = [8, 32], strides = [1, 1]} : vector<64x32xf32> to vector<8x32xf32>
    %699 = arith.negf %698 : vector<8x32xf32>
    %700 = math.exp %699 : vector<8x32xf32>
    %cst_134 = arith.constant 1.000000e+00 : f32
    %701 = vector.broadcast %cst_134 : f32 to vector<8x32xf32>
    %702 = arith.addf %701, %700 : vector<8x32xf32>
    %703 = arith.divf %701, %702 : vector<8x32xf32>
    %704 = vector.extract_strided_slice %691 {offsets = [0, 0], sizes = [8, 32], strides = [1, 1]} : vector<64x32xf32> to vector<8x32xf32>
    %705 = vector.broadcast %15 : vector<1x32xf32> to vector<8x32xf32>
    %706 = arith.mulf %697, %705 : vector<8x32xf32>
    %707 = arith.addf %704, %706 : vector<8x32xf32>
    %708 = math.tanh %707 : vector<8x32xf32>
    %cst_135 = arith.constant 1.000000e+00 : f32
    %709 = vector.broadcast %cst_135 : f32 to vector<8x32xf32>
    %710 = arith.subf %709, %703 : vector<8x32xf32>
    %711 = arith.mulf %710, %708 : vector<8x32xf32>
    %cst_136 = arith.constant dense<0.000000e+00> : vector<8x96xf32>
    %712 = tpu.matmul %711, %13, %cst_136 {dimension_numbers = #tpu.dot_dimension_numbers<[1], [0], [0], [1], [0, 0, 1, 1], [], []>} : vector<8x32xf32>, vector<32x96xf32>, vector<8x96xf32> -> vector<8x96xf32>
    %713 = vector.extract_strided_slice %689 {offsets = [8, 0], sizes = [8, 32], strides = [1, 1]} : vector<64x32xf32> to vector<8x32xf32>
    %714 = vector.extract_strided_slice %712 {offsets = [0, 0], sizes = [8, 32], strides = [1, 1]} : vector<8x96xf32> to vector<8x32xf32>
    %715 = arith.addf %713, %714 : vector<8x32xf32>
    %716 = arith.negf %715 : vector<8x32xf32>
    %717 = math.exp %716 : vector<8x32xf32>
    %cst_137 = arith.constant 1.000000e+00 : f32
    %718 = vector.broadcast %cst_137 : f32 to vector<8x32xf32>
    %719 = arith.addf %718, %717 : vector<8x32xf32>
    %720 = arith.divf %718, %719 : vector<8x32xf32>
    %721 = vector.extract_strided_slice %690 {offsets = [8, 0], sizes = [8, 32], strides = [1, 1]} : vector<64x32xf32> to vector<8x32xf32>
    %722 = vector.extract_strided_slice %712 {offsets = [0, 32], sizes = [8, 32], strides = [1, 1]} : vector<8x96xf32> to vector<8x32xf32>
    %723 = arith.addf %721, %722 : vector<8x32xf32>
    %724 = arith.negf %723 : vector<8x32xf32>
    %725 = math.exp %724 : vector<8x32xf32>
    %cst_138 = arith.constant 1.000000e+00 : f32
    %726 = vector.broadcast %cst_138 : f32 to vector<8x32xf32>
    %727 = arith.addf %726, %725 : vector<8x32xf32>
    %728 = arith.divf %726, %727 : vector<8x32xf32>
    %729 = vector.extract_strided_slice %691 {offsets = [8, 0], sizes = [8, 32], strides = [1, 1]} : vector<64x32xf32> to vector<8x32xf32>
    %730 = vector.extract_strided_slice %712 {offsets = [0, 64], sizes = [8, 32], strides = [1, 1]} : vector<8x96xf32> to vector<8x32xf32>
    %731 = vector.broadcast %15 : vector<1x32xf32> to vector<8x32xf32>
    %732 = arith.addf %730, %731 : vector<8x32xf32>
    %733 = arith.mulf %720, %732 : vector<8x32xf32>
    %734 = arith.addf %729, %733 : vector<8x32xf32>
    %735 = math.tanh %734 : vector<8x32xf32>
    %cst_139 = arith.constant 1.000000e+00 : f32
    %736 = vector.broadcast %cst_139 : f32 to vector<8x32xf32>
    %737 = arith.subf %736, %728 : vector<8x32xf32>
    %738 = arith.mulf %737, %735 : vector<8x32xf32>
    %739 = arith.mulf %728, %711 : vector<8x32xf32>
    %740 = arith.addf %738, %739 : vector<8x32xf32>
    %cst_140 = arith.constant dense<0.000000e+00> : vector<8x96xf32>
    %741 = tpu.matmul %740, %13, %cst_140 {dimension_numbers = #tpu.dot_dimension_numbers<[1], [0], [0], [1], [0, 0, 1, 1], [], []>} : vector<8x32xf32>, vector<32x96xf32>, vector<8x96xf32> -> vector<8x96xf32>
    %742 = vector.extract_strided_slice %689 {offsets = [16, 0], sizes = [8, 32], strides = [1, 1]} : vector<64x32xf32> to vector<8x32xf32>
    %743 = vector.extract_strided_slice %741 {offsets = [0, 0], sizes = [8, 32], strides = [1, 1]} : vector<8x96xf32> to vector<8x32xf32>
    %744 = arith.addf %742, %743 : vector<8x32xf32>
    %745 = arith.negf %744 : vector<8x32xf32>
    %746 = math.exp %745 : vector<8x32xf32>
    %cst_141 = arith.constant 1.000000e+00 : f32
    %747 = vector.broadcast %cst_141 : f32 to vector<8x32xf32>
    %748 = arith.addf %747, %746 : vector<8x32xf32>
    %749 = arith.divf %747, %748 : vector<8x32xf32>
    %750 = vector.extract_strided_slice %690 {offsets = [16, 0], sizes = [8, 32], strides = [1, 1]} : vector<64x32xf32> to vector<8x32xf32>
    %751 = vector.extract_strided_slice %741 {offsets = [0, 32], sizes = [8, 32], strides = [1, 1]} : vector<8x96xf32> to vector<8x32xf32>
    %752 = arith.addf %750, %751 : vector<8x32xf32>
    %753 = arith.negf %752 : vector<8x32xf32>
    %754 = math.exp %753 : vector<8x32xf32>
    %cst_142 = arith.constant 1.000000e+00 : f32
    %755 = vector.broadcast %cst_142 : f32 to vector<8x32xf32>
    %756 = arith.addf %755, %754 : vector<8x32xf32>
    %757 = arith.divf %755, %756 : vector<8x32xf32>
    %758 = vector.extract_strided_slice %691 {offsets = [16, 0], sizes = [8, 32], strides = [1, 1]} : vector<64x32xf32> to vector<8x32xf32>
    %759 = vector.extract_strided_slice %741 {offsets = [0, 64], sizes = [8, 32], strides = [1, 1]} : vector<8x96xf32> to vector<8x32xf32>
    %760 = vector.broadcast %15 : vector<1x32xf32> to vector<8x32xf32>
    %761 = arith.addf %759, %760 : vector<8x32xf32>
    %762 = arith.mulf %749, %761 : vector<8x32xf32>
    %763 = arith.addf %758, %762 : vector<8x32xf32>
    %764 = math.tanh %763 : vector<8x32xf32>
    %cst_143 = arith.constant 1.000000e+00 : f32
    %765 = vector.broadcast %cst_143 : f32 to vector<8x32xf32>
    %766 = arith.subf %765, %757 : vector<8x32xf32>
    %767 = arith.mulf %766, %764 : vector<8x32xf32>
    %768 = arith.mulf %757, %740 : vector<8x32xf32>
    %769 = arith.addf %767, %768 : vector<8x32xf32>
    %cst_144 = arith.constant dense<0.000000e+00> : vector<8x96xf32>
    %770 = tpu.matmul %769, %13, %cst_144 {dimension_numbers = #tpu.dot_dimension_numbers<[1], [0], [0], [1], [0, 0, 1, 1], [], []>} : vector<8x32xf32>, vector<32x96xf32>, vector<8x96xf32> -> vector<8x96xf32>
    %771 = vector.extract_strided_slice %689 {offsets = [24, 0], sizes = [8, 32], strides = [1, 1]} : vector<64x32xf32> to vector<8x32xf32>
    %772 = vector.extract_strided_slice %770 {offsets = [0, 0], sizes = [8, 32], strides = [1, 1]} : vector<8x96xf32> to vector<8x32xf32>
    %773 = arith.addf %771, %772 : vector<8x32xf32>
    %774 = arith.negf %773 : vector<8x32xf32>
    %775 = math.exp %774 : vector<8x32xf32>
    %cst_145 = arith.constant 1.000000e+00 : f32
    %776 = vector.broadcast %cst_145 : f32 to vector<8x32xf32>
    %777 = arith.addf %776, %775 : vector<8x32xf32>
    %778 = arith.divf %776, %777 : vector<8x32xf32>
    %779 = vector.extract_strided_slice %690 {offsets = [24, 0], sizes = [8, 32], strides = [1, 1]} : vector<64x32xf32> to vector<8x32xf32>
    %780 = vector.extract_strided_slice %770 {offsets = [0, 32], sizes = [8, 32], strides = [1, 1]} : vector<8x96xf32> to vector<8x32xf32>
    %781 = arith.addf %779, %780 : vector<8x32xf32>
    %782 = arith.negf %781 : vector<8x32xf32>
    %783 = math.exp %782 : vector<8x32xf32>
    %cst_146 = arith.constant 1.000000e+00 : f32
    %784 = vector.broadcast %cst_146 : f32 to vector<8x32xf32>
    %785 = arith.addf %784, %783 : vector<8x32xf32>
    %786 = arith.divf %784, %785 : vector<8x32xf32>
    %787 = vector.extract_strided_slice %691 {offsets = [24, 0], sizes = [8, 32], strides = [1, 1]} : vector<64x32xf32> to vector<8x32xf32>
    %788 = vector.extract_strided_slice %770 {offsets = [0, 64], sizes = [8, 32], strides = [1, 1]} : vector<8x96xf32> to vector<8x32xf32>
    %789 = vector.broadcast %15 : vector<1x32xf32> to vector<8x32xf32>
    %790 = arith.addf %788, %789 : vector<8x32xf32>
    %791 = arith.mulf %778, %790 : vector<8x32xf32>
    %792 = arith.addf %787, %791 : vector<8x32xf32>
    %793 = math.tanh %792 : vector<8x32xf32>
    %cst_147 = arith.constant 1.000000e+00 : f32
    %794 = vector.broadcast %cst_147 : f32 to vector<8x32xf32>
    %795 = arith.subf %794, %786 : vector<8x32xf32>
    %796 = arith.mulf %795, %793 : vector<8x32xf32>
    %797 = arith.mulf %786, %769 : vector<8x32xf32>
    %798 = arith.addf %796, %797 : vector<8x32xf32>
    %cst_148 = arith.constant dense<0.000000e+00> : vector<8x96xf32>
    %799 = tpu.matmul %798, %13, %cst_148 {dimension_numbers = #tpu.dot_dimension_numbers<[1], [0], [0], [1], [0, 0, 1, 1], [], []>} : vector<8x32xf32>, vector<32x96xf32>, vector<8x96xf32> -> vector<8x96xf32>
    %800 = vector.extract_strided_slice %689 {offsets = [32, 0], sizes = [8, 32], strides = [1, 1]} : vector<64x32xf32> to vector<8x32xf32>
    %801 = vector.extract_strided_slice %799 {offsets = [0, 0], sizes = [8, 32], strides = [1, 1]} : vector<8x96xf32> to vector<8x32xf32>
    %802 = arith.addf %800, %801 : vector<8x32xf32>
    %803 = arith.negf %802 : vector<8x32xf32>
    %804 = math.exp %803 : vector<8x32xf32>
    %cst_149 = arith.constant 1.000000e+00 : f32
    %805 = vector.broadcast %cst_149 : f32 to vector<8x32xf32>
    %806 = arith.addf %805, %804 : vector<8x32xf32>
    %807 = arith.divf %805, %806 : vector<8x32xf32>
    %808 = vector.extract_strided_slice %690 {offsets = [32, 0], sizes = [8, 32], strides = [1, 1]} : vector<64x32xf32> to vector<8x32xf32>
    %809 = vector.extract_strided_slice %799 {offsets = [0, 32], sizes = [8, 32], strides = [1, 1]} : vector<8x96xf32> to vector<8x32xf32>
    %810 = arith.addf %808, %809 : vector<8x32xf32>
    %811 = arith.negf %810 : vector<8x32xf32>
    %812 = math.exp %811 : vector<8x32xf32>
    %cst_150 = arith.constant 1.000000e+00 : f32
    %813 = vector.broadcast %cst_150 : f32 to vector<8x32xf32>
    %814 = arith.addf %813, %812 : vector<8x32xf32>
    %815 = arith.divf %813, %814 : vector<8x32xf32>
    %816 = vector.extract_strided_slice %691 {offsets = [32, 0], sizes = [8, 32], strides = [1, 1]} : vector<64x32xf32> to vector<8x32xf32>
    %817 = vector.extract_strided_slice %799 {offsets = [0, 64], sizes = [8, 32], strides = [1, 1]} : vector<8x96xf32> to vector<8x32xf32>
    %818 = vector.broadcast %15 : vector<1x32xf32> to vector<8x32xf32>
    %819 = arith.addf %817, %818 : vector<8x32xf32>
    %820 = arith.mulf %807, %819 : vector<8x32xf32>
    %821 = arith.addf %816, %820 : vector<8x32xf32>
    %822 = math.tanh %821 : vector<8x32xf32>
    %cst_151 = arith.constant 1.000000e+00 : f32
    %823 = vector.broadcast %cst_151 : f32 to vector<8x32xf32>
    %824 = arith.subf %823, %815 : vector<8x32xf32>
    %825 = arith.mulf %824, %822 : vector<8x32xf32>
    %826 = arith.mulf %815, %798 : vector<8x32xf32>
    %827 = arith.addf %825, %826 : vector<8x32xf32>
    %cst_152 = arith.constant dense<0.000000e+00> : vector<8x96xf32>
    %828 = tpu.matmul %827, %13, %cst_152 {dimension_numbers = #tpu.dot_dimension_numbers<[1], [0], [0], [1], [0, 0, 1, 1], [], []>} : vector<8x32xf32>, vector<32x96xf32>, vector<8x96xf32> -> vector<8x96xf32>
    %829 = vector.extract_strided_slice %689 {offsets = [40, 0], sizes = [8, 32], strides = [1, 1]} : vector<64x32xf32> to vector<8x32xf32>
    %830 = vector.extract_strided_slice %828 {offsets = [0, 0], sizes = [8, 32], strides = [1, 1]} : vector<8x96xf32> to vector<8x32xf32>
    %831 = arith.addf %829, %830 : vector<8x32xf32>
    %832 = arith.negf %831 : vector<8x32xf32>
    %833 = math.exp %832 : vector<8x32xf32>
    %cst_153 = arith.constant 1.000000e+00 : f32
    %834 = vector.broadcast %cst_153 : f32 to vector<8x32xf32>
    %835 = arith.addf %834, %833 : vector<8x32xf32>
    %836 = arith.divf %834, %835 : vector<8x32xf32>
    %837 = vector.extract_strided_slice %690 {offsets = [40, 0], sizes = [8, 32], strides = [1, 1]} : vector<64x32xf32> to vector<8x32xf32>
    %838 = vector.extract_strided_slice %828 {offsets = [0, 32], sizes = [8, 32], strides = [1, 1]} : vector<8x96xf32> to vector<8x32xf32>
    %839 = arith.addf %837, %838 : vector<8x32xf32>
    %840 = arith.negf %839 : vector<8x32xf32>
    %841 = math.exp %840 : vector<8x32xf32>
    %cst_154 = arith.constant 1.000000e+00 : f32
    %842 = vector.broadcast %cst_154 : f32 to vector<8x32xf32>
    %843 = arith.addf %842, %841 : vector<8x32xf32>
    %844 = arith.divf %842, %843 : vector<8x32xf32>
    %845 = vector.extract_strided_slice %691 {offsets = [40, 0], sizes = [8, 32], strides = [1, 1]} : vector<64x32xf32> to vector<8x32xf32>
    %846 = vector.extract_strided_slice %828 {offsets = [0, 64], sizes = [8, 32], strides = [1, 1]} : vector<8x96xf32> to vector<8x32xf32>
    %847 = vector.broadcast %15 : vector<1x32xf32> to vector<8x32xf32>
    %848 = arith.addf %846, %847 : vector<8x32xf32>
    %849 = arith.mulf %836, %848 : vector<8x32xf32>
    %850 = arith.addf %845, %849 : vector<8x32xf32>
    %851 = math.tanh %850 : vector<8x32xf32>
    %cst_155 = arith.constant 1.000000e+00 : f32
    %852 = vector.broadcast %cst_155 : f32 to vector<8x32xf32>
    %853 = arith.subf %852, %844 : vector<8x32xf32>
    %854 = arith.mulf %853, %851 : vector<8x32xf32>
    %855 = arith.mulf %844, %827 : vector<8x32xf32>
    %856 = arith.addf %854, %855 : vector<8x32xf32>
    %cst_156 = arith.constant dense<0.000000e+00> : vector<8x96xf32>
    %857 = tpu.matmul %856, %13, %cst_156 {dimension_numbers = #tpu.dot_dimension_numbers<[1], [0], [0], [1], [0, 0, 1, 1], [], []>} : vector<8x32xf32>, vector<32x96xf32>, vector<8x96xf32> -> vector<8x96xf32>
    %858 = vector.extract_strided_slice %689 {offsets = [48, 0], sizes = [8, 32], strides = [1, 1]} : vector<64x32xf32> to vector<8x32xf32>
    %859 = vector.extract_strided_slice %857 {offsets = [0, 0], sizes = [8, 32], strides = [1, 1]} : vector<8x96xf32> to vector<8x32xf32>
    %860 = arith.addf %858, %859 : vector<8x32xf32>
    %861 = arith.negf %860 : vector<8x32xf32>
    %862 = math.exp %861 : vector<8x32xf32>
    %cst_157 = arith.constant 1.000000e+00 : f32
    %863 = vector.broadcast %cst_157 : f32 to vector<8x32xf32>
    %864 = arith.addf %863, %862 : vector<8x32xf32>
    %865 = arith.divf %863, %864 : vector<8x32xf32>
    %866 = vector.extract_strided_slice %690 {offsets = [48, 0], sizes = [8, 32], strides = [1, 1]} : vector<64x32xf32> to vector<8x32xf32>
    %867 = vector.extract_strided_slice %857 {offsets = [0, 32], sizes = [8, 32], strides = [1, 1]} : vector<8x96xf32> to vector<8x32xf32>
    %868 = arith.addf %866, %867 : vector<8x32xf32>
    %869 = arith.negf %868 : vector<8x32xf32>
    %870 = math.exp %869 : vector<8x32xf32>
    %cst_158 = arith.constant 1.000000e+00 : f32
    %871 = vector.broadcast %cst_158 : f32 to vector<8x32xf32>
    %872 = arith.addf %871, %870 : vector<8x32xf32>
    %873 = arith.divf %871, %872 : vector<8x32xf32>
    %874 = vector.extract_strided_slice %691 {offsets = [48, 0], sizes = [8, 32], strides = [1, 1]} : vector<64x32xf32> to vector<8x32xf32>
    %875 = vector.extract_strided_slice %857 {offsets = [0, 64], sizes = [8, 32], strides = [1, 1]} : vector<8x96xf32> to vector<8x32xf32>
    %876 = vector.broadcast %15 : vector<1x32xf32> to vector<8x32xf32>
    %877 = arith.addf %875, %876 : vector<8x32xf32>
    %878 = arith.mulf %865, %877 : vector<8x32xf32>
    %879 = arith.addf %874, %878 : vector<8x32xf32>
    %880 = math.tanh %879 : vector<8x32xf32>
    %cst_159 = arith.constant 1.000000e+00 : f32
    %881 = vector.broadcast %cst_159 : f32 to vector<8x32xf32>
    %882 = arith.subf %881, %873 : vector<8x32xf32>
    %883 = arith.mulf %882, %880 : vector<8x32xf32>
    %884 = arith.mulf %873, %856 : vector<8x32xf32>
    %885 = arith.addf %883, %884 : vector<8x32xf32>
    %cst_160 = arith.constant dense<0.000000e+00> : vector<8x96xf32>
    %886 = tpu.matmul %885, %13, %cst_160 {dimension_numbers = #tpu.dot_dimension_numbers<[1], [0], [0], [1], [0, 0, 1, 1], [], []>} : vector<8x32xf32>, vector<32x96xf32>, vector<8x96xf32> -> vector<8x96xf32>
    %887 = vector.extract_strided_slice %689 {offsets = [56, 0], sizes = [8, 32], strides = [1, 1]} : vector<64x32xf32> to vector<8x32xf32>
    %888 = vector.extract_strided_slice %886 {offsets = [0, 0], sizes = [8, 32], strides = [1, 1]} : vector<8x96xf32> to vector<8x32xf32>
    %889 = arith.addf %887, %888 : vector<8x32xf32>
    %890 = arith.negf %889 : vector<8x32xf32>
    %891 = math.exp %890 : vector<8x32xf32>
    %cst_161 = arith.constant 1.000000e+00 : f32
    %892 = vector.broadcast %cst_161 : f32 to vector<8x32xf32>
    %893 = arith.addf %892, %891 : vector<8x32xf32>
    %894 = arith.divf %892, %893 : vector<8x32xf32>
    %895 = vector.extract_strided_slice %690 {offsets = [56, 0], sizes = [8, 32], strides = [1, 1]} : vector<64x32xf32> to vector<8x32xf32>
    %896 = vector.extract_strided_slice %886 {offsets = [0, 32], sizes = [8, 32], strides = [1, 1]} : vector<8x96xf32> to vector<8x32xf32>
    %897 = arith.addf %895, %896 : vector<8x32xf32>
    %898 = arith.negf %897 : vector<8x32xf32>
    %899 = math.exp %898 : vector<8x32xf32>
    %cst_162 = arith.constant 1.000000e+00 : f32
    %900 = vector.broadcast %cst_162 : f32 to vector<8x32xf32>
    %901 = arith.addf %900, %899 : vector<8x32xf32>
    %902 = arith.divf %900, %901 : vector<8x32xf32>
    %903 = vector.extract_strided_slice %691 {offsets = [56, 0], sizes = [8, 32], strides = [1, 1]} : vector<64x32xf32> to vector<8x32xf32>
    %904 = vector.extract_strided_slice %886 {offsets = [0, 64], sizes = [8, 32], strides = [1, 1]} : vector<8x96xf32> to vector<8x32xf32>
    %905 = vector.broadcast %15 : vector<1x32xf32> to vector<8x32xf32>
    %906 = arith.addf %904, %905 : vector<8x32xf32>
    %907 = arith.mulf %894, %906 : vector<8x32xf32>
    %908 = arith.addf %903, %907 : vector<8x32xf32>
    %909 = math.tanh %908 : vector<8x32xf32>
    %cst_163 = arith.constant 1.000000e+00 : f32
    %910 = vector.broadcast %cst_163 : f32 to vector<8x32xf32>
    %911 = arith.subf %910, %902 : vector<8x32xf32>
    %912 = arith.mulf %911, %909 : vector<8x32xf32>
    %913 = arith.mulf %902, %885 : vector<8x32xf32>
    %914 = arith.addf %912, %913 : vector<8x32xf32>
    %915 = tpu.concatenate %711, %740, %769, %798, %827, %856, %885, %914 in 0 : vector<8x32xf32>, vector<8x32xf32>, vector<8x32xf32>, vector<8x32xf32>, vector<8x32xf32>, vector<8x32xf32>, vector<8x32xf32>, vector<8x32xf32> -> vector<64x32xf32>
    %cst_164 = arith.constant dense<0.000000e+00> : vector<64x4xf32>
    %916 = tpu.matmul %915, %16, %cst_164 {dimension_numbers = #tpu.dot_dimension_numbers<[1], [0], [0], [1], [0, 0, 1, 1], [], []>} : vector<64x32xf32>, vector<32x4xf32>, vector<64x4xf32> -> vector<64x4xf32>
    %917 = vector.broadcast %17 : vector<1x4xf32> to vector<64x4xf32>
    %918 = arith.addf %916, %917 : vector<64x4xf32>
    %c0_165 = arith.constant 0 : index
    %c0_166 = arith.constant 0 : index
    %919 = vector.load %arg19[%c0_165, %c0_166] : memref<64x4xf32, #tpu.memory_space<vmem>>, vector<64x4xf32>
    tpu.vector_store %arg19[%c0_165, %c0_166], %918 {strides = array<i32>} : memref<64x4xf32, #tpu.memory_space<vmem>>, vector<64x4xf32>,
    return
  }
}

</mosaic_0001>

<bundles_post_ra>
// kernel: lstm_ae_forward.1
= control target key start
LH: loop header
LB: loop body
LE: loop exit
PB: predicated region body
PF: predicated region fallthrough
CT: control target
= control target key end

     0   :  { %vm135_vm0 = vcmask 1043456   ;;  %vm110_vm1 = vcmask 31744   ;;  %s4443_s29 = smov 64   ;;  %v4444_v17 = vmov 0.0   ;;  %vm4445_vm2 = vmmov 0   ;;  %s5351_s1 = inlined_call_operand.vmem [shape: f32[4,96], index: 1, kind: input, shape index: {}]   ;;  %s5352_s0 = inlined_call_operand.vmem [shape: f32[64,4], index: 0, kind: input, shape index: {}]   ;;  %s5353_s3 = inlined_call_operand.vmem [shape: f32[1,96], index: 3, kind: input, shape index: {}]   ;;  %s5354_s4 = inlined_call_operand.vmem [shape: f32[1,32], index: 4, kind: input, shape index: {}]   ;;  %s5355_s2 = inlined_call_operand.vmem [shape: f32[32,96], index: 2, kind: input, shape index: {}]   ;;  %s5356_s5 = inlined_call_operand.vmem [shape: f32[32,48], index: 5, kind: input, shape index: {}]   ;;  %s5357_s7 = inlined_call_operand.vmem [shape: f32[1,48], index: 7, kind: input, shape index: {}]   ;;  %s5358_s8 = inlined_call_operand.vmem [shape: f32[1,16], index: 8, kind: input, shape index: {}]   ;;  %s5359_s6 = inlined_call_operand.vmem [shape: f32[16,48], index: 6, kind: input, shape index: {}]   ;;  %s5360_s9 = inlined_call_operand.vmem [shape: f32[16,48], index: 9, kind: input, shape index: {}]   ;;  %s5361_s11 = inlined_call_operand.vmem [shape: f32[1,48], index: 11, kind: input, shape index: {}]   ;;  %s5362_s12 = inlined_call_operand.vmem [shape: f32[1,16], index: 12, kind: input, shape index: {}]   ;;  %s5363_s10 = inlined_call_operand.vmem [shape: f32[16,48], index: 10, kind: input, shape index: {}]   ;;  %s5364_s13 = inlined_call_operand.vmem [shape: f32[16,96], index: 13, kind: input, shape index: {}]   ;;  %s5365_s15 = inlined_call_operand.vmem [shape: f32[1,96], index: 15, kind: input, shape index: {}]   ;;  %s5366_s16 = inlined_call_operand.vmem [shape: f32[1,32], index: 16, kind: input, shape index: {}]   ;;  %s5367_s14 = inlined_call_operand.vmem [shape: f32[32,96], index: 14, kind: input, shape index: {}]   ;;  %s5368_s17 = inlined_call_operand.vmem [shape: f32[32,4], index: 17, kind: input, shape index: {}]   ;;  %s5369_s18 = inlined_call_operand.vmem [shape: f32[1,4], index: 18, kind: input, shape index: {}]   ;;  %s5370_s19 = inlined_call_operand.vmem [shape: f32[64,4], index: 19, kind: output, shape index: {}]  }
   0x1   :  { %5372 = sst [smem:[#allocation2_spill]] %s5351_s1  ;;  %v4582_v18 = vld [vmem:[%s5355_s2 + $0x18] sm:$0xff]  ;;  %v4588_v19 = vld [vmem:[%s5355_s2 + $0x10] sm:$0xff]  ;;  %3952 = vmatprep.subr.mxu0 %v4444_v17  ;;  %v4600_v21 = vld [vmem:[%s5355_s2 + $0x8] sm:$0xff]  ;;  %3960 = vmatprep.mubr.msk.f32.mxu0 %vm4445_vm2, %v4444_v17  ;;  %vm272_vm3 = vcmask 261120   ;;  %vm1131_vm4 = vcmask 130048  }
   0x2   :  { %5373 = sst [smem:[#allocation3_spill]] %s5352_s0  ;;  %v4614_v24 = vld [vmem:[%s5355_s2] sm:$0xff]  ;;  %3953 = vmatpush3.msra.mxu0 %v4582_v18  ;;  %s4446_s2 = smov 96  }
   0x3   :  { %5374 = sst [smem:[#allocation4_spill]] %s5353_s3  ;;  %3954 = vmatprep.subr.mxu0 %v4444_v17  ;;  %s4447_s0 = smov 32  }
   0x4   :  { %5375 = sst [smem:[#allocation5_spill]] %s5354_s4  ;;  %3955 = vmatpush3.msra.mxu0 %v4588_v19 }
   0x5   :  { %s5376_s20 = sld [smem:[#allocation2_spill]]  ;;  %3956 = vmatprep.subr.mxu0 %v4444_v17 }
   0x6   :  { %s5377_s22 = sld [smem:[#allocation3_spill]]  ;;  %3957 = vmatpush3.msra.mxu0 %v4600_v21 }
   0x7   :  { %s5378_s4 = sld [smem:[#allocation4_spill]]  ;;  %3958 = vmatprep.subr.mxu0 %v4444_v17 }
   0x8   :  { %s5379_s28 = sld [smem:[#allocation5_spill]]  ;;  %3959 = vmatpush3.msra.mxu0 %v4614_v24 }
   0x9   :  { %3974 = vmatprep.subr.mxu0 %v4444_v17 }
   0xb   :  { %v62_v0 = vld [vmem:[%s5376_s20] sm:$0xf] }
   0xc   :  { %v96_v1 = vld [vmem:[%s5377_s22] sm:$0xff]  ;;  %v97_v2 = vld [vmem:[%s5377_s22 + $0x8] sm:$0xff]  ;;  %3916 = vmatprep.subr.msk.mxu1 %vm135_vm0, %v62_v0  ;;  %v98_v15 = vld [vmem:[%s5377_s22 + $0x10] sm:$0xff] }
   0xd   :  { %3918 = vmatprep.mubr.msk.f32.mxu1 %vm110_vm1, %v96_v1  ;;  %3917 = vmatpush3.msk.msra.mxu1 %vm135_vm0, %v62_v0  ;;  %v4565_v4 = vld [vmem:[%s5378_s4] ss:$0 sm:$0xff]  ;;  %v99_v16 = vld [vmem:[%s5377_s22 + $0x18] sm:$0xff]  ;;  %v101_v22 = vld [vmem:[%s5377_s22 + $0x28] sm:$0xff] }
   0xe   :  { %3919 = vmatmul.mubr.msk.f32.vlgmr.msra.gmra.mxu1 %vm110_vm1, %v97_v2  ;;  %v3666_v10 = vld [vmem:[%s5379_s28] ss:$0 sm:$0xff]  ;;  %3930 = vmatprep.subr.mxu1 %v4444_v17  ;;  %v102_v23 = vld [vmem:[%s5377_s22 + $0x30] sm:$0xff]  ;;  %v103_v25 = vld [vmem:[%s5377_s22 + $0x38] sm:$0xff] }
   0xf   :  { %3921 = vmatprep.mubr.msk.f32.mxu1 %vm110_vm1, %v98_v15  ;;  %v100_v20 = vld [vmem:[%s5377_s22 + $0x20] sm:$0xff]  ;;  %3931 = vmatpush3.msra.mxu1 %v4582_v18 }
  0x10   :  { %3932 = vmatprep.subr.mxu1 %v4444_v17 }
  0x11   :  { %3933 = vmatpush3.msra.mxu1 %v4588_v19 }
  0x12   :  { %3922 = vmatmul.mubr.msk.f32.gmra.mxu1 %vm110_vm1, %v99_v16  ;;  %3934 = vmatprep.subr.mxu1 %v4444_v17 }
  0x13   :  { %3924 = vmatprep.mubr.msk.f32.mxu1 %vm110_vm1, %v100_v20  ;;  %3935 = vmatpush3.msra.mxu1 %v4600_v21 }
  0x14   :  { %3936 = vmatprep.subr.mxu1 %v4444_v17 }
  0x15   :  { %3937 = vmatpush3.msra.mxu1 %v4614_v24 }
  0x16   :  { %3925 = vmatmul.mubr.msk.f32.gmra.mxu1 %vm110_vm1, %v101_v22  ;;  %3941 = vmatprep.subr.mxu1 %v4444_v17 }
  0x17   :  { %3927 = vmatprep.mubr.msk.f32.mxu1 %vm110_vm1, %v102_v23 }
  0x1a   :  { %3928 = vmatmul.mubr.msk.f32.gmra.mxu1 %vm110_vm1, %v103_v25 }
  0x1b   :  { %3938 = vmatprep.mubr.msk.f32.mxu1 %vm4445_vm2, %v4444_v17 }
  0xce   :  { %v4560_v3 = vpop.f32.mrf.mxu1 }
  0xcf   :  { %v211_v41 = vadd.f32 %v4560_v3, %v4565_v4 }
  0xd0   :  { %v205_v5 = vpop.f32.mrf.mxu1 }
  0xd1   :  { %v206_v6 = vadd.f32 %v4565_v4, %v205_v5 }
  0xd2   :  { %v4655_v31 = vpop.f32.mrf.mxu1 }
  0xd3   :  { %v3665_v7 = vmul.f32 -1.442695, %v206_v6  ;;  %v221_v22 = vadd.f32 %v4655_v31, %v4565_v4 }
  0xd4   :  { %v215_v32 = vpop.f32.mrf.mxu1 }
  0xd5   :  { %4251 = vpow2.f32 %v3665_v7  ;;  %v216_v61 = vadd.f32 %v4565_v4, %v215_v32 }
  0xd6   :  { %v4657_v33 = vpop.f32.mrf.mxu1 }
  0xd8   :  { %v4659_v34 = vpop.f32.mrf.mxu1 }
  0xda   :  { %v4661_v35 = vpop.f32.mrf.mxu1 }
  0xdc   :  { %v4663_v36 = vpop.f32.mrf.mxu1 }
  0xe2   :  { %v4252_v8 = vpop.eup %4251 }
  0xe3   :  { %v247_v9 = vadd.f32 1.0, %v4252_v8 }
  0xe5   :  { %4253 = vrcp.f32 %v247_v9 }
  0xf2   :  { %v4254_v11 = vpop.eup %4253 }
  0xf3   :  { %v256_v12 = vmul.f32 %v4254_v11, %v3666_v10  ;;  %v263_v27 = vsub.f32 1.0, %v4254_v11 }
  0xf5   :  { %258 = vrot.lane.b32.xlu0 %v256_v12, %s4443_s29 }
 0x167   :  { %v259_v13 = vpop.permute.xlu0 %258 }
 0x168   :  { %v261_v14 = vadd.f32 %v259_v13, %v206_v6 }
 0x16a   :  { %4255 = vtanh.f32 %v261_v14 }
 0x177   :  { %v4256_v26 = vpop.eup %4255 }
 0x178   :  { %265 = vrot.lane.b32.xlu0 %v4256_v26, %s4446_s2 }
 0x1ea   :  { %v266_v28 = vpop.permute.xlu0 %265 }
 0x1eb   :  { %v268_v29 = vmul.f32 %v266_v28, %v263_v27 }
 0x1ed   :  { %270 = vrot.lane.b32.xlu1 %v268_v29, %s4446_s2 }
 0x1f1   :  { %352 = vrot.lane.b32.xlu1 %v3666_v10, %s4443_s29 }
 0x25f   :  { %v4641_v30 = vpop.permute.xlu1 %270 }
 0x260   :  { %3939 = vmatmul.mubr.msk.f32.vlgmr.msra.gmra.mxu1 %vm272_vm3, %v4641_v30 }
 0x261   :  { %3942 = vmatpush3.msra.mxu1 %v4582_v18  ;;  %3949 = vmatprep.mubr.msk.f32.mxu1 %vm4445_vm2, %v4444_v17 }
 0x262   :  { %3943 = vmatprep.subr.mxu1 %v4444_v17 }
 0x263   :  { %3944 = vmatpush3.msra.mxu1 %v4588_v19  ;;  %v4665_v37 = vpop.permute.xlu1 %352 }
 0x264   :  { %3945 = vmatprep.subr.mxu1 %v4444_v17 }
 0x265   :  { %3946 = vmatpush3.msra.mxu1 %v4600_v21 }
 0x266   :  { %3947 = vmatprep.subr.mxu1 %v4444_v17 }
 0x267   :  { %3948 = vmatpush3.msra.mxu1 %v4614_v24 }
 0x268   :  { %3963 = vmatprep.subr.mxu1 %v4444_v17 }
 0x320   :  { %v341_v38 = vpop.f32.mrf.mxu1 }
 0x321   :  { %v355_v39 = vadd.f32 %v4665_v37, %v341_v38  ;;  %v345_v42 = vadd.f32 %v341_v38, %v211_v41 }
 0x322   :  { %v3940_v40 = vpop.f32.mrf.mxu1 }
 0x323   :  { %357 = vrot.lane.b32.xlu0 %v355_v39, %s4443_s29  ;;  %v3668_v43 = vmul.f32 -1.442695, %v345_v42 }
 0x325   :  { %4257 = vpow2.f32 %v3668_v43 }
 0x332   :  { %v4258_v44 = vpop.eup %4257 }
 0x333   :  { %v349_v45 = vadd.f32 1.0, %v4258_v44 }
 0x335   :  { %4259 = vrcp.f32 %v349_v45 }
 0x342   :  { %v4260_v46 = vpop.eup %4259 }
 0x343   :  { %v367_v52 = vsub.f32 1.0, %v4260_v46  ;;  %v373_v54 = vmul.f32 %v4260_v46, %v268_v29 }
 0x395   :  { %v358_v47 = vpop.permute.xlu0 %357 }
 0x396   :  { %v360_v48 = vmul.f32 %v4260_v46, %v358_v47 }
 0x398   :  { %362 = vrot.lane.b32.xlu1 %v360_v48, %s4443_s29 }
 0x40a   :  { %v363_v49 = vpop.permute.xlu1 %362 }
 0x40b   :  { %v365_v50 = vadd.f32 %v363_v49, %v211_v41  ;;  %v226_v49 = vadd.f32 %v4565_v4, %v4659_v34 }
 0x40d   :  { %4261 = vtanh.f32 %v365_v50 }
 0x41a   :  { %v4262_v51 = vpop.eup %4261 }
 0x41b   :  { %369 = vrot.lane.b32.xlu0 %v4262_v51, %s4446_s2 }
 0x48d   :  { %v370_v53 = vpop.permute.xlu0 %369 }
 0x48e   :  { %v372_v55 = vmul.f32 %v370_v53, %v367_v52 }
 0x490   :  { %v374_v56 = vadd.f32 %v373_v54, %v372_v55 }
 0x492   :  { %376 = vrot.lane.b32.xlu1 %v374_v56, %s4446_s2 }
 0x504   :  { %v4674_v57 = vpop.permute.xlu1 %376 }
 0x505   :  { %3950 = vmatmul.mubr.msk.f32.vlgmr.msra.gmra.mxu1 %vm272_vm3, %v4674_v57 }
 0x506   :  { %3964 = vmatpush3.msra.mxu1 %v4582_v18  ;;  %3971 = vmatprep.mubr.msk.f32.mxu1 %vm4445_vm2, %v4444_v17 }
 0x507   :  { %3965 = vmatprep.subr.mxu1 %v4444_v17 }
 0x508   :  { %3966 = vmatpush3.msra.mxu1 %v4588_v19 }
 0x509   :  { %3967 = vmatprep.subr.mxu1 %v4444_v17 }
 0x50a   :  { %3968 = vmatpush3.msra.mxu1 %v4600_v21 }
 0x50b   :  { %3969 = vmatprep.subr.mxu1 %v4444_v17 }
 0x50c   :  { %3970 = vmatpush3.msra.mxu1 %v4614_v24 }
 0x50d   :  { %3985 = vmatprep.subr.mxu1 %v4444_v17 }
 0x5c5   :  { %v446_v58 = vpop.f32.mrf.mxu1 }
 0x5c6   :  { %v457_v59 = vadd.f32 %v446_v58, %v4665_v37  ;;  %v450_v62 = vadd.f32 %v446_v58, %v216_v61 }
 0x5c7   :  { %v3951_v60 = vpop.f32.mrf.mxu1 }
 0x5c8   :  { %459 = vrot.lane.b32.xlu0 %v457_v59, %s4443_s29  ;;  %v3670_v63 = vmul.f32 -1.442695, %v450_v62 }
 0x5ca   :  { %4263 = vpow2.f32 %v3670_v63 }
 0x5d7   :  { %v4264_v0 = vpop.eup %4263 }
 0x5d8   :  { %v454_v1 = vadd.f32 1.0, %v4264_v0 }
 0x5da   :  { %4265 = vrcp.f32 %v454_v1 }
 0x5e7   :  { %v4266_v2 = vpop.eup %4265 }
 0x5e8   :  { %v469_v9 = vsub.f32 1.0, %v4266_v2  ;;  %v475_v11 = vmul.f32 %v4266_v2, %v374_v56 }
 0x63a   :  { %v460_v3 = vpop.permute.xlu0 %459 }
 0x63b   :  { %v462_v5 = vmul.f32 %v4266_v2, %v460_v3 }
 0x63d   :  { %464 = vrot.lane.b32.xlu1 %v462_v5, %s4443_s29  ;;  %v231_v5 = vadd.f32 %v4657_v33, %v4565_v4 }
 0x6af   :  { %v465_v6 = vpop.permute.xlu1 %464 }
 0x6b0   :  { %v467_v7 = vadd.f32 %v465_v6, %v216_v61 }
 0x6b2   :  { %4267 = vtanh.f32 %v467_v7 }
 0x6bf   :  { %v4268_v8 = vpop.eup %4267 }
 0x6c0   :  { %471 = vrot.lane.b32.xlu0 %v4268_v8, %s4446_s2 }
 0x732   :  { %v472_v10 = vpop.permute.xlu0 %471 }
 0x733   :  { %v474_v12 = vmul.f32 %v472_v10, %v469_v9 }
 0x735   :  { %v476_v13 = vadd.f32 %v475_v11, %v474_v12  ;;  %v72_v12 = vld [vmem:[%s5356_s5 + $0x18] sm:$0xff] }
 0x737   :  { %478 = vrot.lane.b32.xlu1 %v476_v13, %s4446_s2 }
 0x7a9   :  { %v4694_v14 = vpop.permute.xlu1 %478 }
 0x7aa   :  { %3961 = vmatmul.mubr.msk.f32.vlgmr.msra.gmra.mxu0 %vm272_vm3, %v4694_v14 }
 0x7ab   :  { %3975 = vmatpush3.msra.mxu0 %v4582_v18  ;;  %3982 = vmatprep.mubr.msk.f32.mxu0 %vm4445_vm2, %v4444_v17 }
 0x7ac   :  { %3976 = vmatprep.subr.mxu0 %v4444_v17 }
 0x7ad   :  { %3977 = vmatpush3.msra.mxu0 %v4588_v19 }
 0x7ae   :  { %3978 = vmatprep.subr.mxu0 %v4444_v17 }
 0x7af   :  { %3979 = vmatpush3.msra.mxu0 %v4600_v21 }
 0x7b0   :  { %3980 = vmatprep.subr.mxu0 %v4444_v17 }
 0x7b1   :  { %3981 = vmatpush3.msra.mxu0 %v4614_v24 }
 0x7b2   :  { %3996 = vmatprep.subr.mxu0 %v4444_v17 }
 0x86a   :  { %v548_v15 = vpop.f32.mrf.mxu0 }
 0x86b   :  { %v559_v16 = vadd.f32 %v548_v15, %v4665_v37  ;;  %v552_v23 = vadd.f32 %v548_v15, %v221_v22 }
 0x86c   :  { %v3962_v20 = vpop.f32.mrf.mxu0 }
 0x86d   :  { %561 = vrot.lane.b32.xlu0 %v559_v16, %s4443_s29  ;;  %v3672_v25 = vmul.f32 -1.442695, %v552_v23 }
 0x86f   :  { %4269 = vpow2.f32 %v3672_v25  ;;  %v71_v25 = vld [vmem:[%s5356_s5 + $0x10] sm:$0xff] }
 0x87c   :  { %v4270_v26 = vpop.eup %4269 }
 0x87d   :  { %v556_v27 = vadd.f32 1.0, %v4270_v26  ;;  %v70_v26 = vld [vmem:[%s5356_s5 + $0x8] sm:$0xff] }
 0x87f   :  { %4271 = vrcp.f32 %v556_v27  ;;  %v69_v27 = vld [vmem:[%s5356_s5] sm:$0xff] }
 0x88c   :  { %v4272_v28 = vpop.eup %4271 }
 0x88d   :  { %v571_v41 = vsub.f32 1.0, %v4272_v28  ;;  %v577_v31 = vmul.f32 %v4272_v28, %v476_v13 }
 0x8df   :  { %v562_v29 = vpop.permute.xlu0 %561 }
 0x8e0   :  { %v564_v32 = vmul.f32 %v4272_v28, %v562_v29 }
 0x8e2   :  { %566 = vrot.lane.b32.xlu1 %v564_v32, %s4443_s29 }
 0x954   :  { %v567_v38 = vpop.permute.xlu1 %566 }
 0x955   :  { %v569_v39 = vadd.f32 %v567_v38, %v221_v22 }
 0x957   :  { %4273 = vtanh.f32 %v569_v39 }
 0x964   :  { %v4274_v40 = vpop.eup %4273 }
 0x965   :  { %573 = vrot.lane.b32.xlu0 %v4274_v40, %s4446_s2 }
 0x9d7   :  { %v574_v42 = vpop.permute.xlu0 %573 }
 0x9d8   :  { %v576_v43 = vmul.f32 %v574_v42, %v571_v41  ;;  %v3691_v42 = vld [vmem:[%s5358_s8] ss:$0 sm:$0xff] }
 0x9da   :  { %v578_v44 = vadd.f32 %v577_v31, %v576_v43 }
 0x9dc   :  { %580 = vrot.lane.b32.xlu1 %v578_v44, %s4446_s2 }
 0xa4e   :  { %v4715_v45 = vpop.permute.xlu1 %580 }
 0xa4f   :  { %3972 = vmatmul.mubr.msk.f32.vlgmr.msra.gmra.mxu1 %vm272_vm3, %v4715_v45 }
 0xa50   :  { %3986 = vmatpush3.msra.mxu1 %v4582_v18  ;;  %3993 = vmatprep.mubr.msk.f32.mxu1 %vm4445_vm2, %v4444_v17 }
 0xa51   :  { %3987 = vmatprep.subr.mxu1 %v4444_v17 }
 0xa52   :  { %3988 = vmatpush3.msra.mxu1 %v4588_v19 }
 0xa53   :  { %3989 = vmatprep.subr.mxu1 %v4444_v17 }
 0xa54   :  { %3990 = vmatpush3.msra.mxu1 %v4600_v21 }
 0xa55   :  { %3991 = vmatprep.subr.mxu1 %v4444_v17 }
 0xa56   :  { %3992 = vmatpush3.msra.mxu1 %v4614_v24 }
 0xa57   :  { %4007 = vmatprep.subr.mxu1 %v72_v12 }
 0xb0f   :  { %v650_v46 = vpop.f32.mrf.mxu1 }
 0xb10   :  { %v661_v47 = vadd.f32 %v650_v46, %v4665_v37  ;;  %v654_v50 = vadd.f32 %v650_v46, %v226_v49 }
 0xb11   :  { %v3973_v48 = vpop.f32.mrf.mxu1 }
 0xb12   :  { %663 = vrot.lane.b32.xlu0 %v661_v47, %s4443_s29  ;;  %v3674_v51 = vmul.f32 -1.442695, %v654_v50 }
 0xb14   :  { %4275 = vpow2.f32 %v3674_v51 }
 0xb21   :  { %v4276_v52 = vpop.eup %4275 }
 0xb22   :  { %v658_v53 = vadd.f32 1.0, %v4276_v52 }
 0xb24   :  { %4277 = vrcp.f32 %v658_v53 }
 0xb31   :  { %v4278_v54 = vpop.eup %4277 }
 0xb32   :  { %v673_v61 = vsub.f32 1.0, %v4278_v54  ;;  %v679_v34 = vmul.f32 %v4278_v54, %v578_v44  ;;  %v236_v44 = vadd.f32 %v4565_v4, %v4663_v36 }
 0xb84   :  { %v664_v55 = vpop.permute.xlu0 %663 }
 0xb85   :  { %v666_v56 = vmul.f32 %v4278_v54, %v664_v55 }
 0xb87   :  { %668 = vrot.lane.b32.xlu1 %v666_v56, %s4443_s29 }
 0xbf9   :  { %v669_v58 = vpop.permute.xlu1 %668 }
 0xbfa   :  { %v671_v59 = vadd.f32 %v669_v58, %v226_v49 }
 0xbfc   :  { %4279 = vtanh.f32 %v671_v59 }
 0xc09   :  { %v4280_v60 = vpop.eup %4279 }
 0xc0a   :  { %675 = vrot.lane.b32.xlu0 %v4280_v60, %s4446_s2 }
 0xc7c   :  { %v676_v62 = vpop.permute.xlu0 %675 }
 0xc7d   :  { %v678_v63 = vmul.f32 %v676_v62, %v673_v61  ;;  %v4803_v61 = vld [vmem:[%s5359_s6 + $0x8] sm:$0xff]  ;;  %v4809_v62 = vld [vmem:[%s5359_s6] sm:$0xff] }
 0xc7f   :  { %v680_v0 = vadd.f32 %v679_v34, %v678_v63 }
 0xc81   :  { %682 = vrot.lane.b32.xlu1 %v680_v0, %s4446_s2 }
 0xcf3   :  { %v683_v1 = vpop.permute.xlu1 %682 }
 0xcf4   :  { %3983 = vmatmul.mubr.msk.f32.vlgmr.msra.gmra.mxu0 %vm272_vm3, %v683_v1 }
 0xcf5   :  { %3997 = vmatpush3.msra.mxu0 %v4582_v18  ;;  %4004 = vmatprep.mubr.msk.f32.mxu0 %vm4445_vm2, %v4444_v17 }
 0xcf6   :  { %3998 = vmatprep.subr.mxu0 %v4444_v17 }
 0xcf7   :  { %3999 = vmatpush3.msra.mxu0 %v4588_v19 }
 0xcf8   :  { %4000 = vmatprep.subr.mxu0 %v4444_v17 }
 0xcf9   :  { %4001 = vmatpush3.msra.mxu0 %v4600_v21 }
 0xcfa   :  { %4002 = vmatprep.subr.mxu0 %v4444_v17 }
 0xcfb   :  { %4003 = vmatpush3.msra.mxu0 %v4614_v24 }
 0xcfc   :  { %4027 = vmatprep.subr.mxu0 %v4444_v17 }
 0xdb4   :  { %v752_v2 = vpop.f32.mrf.mxu0 }
 0xdb5   :  { %v763_v18 = vadd.f32 %v752_v2, %v4665_v37  ;;  %v756_v19 = vadd.f32 %v752_v2, %v231_v5 }
 0xdb6   :  { %v3984_v3 = vpop.f32.mrf.mxu0 }
 0xdb7   :  { %765 = vrot.lane.b32.xlu0 %v763_v18, %s4443_s29  ;;  %v3676_v6 = vmul.f32 -1.442695, %v756_v19 }
 0xdb9   :  { %4281 = vpow2.f32 %v3676_v6 }
 0xdc6   :  { %v4282_v7 = vpop.eup %4281 }
 0xdc7   :  { %v760_v21 = vadd.f32 1.0, %v4282_v7 }
 0xdc9   :  { %4283 = vrcp.f32 %v760_v21 }
 0xdd6   :  { %v4284_v8 = vpop.eup %4283 }
 0xdd7   :  { %v775_v13 = vsub.f32 1.0, %v4284_v8  ;;  %v781_v16 = vmul.f32 %v4284_v8, %v680_v0 }
 0xe29   :  { %v766_v9 = vpop.permute.xlu0 %765 }
 0xe2a   :  { %v768_v24 = vmul.f32 %v4284_v8, %v766_v9 }
 0xe2c   :  { %770 = vrot.lane.b32.xlu1 %v768_v24, %s4443_s29 }
 0xe9e   :  { %v771_v10 = vpop.permute.xlu1 %770 }
 0xe9f   :  { %v773_v11 = vadd.f32 %v771_v10, %v231_v5 }
 0xea1   :  { %4285 = vtanh.f32 %v773_v11 }
 0xeae   :  { %v4286_v33 = vpop.eup %4285 }
 0xeaf   :  { %777 = vrot.lane.b32.xlu0 %v4286_v33, %s4446_s2 }
 0xf21   :  { %v778_v15 = vpop.permute.xlu0 %777 }
 0xf22   :  { %v780_v20 = vmul.f32 %v778_v15, %v775_v13 }
 0xf24   :  { %v4755_v22 = vadd.f32 %v781_v16, %v780_v20 }
 0xf26   :  { %784 = vrot.lane.b32.xlu1 %v4755_v22, %s4446_s2 }
 0xf98   :  { %v785_v23 = vpop.permute.xlu1 %784 }
 0xf99   :  { %3994 = vmatmul.mubr.msk.f32.vlgmr.msra.gmra.mxu1 %vm272_vm3, %v785_v23 }
 0xf9a   :  { %4008 = vmatpush3.msra.mxu1 %v72_v12  ;;  %4015 = vmatprep.mubr.msk.f32.mxu1 %vm272_vm3, %v4641_v30 }
 0xf9b   :  { %4009 = vmatprep.subr.mxu1 %v71_v25 }
 0xf9c   :  { %4010 = vmatpush3.msra.mxu1 %v71_v25 }
 0xf9d   :  { %4011 = vmatprep.subr.mxu1 %v70_v26 }
 0xf9e   :  { %4012 = vmatpush3.msra.mxu1 %v70_v26 }
 0xf9f   :  { %4013 = vmatprep.subr.mxu1 %v69_v27 }
 0xfa0   :  { %4014 = vmatpush3.msra.mxu1 %v69_v27 }
 0xfa1   :  { %4016 = vmatmul.mubr.msk.f32.vlgmr.msra.gmra.mxu1 %vm272_vm3, %v4674_v57  ;;  %4062 = vmatprep.subr.mxu1 %v4444_v17  ;;  %v4787_v57 = vld [vmem:[%s5357_s7] ss:$0 sm:$0xff]  ;;  %s4448_s7 = smov 112  }
 0xfa2   :  { %4018 = vmatprep.mubr.msk.f32.mxu1 %vm272_vm3, %v4694_v14  ;;  %4063 = vmatpush3.msra.mxu1 %v4803_v61 }
 0xfa3   :  { %4064 = vmatprep.subr.mxu1 %v4444_v17 }
 0xfa4   :  { %4065 = vmatpush3.msra.mxu1 %v4809_v62 }
 0xfa5   :  { %4019 = vmatmul.mubr.msk.f32.gmra.mxu1 %vm272_vm3, %v4715_v45  ;;  %4076 = vmatprep.subr.mxu1 %v4444_v17 }
 0xfa6   :  { %4021 = vmatprep.mubr.msk.f32.mxu1 %vm272_vm3, %v683_v1 }
 0xfa9   :  { %4022 = vmatmul.mubr.msk.f32.gmra.mxu1 %vm272_vm3, %v785_v23 }
0x1059   :  { %v854_v30 = vpop.f32.mrf.mxu1 }
0x105a   :  { %v865_v28 = vadd.f32 %v854_v30, %v4665_v37  ;;  %v858_v45 = vadd.f32 %v854_v30, %v236_v44 }
0x105b   :  { %v3995_v29 = vpop.f32.mrf.mxu1 }
0x105c   :  { %867 = vrot.lane.b32.xlu0 %v865_v28, %s4443_s29  ;;  %v3678_v46 = vmul.f32 -1.442695, %v858_v45 }
0x1061   :  { %v4782_v32 = vpop.f32.mrf.mxu1 }
0x1062   :  { %v1070_v9 = vadd.f32 %v4782_v32, %v4787_v57 }
0x1063   :  { %v1064_v14 = vpop.f32.mrf.mxu1 }
0x1064   :  { %v1065_v38 = vadd.f32 %v4787_v57, %v1064_v14 }
0x1066   :  { %v3690_v39 = vmul.f32 -1.442695, %v1065_v38 }
0x1068   :  { %4287 = vpow2.f32 %v3690_v39 }
0x1075   :  { %v4288_v40 = vpop.eup %4287 }
0x1076   :  { %v1106_v41 = vadd.f32 1.0, %v4288_v40 }
0x1078   :  { %4289 = vrcp.f32 %v1106_v41 }
0x1079   :  { %4291 = vpow2.f32 %v3678_v46 }
0x1085   :  { %v4290_v31 = vpop.eup %4289 }
0x1086   :  { %v1115_v43 = vmul.f32 %v4290_v31, %v3691_v42  ;;  %v4292_v47 = vpop.eup %4291  ;;  %v1122_v58 = vsub.f32 1.0, %v4290_v31 }
0x1087   :  { %v862_v48 = vadd.f32 1.0, %v4292_v47 }
0x1088   :  { %1117 = vrot.lane.b32.xlu0 %v1115_v43, %s4447_s0 }
0x1089   :  { %4293 = vrcp.f32 %v862_v48 }
0x1096   :  { %v4294_v49 = vpop.eup %4293 }
0x1097   :  { %v877_v34 = vsub.f32 1.0, %v4294_v49  ;;  %v883_v0 = vmul.f32 %v4294_v49, %v4755_v22 }
0x10ce   :  { %v868_v50 = vpop.permute.xlu0 %867 }
0x10cf   :  { %v870_v51 = vmul.f32 %v4294_v49, %v868_v50 }
0x10d1   :  { %872 = vrot.lane.b32.xlu1 %v870_v51, %s4443_s29 }
0x10fa   :  { %v1118_v52 = vpop.permute.xlu0 %1117 }
0x10fb   :  { %v1120_v53 = vadd.f32 %v1118_v52, %v1065_v38  ;;  %v4020_v38 = vpop.f32.mrf.mxu1 }
0x10fd   :  { %4295 = vtanh.f32 %v1120_v53  ;;  %v1074_v39 = vpop.f32.mrf.mxu1 }
0x10fe   :  { %v1075_v40 = vadd.f32 %v4787_v57, %v1074_v39 }
0x110a   :  { %v4296_v54 = vpop.eup %4295 }
0x110b   :  { %1124 = vrot.lane.b32.xlu0 %v4296_v54, %s4448_s7 }
0x1143   :  { %v873_v55 = vpop.permute.xlu1 %872 }
0x1144   :  { %v875_v36 = vadd.f32 %v873_v55, %v236_v44 }
0x1146   :  { %4297 = vtanh.f32 %v875_v36 }
0x1153   :  { %v4298_v56 = vpop.eup %4297 }
0x1154   :  { %879 = vrot.lane.b32.xlu1 %v4298_v56, %s4446_s2 }
0x117d   :  { %v1125_v59 = vpop.permute.xlu0 %1124 }
0x117e   :  { %v1127_v60 = vmul.f32 %v1125_v59, %v1122_v58  ;;  %v1080_v59 = vadd.f32 %v4020_v38, %v4787_v57 }
0x1180   :  { %1129 = vrot.lane.b32.xlu0 %v1127_v60, %s4448_s7 }
0x11c6   :  { %v880_v63 = vpop.permute.xlu1 %879 }
0x11c7   :  { %v882_v1 = vmul.f32 %v880_v63, %v877_v34 }
0x11c9   :  { %v4815_v2 = vadd.f32 %v883_v0, %v882_v1 }
0x11cb   :  { %886 = vrot.lane.b32.xlu1 %v4815_v2, %s4446_s2 }
0x11cf   :  { %1211 = vrot.lane.b32.xlu1 %v3691_v42, %s4447_s0 }
0x11f2   :  { %v1130_v3 = vpop.permute.xlu0 %1129 }
0x123d   :  { %v887_v18 = vpop.permute.xlu1 %886 }
0x123e   :  { %4005 = vmatmul.mubr.msk.f32.vlgmr.msra.gmra.mxu0 %vm272_vm3, %v887_v18  ;;  %4024 = vmatprep.mubr.msk.f32.mxu1 %vm272_vm3, %v887_v18 }
0x123f   :  { %4028 = vmatpush3.msra.mxu0 %v4803_v61  ;;  %4031 = vmatprep.mubr.msk.f32.mxu0 %vm4445_vm2, %v4444_v17 }
0x1240   :  { %4029 = vmatprep.subr.mxu0 %v4444_v17 }
0x1241   :  { %4030 = vmatpush3.msra.mxu0 %v4809_v62  ;;  %v4837_v6 = vpop.permute.xlu1 %1211 }
0x1242   :  { %4032 = vmatmul.mubr.msk.f32.vlgmr.msra.gmra.mxu0 %vm1131_vm4, %v1130_v3  ;;  %4034 = vmatprep.subr.mxu0 %v4444_v17 }
0x1243   :  { %4035 = vmatpush3.msra.mxu0 %v4803_v61  ;;  %4038 = vmatprep.mubr.msk.f32.mxu0 %vm4445_vm2, %v4444_v17 }
0x1244   :  { %4036 = vmatprep.subr.mxu0 %v4444_v17 }
0x1245   :  { %4037 = vmatpush3.msra.mxu0 %v4809_v62 }
0x1246   :  { %4041 = vmatprep.subr.mxu0 %v4444_v17 }
0x12fe   :  { %v4835_v5 = vpop.f32.mrf.mxu0 }
0x12ff   :  { %v967_v39 = vadd.f32 %v4835_v5, %v4665_v37 }
0x1300   :  { %v4006_v19 = vpop.f32.mrf.mxu0 }
0x1302   :  { %v1200_v7 = vpop.f32.mrf.mxu0 }
0x1303   :  { %v1214_v21 = vadd.f32 %v4837_v6, %v1200_v7  ;;  %v1204_v24 = vadd.f32 %v1200_v7, %v1070_v9 }
0x1304   :  { %v4033_v8 = vpop.f32.mrf.mxu0 }
0x1305   :  { %1216 = vrot.lane.b32.xlu0 %v1214_v21, %s4446_s2  ;;  %v3693_v10 = vmul.f32 -1.442695, %v1204_v24 }
0x1307   :  { %4299 = vpow2.f32 %v3693_v10 }
0x1314   :  { %v4300_v11 = vpop.eup %4299 }
0x1315   :  { %v1208_v12 = vadd.f32 1.0, %v4300_v11 }
0x1317   :  { %4301 = vrcp.f32 %v1208_v12 }
0x1324   :  { %v4302_v33 = vpop.eup %4301 }
0x1325   :  { %v1226_v23 = vsub.f32 1.0, %v4302_v33  ;;  %v1232_v26 = vmul.f32 %v4302_v33, %v1127_v60 }
0x1377   :  { %v1217_v13 = vpop.permute.xlu0 %1216 }
0x1378   :  { %v1219_v15 = vmul.f32 %v4302_v33, %v1217_v13 }
0x137a   :  { %1221 = vrot.lane.b32.xlu1 %v1219_v15, %s4447_s0 }
0x13ec   :  { %v1222_v16 = vpop.permute.xlu1 %1221 }
0x13ed   :  { %v1224_v20 = vadd.f32 %v1222_v16, %v1070_v9  ;;  %v4023_v16 = vpop.f32.mrf.mxu1 }
0x13ef   :  { %4303 = vtanh.f32 %v1224_v20  ;;  %v1084_v20 = vpop.f32.mrf.mxu1 }
0x13fc   :  { %v4304_v22 = vpop.eup %4303 }
0x13fd   :  { %1228 = vrot.lane.b32.xlu0 %v4304_v22, %s4448_s7  ;;  %v1085_v22 = vadd.f32 %v4787_v57, %v1084_v20 }
0x146f   :  { %v1229_v25 = vpop.permute.xlu0 %1228 }
0x1470   :  { %v1231_v27 = vmul.f32 %v1229_v25, %v1226_v23 }
0x1472   :  { %v1233_v30 = vadd.f32 %v1232_v26, %v1231_v27 }
0x1474   :  { %1235 = vrot.lane.b32.xlu1 %v1233_v30, %s4448_s7 }
0x14e6   :  { %v1236_v28 = vpop.permute.xlu1 %1235 }
0x14e7   :  { %4039 = vmatmul.mubr.msk.f32.vlgmr.msra.gmra.mxu0 %vm1131_vm4, %v1236_v28 }
0x14e8   :  { %4042 = vmatpush3.msra.mxu0 %v4803_v61  ;;  %4045 = vmatprep.mubr.msk.f32.mxu0 %vm4445_vm2, %v4444_v17 }
0x14e9   :  { %4043 = vmatprep.subr.mxu0 %v4444_v17 }
0x14ea   :  { %4044 = vmatpush3.msra.mxu0 %v4809_v62 }
0x14eb   :  { %4048 = vmatprep.subr.mxu0 %v4444_v17 }
0x15a7   :  { %v1305_v29 = vpop.f32.mrf.mxu0 }
0x15a8   :  { %v1316_v32 = vadd.f32 %v1305_v29, %v4837_v6  ;;  %v1309_v41 = vadd.f32 %v1305_v29, %v1075_v40 }
0x15a9   :  { %v4040_v14 = vpop.f32.mrf.mxu0 }
0x15aa   :  { %1318 = vrot.lane.b32.xlu0 %v1316_v32, %s4446_s2  ;;  %v3695_v42 = vmul.f32 -1.442695, %v1309_v41 }
0x15ac   :  { %4305 = vpow2.f32 %v3695_v42 }
0x15b9   :  { %v4306_v31 = vpop.eup %4305 }
0x15ba   :  { %v1313_v43 = vadd.f32 1.0, %v4306_v31 }
0x15bc   :  { %4307 = vrcp.f32 %v1313_v43 }
0x15c9   :  { %v4308_v44 = vpop.eup %4307 }
0x15ca   :  { %v1328_v50 = vsub.f32 1.0, %v4308_v44  ;;  %v1334_v52 = vmul.f32 %v4308_v44, %v1233_v30 }
0x161c   :  { %v1319_v45 = vpop.permute.xlu0 %1318 }
0x161d   :  { %v1321_v46 = vmul.f32 %v4308_v44, %v1319_v45 }
0x161f   :  { %1323 = vrot.lane.b32.xlu1 %v1321_v46, %s4447_s0 }
0x1691   :  { %v1324_v47 = vpop.permute.xlu1 %1323 }
0x1692   :  { %v1326_v48 = vadd.f32 %v1324_v47, %v1075_v40  ;;  %v241_v40 = vadd.f32 %v4661_v35, %v4565_v4 }
0x1694   :  { %4309 = vtanh.f32 %v1326_v48  ;;  %v960_v41 = vadd.f32 %v4835_v5, %v241_v40 }
0x1696   :  { %v3680_v42 = vmul.f32 -1.442695, %v960_v41 }
0x16a1   :  { %v4310_v49 = vpop.eup %4309 }
0x16a2   :  { %1330 = vrot.lane.b32.xlu0 %v4310_v49, %s4448_s7 }
0x1714   :  { %v1331_v51 = vpop.permute.xlu0 %1330 }
0x1715   :  { %v1333_v53 = vmul.f32 %v1331_v51, %v1328_v50 }
0x1717   :  { %v1335_v54 = vadd.f32 %v1334_v52, %v1333_v53 }
0x1719   :  { %1337 = vrot.lane.b32.xlu1 %v1335_v54, %s4448_s7 }
0x178b   :  { %v1338_v55 = vpop.permute.xlu1 %1337 }
0x178c   :  { %4046 = vmatmul.mubr.msk.f32.vlgmr.msra.gmra.mxu0 %vm1131_vm4, %v1338_v55 }
0x178d   :  { %4049 = vmatpush3.msra.mxu0 %v4803_v61  ;;  %4052 = vmatprep.mubr.msk.f32.mxu0 %vm4445_vm2, %v4444_v17 }
0x178e   :  { %4050 = vmatprep.subr.mxu0 %v4444_v17 }
0x178f   :  { %4051 = vmatpush3.msra.mxu0 %v4809_v62 }
0x1790   :  { %4055 = vmatprep.subr.mxu0 %v4444_v17 }
0x184c   :  { %v1407_v36 = vpop.f32.mrf.mxu0 }
0x184d   :  { %v1418_v56 = vadd.f32 %v1407_v36, %v4837_v6  ;;  %v1411_v60 = vadd.f32 %v1407_v36, %v1080_v59 }
0x184e   :  { %v4047_v58 = vpop.f32.mrf.mxu0 }
0x184f   :  { %1420 = vrot.lane.b32.xlu0 %v1418_v56, %s4446_s2  ;;  %v3697_v34 = vmul.f32 -1.442695, %v1411_v60 }
0x1851   :  { %4311 = vpow2.f32 %v3697_v34 }
0x185e   :  { %v4312_v63 = vpop.eup %4311 }
0x185f   :  { %v1415_v0 = vadd.f32 1.0, %v4312_v63 }
0x1861   :  { %4313 = vrcp.f32 %v1415_v0 }
0x186e   :  { %v4314_v1 = vpop.eup %4313 }
0x186f   :  { %v1430_v8 = vsub.f32 1.0, %v4314_v1  ;;  %v1436_v24 = vmul.f32 %v4314_v1, %v1335_v54 }
0x18c1   :  { %v1421_v18 = vpop.permute.xlu0 %1420 }
0x18c2   :  { %v1423_v3 = vmul.f32 %v4314_v1, %v1421_v18 }
0x18c4   :  { %1425 = vrot.lane.b32.xlu1 %v1423_v3, %s4447_s0 }
0x1936   :  { %v1426_v19 = vpop.permute.xlu1 %1425 }
0x1937   :  { %v1428_v7 = vadd.f32 %v1426_v19, %v1080_v59  ;;  %v1090_v59 = vadd.f32 %v4023_v16, %v4787_v57 }
0x1939   :  { %4315 = vtanh.f32 %v1428_v7 }
0x1946   :  { %v4316_v21 = vpop.eup %4315 }
0x1947   :  { %1432 = vrot.lane.b32.xlu0 %v4316_v21, %s4448_s7 }
0x19b9   :  { %v1433_v9 = vpop.permute.xlu0 %1432 }
0x19ba   :  { %v1435_v10 = vmul.f32 %v1433_v9, %v1430_v8 }
0x19bc   :  { %v1437_v11 = vadd.f32 %v1436_v24, %v1435_v10 }
0x19be   :  { %1439 = vrot.lane.b32.xlu1 %v1437_v11, %s4448_s7 }
0x1a30   :  { %v1440_v12 = vpop.permute.xlu1 %1439 }
0x1a31   :  { %4053 = vmatmul.mubr.msk.f32.vlgmr.msra.gmra.mxu0 %vm1131_vm4, %v1440_v12 }
0x1a32   :  { %4056 = vmatpush3.msra.mxu0 %v4803_v61  ;;  %4059 = vmatprep.mubr.msk.f32.mxu0 %vm4445_vm2, %v4444_v17 }
0x1a33   :  { %4057 = vmatprep.subr.mxu0 %v4444_v17 }
0x1a34   :  { %4058 = vmatpush3.msra.mxu0 %v4809_v62 }
0x1a35   :  { %4069 = vmatprep.subr.mxu0 %v4444_v17 }
0x1af1   :  { %v1509_v33 = vpop.f32.mrf.mxu0 }
0x1af2   :  { %v1520_v13 = vadd.f32 %v1509_v33, %v4837_v6  ;;  %v1513_v23 = vadd.f32 %v1509_v33, %v1085_v22 }
0x1af3   :  { %v4054_v15 = vpop.f32.mrf.mxu0 }
0x1af4   :  { %1522 = vrot.lane.b32.xlu0 %v1520_v13, %s4446_s2  ;;  %v3699_v25 = vmul.f32 -1.442695, %v1513_v23 }
0x1af6   :  { %4317 = vpow2.f32 %v3699_v25 }
0x1b03   :  { %v4318_v26 = vpop.eup %4317 }
0x1b04   :  { %v1517_v27 = vadd.f32 1.0, %v4318_v26 }
0x1b06   :  { %4319 = vrcp.f32 %v1517_v27 }
0x1b13   :  { %v4320_v30 = vpop.eup %4319 }
0x1b14   :  { %v1532_v44 = vsub.f32 1.0, %v4320_v30  ;;  %v1538_v46 = vmul.f32 %v4320_v30, %v1437_v11 }
0x1b66   :  { %v1523_v28 = vpop.permute.xlu0 %1522 }
0x1b67   :  { %v1525_v29 = vmul.f32 %v4320_v30, %v1523_v28 }
0x1b69   :  { %1527 = vrot.lane.b32.xlu1 %v1525_v29, %s4447_s0 }
0x1bdb   :  { %v1528_v32 = vpop.permute.xlu1 %1527 }
0x1bdc   :  { %v1530_v14 = vadd.f32 %v1528_v32, %v1085_v22 }
0x1bde   :  { %4321 = vtanh.f32 %v1530_v14 }
0x1bdf   :  { %4323 = vpow2.f32 %v3680_v42 }
0x1beb   :  { %v4322_v38 = vpop.eup %4321 }
0x1bec   :  { %1534 = vrot.lane.b32.xlu0 %v4322_v38, %s4448_s7  ;;  %v4324_v31 = vpop.eup %4323 }
0x1bed   :  { %v964_v43 = vadd.f32 1.0, %v4324_v31 }
0x1bef   :  { %4325 = vrcp.f32 %v964_v43 }
0x1bf0   :  { %969 = vrot.lane.b32.xlu0 %v967_v39, %s4443_s29 }
0x1bfc   :  { %v4326_v49 = vpop.eup %4325 }
0x1bfd   :  { %v979_v52 = vsub.f32 1.0, %v4326_v49  ;;  %v985_v54 = vmul.f32 %v4326_v49, %v4815_v2 }
0x1c5e   :  { %v1535_v45 = vpop.permute.xlu0 %1534 }
0x1c5f   :  { %v1537_v47 = vmul.f32 %v1535_v45, %v1532_v44 }
0x1c61   :  { %v1539_v48 = vadd.f32 %v1538_v46, %v1537_v47 }
0x1c62   :  { %v970_v50 = vpop.permute.xlu0 %969 }
0x1c63   :  { %v972_v37 = vmul.f32 %v4326_v49, %v970_v50  ;;  %1541 = vrot.lane.b32.xlu1 %v1539_v48, %s4448_s7 }
0x1c65   :  { %974 = vrot.lane.b32.xlu0 %v972_v37, %s4443_s29 }
0x1cd5   :  { %v1542_v4 = vpop.permute.xlu1 %1541 }
0x1cd6   :  { %4060 = vmatmul.mubr.msk.f32.vlgmr.msra.gmra.mxu0 %vm1131_vm4, %v1542_v4 }
0x1cd7   :  { %v975_v35 = vpop.permute.xlu0 %974  ;;  %4070 = vmatpush3.msra.mxu0 %v4803_v61  ;;  %4073 = vmatprep.mubr.msk.f32.mxu0 %vm4445_vm2, %v4444_v17 }
0x1cd8   :  { %v977_v5 = vadd.f32 %v975_v35, %v241_v40  ;;  %4071 = vmatprep.subr.mxu0 %v4444_v17 }
0x1cd9   :  { %4072 = vmatpush3.msra.mxu0 %v4809_v62 }
0x1cda   :  { %4327 = vtanh.f32 %v977_v5  ;;  %4083 = vmatprep.subr.mxu0 %v4444_v17 }
0x1ce7   :  { %v4328_v51 = vpop.eup %4327 }
0x1ce8   :  { %981 = vrot.lane.b32.xlu0 %v4328_v51, %s4446_s2 }
0x1d5a   :  { %v982_v53 = vpop.permute.xlu0 %981 }
0x1d5b   :  { %v984_v55 = vmul.f32 %v982_v53, %v979_v52 }
0x1d5d   :  { %v986_v61 = vadd.f32 %v985_v54, %v984_v55 }
0x1d5f   :  { %994 = vrot.lane.b32.xlu0 %v986_v61, %s4446_s2 }
0x1d96   :  { %v1611_v36 = vpop.f32.mrf.mxu0 }
0x1d97   :  { %v1622_v56 = vadd.f32 %v1611_v36, %v4837_v6  ;;  %v1615_v60 = vadd.f32 %v1611_v36, %v1090_v59 }
0x1d98   :  { %v4061_v58 = vpop.f32.mrf.mxu0 }
0x1d99   :  { %1624 = vrot.lane.b32.xlu1 %v1622_v56, %s4446_s2  ;;  %v3701_v2 = vmul.f32 -1.442695, %v1615_v60  ;;  %v3706_v58 = vld [vmem:[%s5361_s11] ss:$0 sm:$0xff] }
0x1d9b   :  { %4329 = vpow2.f32 %v3701_v2 }
0x1da8   :  { %v4330_v34 = vpop.eup %4329 }
0x1da9   :  { %v1619_v63 = vadd.f32 1.0, %v4330_v34 }
0x1dab   :  { %4331 = vrcp.f32 %v1619_v63 }
0x1db8   :  { %v4332_v0 = vpop.eup %4331 }
0x1db9   :  { %v1634_v21 = vsub.f32 1.0, %v4332_v0  ;;  %v1640_v9 = vmul.f32 %v4332_v0, %v1539_v48 }
0x1dd1   :  { %v995_v62 = vpop.permute.xlu0 %994 }
0x1dd2   :  { %4025 = vmatmul.mubr.msk.f32.gmra.mxu1 %vm272_vm3, %v995_v62 }
0x1dd3   :  { %4066 = vmatprep.mubr.msk.f32.mxu1 %vm4445_vm2, %v4444_v17 }
0x1e0b   :  { %v1625_v1 = vpop.permute.xlu1 %1624 }
0x1e0c   :  { %v1627_v18 = vmul.f32 %v4332_v0, %v1625_v1  ;;  %v3709_v0 = vld [vmem:[%s5362_s12] ss:$0 sm:$0xff] }
0x1e0e   :  { %1629 = vrot.lane.b32.xlu1 %v1627_v18, %s4447_s0 }
0x1e80   :  { %v1630_v3 = vpop.permute.xlu1 %1629 }
0x1e81   :  { %v1632_v19 = vadd.f32 %v1630_v3, %v1090_v59 }
0x1e83   :  { %4333 = vtanh.f32 %v1632_v19 }
0x1e90   :  { %v4334_v7 = vpop.eup %4333 }
0x1e91   :  { %1636 = vrot.lane.b32.xlu1 %v4334_v7, %s4448_s7  ;;  %v4954_v7 = vld [vmem:[%s5363_s10 + $0x8] sm:$0xff] }
0x1e92   :  { %v4026_v12 = vpop.f32.mrf.mxu1 }
0x1e93   :  { %v1100_v46 = vadd.f32 %v4026_v12, %v4787_v57 }
0x1e94   :  { %v1094_v33 = vpop.f32.mrf.mxu1 }
0x1e95   :  { %v1095_v20 = vadd.f32 %v4787_v57, %v1094_v33  ;;  %v77_v57 = vld [vmem:[%s5360_s9] sm:$0xff] }
0x1f03   :  { %v1637_v8 = vpop.permute.xlu1 %1636 }
0x1f04   :  { %v1639_v24 = vmul.f32 %v1637_v8, %v1634_v21  ;;  %v4959_v21 = vld [vmem:[%s5363_s10] sm:$0xff] }
0x1f06   :  { %v1641_v10 = vadd.f32 %v1640_v9, %v1639_v24 }
0x1f08   :  { %1643 = vrot.lane.b32.xlu1 %v1641_v10, %s4448_s7 }
0x1f7a   :  { %v1644_v11 = vpop.permute.xlu1 %1643 }
0x1f7b   :  { %4067 = vmatmul.mubr.msk.f32.vlgmr.msra.gmra.mxu1 %vm1131_vm4, %v1644_v11 }
0x1f7c   :  { %4080 = vmatprep.mubr.msk.f32.mxu1 %vm4445_vm2, %v4444_v17 }
0x203b   :  { %v1713_v13 = vpop.f32.mrf.mxu1 }
0x203c   :  { %v1724_v15 = vadd.f32 %v1713_v13, %v4837_v6  ;;  %v1717_v22 = vadd.f32 %v1713_v13, %v1095_v20 }
0x203d   :  { %v4068_v16 = vpop.f32.mrf.mxu1 }
0x203e   :  { %1726 = vrot.lane.b32.xlu0 %v1724_v15, %s4446_s2  ;;  %v3703_v23 = vmul.f32 -1.442695, %v1717_v22 }
0x2040   :  { %4335 = vpow2.f32 %v3703_v23 }
0x204d   :  { %v4336_v25 = vpop.eup %4335 }
0x204e   :  { %v1721_v26 = vadd.f32 1.0, %v4336_v25 }
0x2050   :  { %4337 = vrcp.f32 %v1721_v26 }
0x205d   :  { %v4338_v27 = vpop.eup %4337 }
0x205e   :  { %v1736_v38 = vsub.f32 1.0, %v4338_v27  ;;  %v1742_v40 = vmul.f32 %v4338_v27, %v1641_v10 }
0x20b0   :  { %v1727_v30 = vpop.permute.xlu0 %1726 }
0x20b1   :  { %v1729_v28 = vmul.f32 %v4338_v27, %v1727_v30 }
0x20b3   :  { %1731 = vrot.lane.b32.xlu1 %v1729_v28, %s4447_s0 }
0x2125   :  { %v1732_v29 = vpop.permute.xlu1 %1731 }
0x2126   :  { %v1734_v32 = vadd.f32 %v1732_v29, %v1095_v20 }
0x2128   :  { %4339 = vtanh.f32 %v1734_v32 }
0x2135   :  { %v4340_v14 = vpop.eup %4339 }
0x2136   :  { %1738 = vrot.lane.b32.xlu0 %v4340_v14, %s4448_s7 }
0x21a8   :  { %v1739_v39 = vpop.permute.xlu0 %1738 }
0x21a9   :  { %v1741_v41 = vmul.f32 %v1739_v39, %v1736_v38 }
0x21ab   :  { %v1743_v42 = vadd.f32 %v1742_v40, %v1741_v41 }
0x21ad   :  { %1745 = vrot.lane.b32.xlu1 %v1743_v42, %s4448_s7 }
0x221f   :  { %v1746_v31 = vpop.permute.xlu1 %1745 }
0x2220   :  { %4074 = vmatmul.mubr.msk.f32.vlgmr.msra.gmra.mxu0 %vm1131_vm4, %v1746_v31 }
0x2221   :  { %4087 = vmatprep.mubr.msk.f32.mxu0 %vm4445_vm2, %v4444_v17  ;;  %4084 = vmatpush3.msra.mxu0 %v4954_v7 }
0x2222   :  { %4085 = vmatprep.subr.mxu0 %v4444_v17 }
0x2223   :  { %4086 = vmatpush3.msra.mxu0 %v4959_v21 }
0x2224   :  { %4097 = vmatprep.subr.mxu0 %v4444_v17 }
0x22e0   :  { %v1815_v43 = vpop.f32.mrf.mxu0 }
0x22e1   :  { %v1826_v44 = vadd.f32 %v1815_v43, %v4837_v6  ;;  %v1819_v47 = vadd.f32 %v1815_v43, %v1100_v46  ;;  %v78_v6 = vld [vmem:[%s5360_s9 + $0x8] sm:$0xff] }
0x22e2   :  { %v4075_v45 = vpop.f32.mrf.mxu0  ;;  %4077 = vmatpush3.msra.mxu1 %v78_v6 }
0x22e3   :  { %1828 = vrot.lane.b32.xlu0 %v1826_v44, %s4446_s2  ;;  %v3705_v48 = vmul.f32 -1.442695, %v1819_v47  ;;  %4078 = vmatprep.subr.mxu1 %v4444_v17 }
0x22e4   :  { %4079 = vmatpush3.msra.mxu1 %v77_v57 }
0x22e5   :  { %4341 = vpow2.f32 %v3705_v48  ;;  %4090 = vmatprep.subr.mxu1 %v4444_v17 }
0x22f2   :  { %v4342_v49 = vpop.eup %4341 }
0x22f3   :  { %v1823_v50 = vadd.f32 1.0, %v4342_v49 }
0x22f5   :  { %4343 = vrcp.f32 %v1823_v50 }
0x2302   :  { %v4344_v37 = vpop.eup %4343 }
0x2303   :  { %v1838_v53 = vsub.f32 1.0, %v4344_v37  ;;  %v1844_v55 = vmul.f32 %v4344_v37, %v1743_v42 }
0x2355   :  { %v1829_v4 = vpop.permute.xlu0 %1828 }
0x2356   :  { %v1831_v35 = vmul.f32 %v4344_v37, %v1829_v4 }
0x2358   :  { %1833 = vrot.lane.b32.xlu1 %v1831_v35, %s4447_s0 }
0x23ca   :  { %v1834_v5 = vpop.permute.xlu1 %1833 }
0x23cb   :  { %v1836_v51 = vadd.f32 %v1834_v5, %v1100_v46 }
0x23cd   :  { %4345 = vtanh.f32 %v1836_v51 }
0x23da   :  { %v4346_v52 = vpop.eup %4345 }
0x23db   :  { %1840 = vrot.lane.b32.xlu0 %v4346_v52, %s4448_s7 }
0x244d   :  { %v1841_v54 = vpop.permute.xlu0 %1840 }
0x244e   :  { %v1843_v61 = vmul.f32 %v1841_v54, %v1838_v53 }
0x2450   :  { %v1845_v36 = vadd.f32 %v1844_v55, %v1843_v61 }
0x2452   :  { %1853 = vrot.lane.b32.xlu1 %v1845_v36, %s4448_s7 }
0x24c4   :  { %v1854_v56 = vpop.permute.xlu1 %1853 }
0x24c5   :  { %4081 = vmatmul.mubr.msk.f32.vlgmr.msra.gmra.mxu1 %vm1131_vm4, %v1854_v56 }
0x24c6   :  { %4094 = vmatprep.mubr.msk.f32.mxu1 %vm4445_vm2, %v4444_v17  ;;  %4091 = vmatpush3.msra.mxu1 %v4954_v7 }
0x24c7   :  { %4092 = vmatprep.subr.mxu1 %v4444_v17 }
0x24c8   :  { %4093 = vmatpush3.msra.mxu1 %v4959_v21 }
0x24c9   :  { %4104 = vmatprep.subr.mxu1 %v4444_v17 }
0x2585   :  { %v1923_v62 = vpop.f32.mrf.mxu1 }
0x2586   :  { %v4943_v59 = vadd.f32 %v3706_v58, %v1923_v62 }
0x2587   :  { %v4082_v60 = vpop.f32.mrf.mxu1 }
0x2588   :  { %v3708_v2 = vmul.f32 -1.442695, %v4943_v59 }
0x258a   :  { %4347 = vpow2.f32 %v3708_v2 }
0x2597   :  { %v4348_v34 = vpop.eup %4347 }
0x2598   :  { %v1930_v63 = vadd.f32 1.0, %v4348_v34 }
0x259a   :  { %4349 = vrcp.f32 %v1930_v63 }
0x25a7   :  { %v4350_v1 = vpop.eup %4349 }
0x25a8   :  { %v1939_v18 = vmul.f32 %v4350_v1, %v3709_v0  ;;  %v1946_v9 = vsub.f32 1.0, %v4350_v1 }
0x25aa   :  { %1941 = vrot.lane.b32.xlu0 %v1939_v18, %s4447_s0 }
0x261c   :  { %v1942_v3 = vpop.permute.xlu0 %1941 }
0x261d   :  { %v1944_v19 = vadd.f32 %v1942_v3, %v4943_v59 }
0x261f   :  { %4351 = vtanh.f32 %v1944_v19 }
0x262c   :  { %v4352_v8 = vpop.eup %4351 }
0x262d   :  { %1948 = vrot.lane.b32.xlu1 %v4352_v8, %s4448_s7 }
0x2631   :  { %2034 = vrot.lane.b32.xlu1 %v3709_v0, %s4447_s0 }
0x269f   :  { %v1949_v24 = vpop.permute.xlu1 %1948 }
0x26a0   :  { %v1951_v10 = vmul.f32 %v1949_v24, %v1946_v9 }
0x26a2   :  { %1953 = vrot.lane.b32.xlu0 %v1951_v10, %s4448_s7 }
0x26a3   :  { %v4982_v12 = vpop.permute.xlu1 %2034 }
0x2714   :  { %v4972_v11 = vpop.permute.xlu0 %1953 }
0x2715   :  { %4088 = vmatmul.mubr.msk.f32.vlgmr.msra.gmra.mxu0 %vm1131_vm4, %v4972_v11 }
0x2716   :  { %4098 = vmatpush3.msra.mxu0 %v4954_v7  ;;  %4101 = vmatprep.mubr.msk.f32.mxu0 %vm4445_vm2, %v4444_v17 }
0x2717   :  { %4099 = vmatprep.subr.mxu0 %v4444_v17 }
0x2718   :  { %4100 = vmatpush3.msra.mxu0 %v4959_v21 }
0x2719   :  { %4111 = vmatprep.subr.mxu0 %v4444_v17 }
0x27d5   :  { %v2023_v33 = vpop.f32.mrf.mxu0 }
0x27d6   :  { %v2037_v13 = vadd.f32 %v4982_v12, %v2023_v33  ;;  %v2027_v16 = vadd.f32 %v2023_v33, %v4943_v59 }
0x27d7   :  { %v4089_v15 = vpop.f32.mrf.mxu0 }
0x27d8   :  { %2039 = vrot.lane.b32.xlu0 %v2037_v13, %s4446_s2  ;;  %v3711_v20 = vmul.f32 -1.442695, %v2027_v16 }
0x27da   :  { %4353 = vpow2.f32 %v3711_v20 }
0x27e7   :  { %v4354_v22 = vpop.eup %4353 }
0x27e8   :  { %v2031_v23 = vadd.f32 1.0, %v4354_v22 }
0x27ea   :  { %4355 = vrcp.f32 %v2031_v23 }
0x27f7   :  { %v4356_v25 = vpop.eup %4355 }
0x27f8   :  { %v2049_v32 = vsub.f32 1.0, %v4356_v25  ;;  %v2055_v38 = vmul.f32 %v4356_v25, %v1951_v10 }
0x284a   :  { %v2040_v26 = vpop.permute.xlu0 %2039 }
0x284b   :  { %v2042_v27 = vmul.f32 %v4356_v25, %v2040_v26 }
0x284d   :  { %2044 = vrot.lane.b32.xlu1 %v2042_v27, %s4447_s0 }
0x28bf   :  { %v2045_v30 = vpop.permute.xlu1 %2044 }
0x28c0   :  { %v2047_v28 = vadd.f32 %v2045_v30, %v4943_v59 }
0x28c2   :  { %4357 = vtanh.f32 %v2047_v28 }
0x28cf   :  { %v4358_v29 = vpop.eup %4357 }
0x28d0   :  { %2051 = vrot.lane.b32.xlu0 %v4358_v29, %s4448_s7 }
0x2942   :  { %v2052_v14 = vpop.permute.xlu0 %2051 }
0x2943   :  { %v2054_v39 = vmul.f32 %v2052_v14, %v2049_v32 }
0x2945   :  { %v2056_v40 = vadd.f32 %v2055_v38, %v2054_v39 }
0x2947   :  { %2058 = vrot.lane.b32.xlu1 %v2056_v40, %s4448_s7 }
0x29b9   :  { %v4991_v41 = vpop.permute.xlu1 %2058 }
0x29ba   :  { %4095 = vmatmul.mubr.msk.f32.vlgmr.msra.gmra.mxu1 %vm1131_vm4, %v4991_v41 }
0x29bb   :  { %4105 = vmatpush3.msra.mxu1 %v4954_v7  ;;  %4108 = vmatprep.mubr.msk.f32.mxu1 %vm4445_vm2, %v4444_v17 }
0x29bc   :  { %4106 = vmatprep.subr.mxu1 %v4444_v17 }
0x29bd   :  { %4107 = vmatpush3.msra.mxu1 %v4959_v21 }
0x29be   :  { %4118 = vmatprep.subr.mxu1 %v4444_v17 }
0x2a7a   :  { %v2128_v42 = vpop.f32.mrf.mxu1 }
0x2a7b   :  { %v2139_v31 = vadd.f32 %v2128_v42, %v4982_v12  ;;  %v2132_v44 = vadd.f32 %v2128_v42, %v4943_v59 }
0x2a7c   :  { %v4096_v43 = vpop.f32.mrf.mxu1 }
0x2a7d   :  { %2141 = vrot.lane.b32.xlu0 %v2139_v31, %s4446_s2  ;;  %v3713_v45 = vmul.f32 -1.442695, %v2132_v44 }
0x2a7f   :  { %4359 = vpow2.f32 %v3713_v45 }
0x2a8c   :  { %v4360_v46 = vpop.eup %4359 }
0x2a8d   :  { %v2136_v47 = vadd.f32 1.0, %v4360_v46 }
0x2a8f   :  { %4361 = vrcp.f32 %v2136_v47 }
0x2a9c   :  { %v4362_v48 = vpop.eup %4361 }
0x2a9d   :  { %v2151_v5 = vsub.f32 1.0, %v4362_v48  ;;  %v2157_v6 = vmul.f32 %v4362_v48, %v2056_v40 }
0x2aef   :  { %v2142_v49 = vpop.permute.xlu0 %2141 }
0x2af0   :  { %v2144_v50 = vmul.f32 %v4362_v48, %v2142_v49 }
0x2af2   :  { %2146 = vrot.lane.b32.xlu1 %v2144_v50, %s4447_s0 }
0x2b64   :  { %v2147_v37 = vpop.permute.xlu1 %2146 }
0x2b65   :  { %v2149_v4 = vadd.f32 %v2147_v37, %v4943_v59 }
0x2b67   :  { %4363 = vtanh.f32 %v2149_v4  ;;  %v84_v4 = vld [vmem:[%s5364_s13 + $0x8] sm:$0xff] }
0x2b74   :  { %v4364_v35 = vpop.eup %4363 }
0x2b75   :  { %2153 = vrot.lane.b32.xlu0 %v4364_v35, %s4448_s7 }
0x2be7   :  { %v2154_v51 = vpop.permute.xlu0 %2153 }
0x2be8   :  { %v2156_v57 = vmul.f32 %v2154_v51, %v2151_v5 }
0x2bea   :  { %v2158_v52 = vadd.f32 %v2157_v6, %v2156_v57 }
0x2bec   :  { %2160 = vrot.lane.b32.xlu1 %v2158_v52, %s4448_s7 }
0x2c5e   :  { %v5008_v53 = vpop.permute.xlu1 %2160 }
0x2c5f   :  { %4102 = vmatmul.mubr.msk.f32.vlgmr.msra.gmra.mxu0 %vm1131_vm4, %v5008_v53 }
0x2c60   :  { %4112 = vmatpush3.msra.mxu0 %v4954_v7  ;;  %4115 = vmatprep.mubr.msk.f32.mxu0 %vm4445_vm2, %v4444_v17 }
0x2c61   :  { %4113 = vmatprep.subr.mxu0 %v4444_v17 }
0x2c62   :  { %4114 = vmatpush3.msra.mxu0 %v4959_v21 }
0x2c63   :  { %4125 = vmatprep.subr.mxu0 %v4444_v17 }
0x2d1f   :  { %v2230_v54 = vpop.f32.mrf.mxu0 }
0x2d20   :  { %v2241_v55 = vadd.f32 %v2230_v54, %v4982_v12  ;;  %v2234_v36 = vadd.f32 %v2230_v54, %v4943_v59  ;;  %v83_v54 = vld [vmem:[%s5364_s13] sm:$0xff] }
0x2d21   :  { %v4103_v61 = vpop.f32.mrf.mxu0 }
0x2d22   :  { %2243 = vrot.lane.b32.xlu0 %v2241_v55, %s4446_s2  ;;  %v3715_v56 = vmul.f32 -1.442695, %v2234_v36 }
0x2d24   :  { %4365 = vpow2.f32 %v3715_v56 }
0x2d31   :  { %v4366_v58 = vpop.eup %4365 }
0x2d32   :  { %v2238_v62 = vadd.f32 1.0, %v4366_v58 }
0x2d34   :  { %4367 = vrcp.f32 %v2238_v62 }
0x2d41   :  { %v4368_v60 = vpop.eup %4367 }
0x2d42   :  { %v2253_v18 = vsub.f32 1.0, %v4368_v60  ;;  %v2259_v19 = vmul.f32 %v4368_v60, %v2158_v52 }
0x2d94   :  { %v2244_v2 = vpop.permute.xlu0 %2243 }
0x2d95   :  { %v2246_v34 = vmul.f32 %v4368_v60, %v2244_v2  ;;  %v3734_v2 = vld [vmem:[%s5366_s16] ss:$0 sm:$0xff] }
0x2d97   :  { %2248 = vrot.lane.b32.xlu1 %v2246_v34, %s4447_s0 }
0x2e09   :  { %v2249_v63 = vpop.permute.xlu1 %2248 }
0x2e0a   :  { %v2251_v0 = vadd.f32 %v2249_v63, %v4943_v59 }
0x2e0c   :  { %4369 = vtanh.f32 %v2251_v0 }
0x2e19   :  { %v4370_v1 = vpop.eup %4369 }
0x2e1a   :  { %2255 = vrot.lane.b32.xlu0 %v4370_v1, %s4448_s7 }
0x2e8c   :  { %v2256_v3 = vpop.permute.xlu0 %2255 }
0x2e8d   :  { %v2258_v8 = vmul.f32 %v2256_v3, %v2253_v18 }
0x2e8f   :  { %v2260_v9 = vadd.f32 %v2259_v19, %v2258_v8 }
0x2e91   :  { %2262 = vrot.lane.b32.xlu1 %v2260_v9, %s4448_s7 }
0x2f03   :  { %v5025_v24 = vpop.permute.xlu1 %2262 }
0x2f04   :  { %4109 = vmatmul.mubr.msk.f32.vlgmr.msra.gmra.mxu1 %vm1131_vm4, %v5025_v24 }
0x2f05   :  { %4119 = vmatpush3.msra.mxu1 %v4954_v7  ;;  %4122 = vmatprep.mubr.msk.f32.mxu1 %vm4445_vm2, %v4444_v17 }
0x2f06   :  { %4120 = vmatprep.subr.mxu1 %v4444_v17 }
0x2f07   :  { %4121 = vmatpush3.msra.mxu1 %v4959_v21 }
0x2f08   :  { %4132 = vmatprep.subr.mxu1 %v84_v4 }
0x2fc4   :  { %v2332_v10 = vpop.f32.mrf.mxu1 }
0x2fc5   :  { %v2343_v33 = vadd.f32 %v2332_v10, %v4982_v12  ;;  %v2336_v15 = vadd.f32 %v2332_v10, %v4943_v59 }
0x2fc6   :  { %v4110_v13 = vpop.f32.mrf.mxu1 }
0x2fc7   :  { %2345 = vrot.lane.b32.xlu0 %v2343_v33, %s4446_s2  ;;  %v3717_v16 = vmul.f32 -1.442695, %v2336_v15 }
0x2fc9   :  { %4371 = vpow2.f32 %v3717_v16 }
0x2fd6   :  { %v4372_v20 = vpop.eup %4371 }
0x2fd7   :  { %v2340_v22 = vadd.f32 1.0, %v4372_v20 }
0x2fd9   :  { %4373 = vrcp.f32 %v2340_v22 }
0x2fe6   :  { %v4374_v23 = vpop.eup %4373 }
0x2fe7   :  { %v2355_v29 = vsub.f32 1.0, %v4374_v23  ;;  %v2361_v14 = vmul.f32 %v4374_v23, %v2260_v9 }
0x3039   :  { %v2346_v25 = vpop.permute.xlu0 %2345 }
0x303a   :  { %v2348_v26 = vmul.f32 %v4374_v23, %v2346_v25  ;;  %v5102_v25 = vld [vmem:[%s5367_s14 + $0x18] sm:$0xff] }
0x303c   :  { %2350 = vrot.lane.b32.xlu1 %v2348_v26, %s4447_s0  ;;  %v5108_v26 = vld [vmem:[%s5367_s14 + $0x10] sm:$0xff] }
0x30ae   :  { %v2351_v27 = vpop.permute.xlu1 %2350 }
0x30af   :  { %v2353_v30 = vadd.f32 %v2351_v27, %v4943_v59  ;;  %v5115_v27 = vld [vmem:[%s5367_s14 + $0x8] sm:$0xff] }
0x30b1   :  { %4375 = vtanh.f32 %v2353_v30  ;;  %v5122_v30 = vld [vmem:[%s5367_s14] sm:$0xff] }
0x30be   :  { %v4376_v28 = vpop.eup %4375 }
0x30bf   :  { %2357 = vrot.lane.b32.xlu0 %v4376_v28, %s4448_s7 }
0x3131   :  { %v2358_v32 = vpop.permute.xlu0 %2357 }
0x3132   :  { %v2360_v38 = vmul.f32 %v2358_v32, %v2355_v29 }
0x3134   :  { %v2362_v39 = vadd.f32 %v2361_v14, %v2360_v38 }
0x3136   :  { %2364 = vrot.lane.b32.xlu1 %v2362_v39, %s4448_s7 }
0x31a8   :  { %v2365_v40 = vpop.permute.xlu1 %2364 }
0x31a9   :  { %4116 = vmatmul.mubr.msk.f32.vlgmr.msra.gmra.mxu0 %vm1131_vm4, %v2365_v40 }
0x31aa   :  { %4126 = vmatpush3.msra.mxu0 %v4954_v7  ;;  %4129 = vmatprep.mubr.msk.f32.mxu0 %vm4445_vm2, %v4444_v17 }
0x31ab   :  { %4127 = vmatprep.subr.mxu0 %v4444_v17 }
0x31ac   :  { %4128 = vmatpush3.msra.mxu0 %v4959_v21 }
0x31ad   :  { %4148 = vmatprep.subr.mxu0 %v4444_v17 }
0x3269   :  { %v2434_v42 = vpop.f32.mrf.mxu0 }
0x326a   :  { %v2445_v31 = vadd.f32 %v2434_v42, %v4982_v12  ;;  %v2438_v44 = vadd.f32 %v2434_v42, %v4943_v59 }
0x326b   :  { %v4117_v43 = vpop.f32.mrf.mxu0 }
0x326c   :  { %2447 = vrot.lane.b32.xlu0 %v2445_v31, %s4446_s2  ;;  %v3719_v45 = vmul.f32 -1.442695, %v2438_v44 }
0x326e   :  { %4377 = vpow2.f32 %v3719_v45 }
0x327b   :  { %v4378_v7 = vpop.eup %4377 }
0x327c   :  { %v2442_v46 = vadd.f32 1.0, %v4378_v7 }
0x327e   :  { %4379 = vrcp.f32 %v2442_v46 }
0x328b   :  { %v4380_v47 = vpop.eup %4379 }
0x328c   :  { %v2457_v35 = vsub.f32 1.0, %v4380_v47  ;;  %v2463_v51 = vmul.f32 %v4380_v47, %v2362_v39 }
0x32de   :  { %v2448_v48 = vpop.permute.xlu0 %2447 }
0x32df   :  { %v2450_v49 = vmul.f32 %v4380_v47, %v2448_v48 }
0x32e1   :  { %2452 = vrot.lane.b32.xlu1 %v2450_v49, %s4447_s0 }
0x3353   :  { %v2453_v21 = vpop.permute.xlu1 %2452 }
0x3354   :  { %v2455_v50 = vadd.f32 %v2453_v21, %v4943_v59 }
0x3356   :  { %4381 = vtanh.f32 %v2455_v50 }
0x3363   :  { %v4382_v37 = vpop.eup %4381 }
0x3364   :  { %2459 = vrot.lane.b32.xlu0 %v4382_v37, %s4448_s7 }
0x33d6   :  { %v2460_v5 = vpop.permute.xlu0 %2459 }
0x33d7   :  { %v2462_v6 = vmul.f32 %v2460_v5, %v2457_v35 }
0x33d9   :  { %v5057_v57 = vadd.f32 %v2463_v51, %v2462_v6 }
0x33db   :  { %2466 = vrot.lane.b32.xlu1 %v5057_v57, %s4448_s7 }
0x344d   :  { %v2467_v52 = vpop.permute.xlu1 %2466 }
0x344e   :  { %4123 = vmatmul.mubr.msk.f32.vlgmr.msra.gmra.mxu1 %vm1131_vm4, %v2467_v52 }
0x344f   :  { %4133 = vmatpush3.msra.mxu1 %v84_v4  ;;  %4136 = vmatprep.mubr.msk.f32.mxu1 %vm1131_vm4, %v4972_v11 }
0x3450   :  { %4134 = vmatprep.subr.mxu1 %v83_v54 }
0x3451   :  { %4135 = vmatpush3.msra.mxu1 %v83_v54 }
0x3452   :  { %4137 = vmatmul.mubr.msk.f32.vlgmr.msra.gmra.mxu1 %vm1131_vm4, %v4991_v41  ;;  %4170 = vmatprep.subr.mxu1 %v4444_v17  ;;  %v5083_v41 = vld [vmem:[%s5365_s15] ss:$0 sm:$0xff] }
0x3453   :  { %4139 = vmatprep.mubr.msk.f32.mxu1 %vm1131_vm4, %v5008_v53  ;;  %4171 = vmatpush3.msra.mxu1 %v5102_v25 }
0x3454   :  { %4172 = vmatprep.subr.mxu1 %v4444_v17 }
0x3455   :  { %4173 = vmatpush3.msra.mxu1 %v5108_v26 }
0x3456   :  { %4140 = vmatmul.mubr.msk.f32.gmra.mxu1 %vm1131_vm4, %v5025_v24  ;;  %4174 = vmatprep.subr.mxu1 %v4444_v17 }
0x3457   :  { %4142 = vmatprep.mubr.msk.f32.mxu1 %vm1131_vm4, %v2365_v40  ;;  %4175 = vmatpush3.msra.mxu1 %v5115_v27 }
0x3458   :  { %4176 = vmatprep.subr.mxu1 %v4444_v17 }
0x3459   :  { %4177 = vmatpush3.msra.mxu1 %v5122_v30 }
0x345a   :  { %4143 = vmatmul.mubr.msk.f32.gmra.mxu1 %vm1131_vm4, %v2467_v52  ;;  %4192 = vmatprep.subr.mxu1 %v4444_v17 }
0x350e   :  { %v2536_v55 = vpop.f32.mrf.mxu1 }
0x350f   :  { %v2547_v11 = vadd.f32 %v2536_v55, %v4982_v12  ;;  %v2540_v0 = vadd.f32 %v2536_v55, %v4943_v59 }
0x3510   :  { %v4124_v61 = vpop.f32.mrf.mxu1 }
0x3511   :  { %2549 = vrot.lane.b32.xlu0 %v2547_v11, %s4446_s2  ;;  %v3721_v1 = vmul.f32 -1.442695, %v2540_v0 }
0x3512   :  { %v5078_v36 = vpop.f32.mrf.mxu1 }
0x3513   :  { %v2752_v46 = vadd.f32 %v5078_v36, %v5083_v41 }
0x3514   :  { %v2746_v53 = vpop.f32.mrf.mxu1 }
0x3515   :  { %v2747_v56 = vadd.f32 %v5083_v41, %v2746_v53 }
0x3517   :  { %v3733_v58 = vmul.f32 -1.442695, %v2747_v56 }
0x3519   :  { %4383 = vpow2.f32 %v3733_v58 }
0x3526   :  { %v4384_v62 = vpop.eup %4383 }
0x3527   :  { %v2788_v60 = vadd.f32 1.0, %v4384_v62 }
0x3529   :  { %4385 = vrcp.f32 %v2788_v60 }
0x352a   :  { %4387 = vpow2.f32 %v3721_v1 }
0x3536   :  { %v4386_v34 = vpop.eup %4385 }
0x3537   :  { %v2797_v63 = vmul.f32 %v4386_v34, %v3734_v2  ;;  %v4388_v18 = vpop.eup %4387  ;;  %v2804_v20 = vsub.f32 1.0, %v4386_v34 }
0x3538   :  { %v2544_v3 = vadd.f32 1.0, %v4388_v18 }
0x3539   :  { %2799 = vrot.lane.b32.xlu0 %v2797_v63, %s4443_s29 }
0x353a   :  { %4389 = vrcp.f32 %v2544_v3 }
0x3547   :  { %v4390_v19 = vpop.eup %4389 }
0x3548   :  { %v2559_v28 = vsub.f32 1.0, %v4390_v19  ;;  %v2565_v32 = vmul.f32 %v4390_v19, %v5057_v57 }
0x3583   :  { %v2550_v8 = vpop.permute.xlu0 %2549 }
0x3584   :  { %v2552_v9 = vmul.f32 %v4390_v19, %v2550_v8 }
0x3586   :  { %2554 = vrot.lane.b32.xlu1 %v2552_v9, %s4447_s0 }
0x35ab   :  { %v2800_v24 = vpop.permute.xlu0 %2799 }
0x35ac   :  { %v2802_v10 = vadd.f32 %v2800_v24, %v2747_v56 }
0x35ae   :  { %4391 = vtanh.f32 %v2802_v10  ;;  %v4141_v10 = vpop.f32.mrf.mxu1 }
0x35bb   :  { %v4392_v33 = vpop.eup %4391 }
0x35bc   :  { %2806 = vrot.lane.b32.xlu0 %v4392_v33, %s4446_s2  ;;  %v2756_v33 = vpop.f32.mrf.mxu1 }
0x35f8   :  { %v2555_v13 = vpop.permute.xlu1 %2554 }
0x35f9   :  { %v2557_v15 = vadd.f32 %v2555_v13, %v4943_v59  ;;  %v2757_v13 = vadd.f32 %v5083_v41, %v2756_v33 }
0x35fb   :  { %4393 = vtanh.f32 %v2557_v15 }
0x3608   :  { %v4394_v16 = vpop.eup %4393 }
0x3609   :  { %2561 = vrot.lane.b32.xlu1 %v4394_v16, %s4448_s7 }
0x362e   :  { %v2807_v22 = vpop.permute.xlu0 %2806 }
0x362f   :  { %v5095_v23 = vmul.f32 %v2807_v22, %v2804_v20 }
0x3631   :  { %2811 = vrot.lane.b32.xlu0 %v5095_v23, %s4446_s2 }
0x367b   :  { %v2562_v29 = vpop.permute.xlu1 %2561 }
0x367c   :  { %v2564_v14 = vmul.f32 %v2562_v29, %v2559_v28 }
0x367e   :  { %v5128_v38 = vadd.f32 %v2565_v32, %v2564_v14 }
0x3680   :  { %2568 = vrot.lane.b32.xlu1 %v5128_v38, %s4448_s7 }
0x3684   :  { %2892 = vrot.lane.b32.xlu1 %v3734_v2, %s4443_s29 }
0x36a3   :  { %v5143_v40 = vpop.permute.xlu0 %2811 }
0x36f2   :  { %v2569_v39 = vpop.permute.xlu1 %2568 }
0x36f3   :  { %4130 = vmatmul.mubr.msk.f32.vlgmr.msra.gmra.mxu0 %vm1131_vm4, %v2569_v39  ;;  %4145 = vmatprep.mubr.msk.f32.mxu1 %vm1131_vm4, %v2569_v39 }
0x36f4   :  { %4149 = vmatpush3.msra.mxu0 %v5102_v25  ;;  %4156 = vmatprep.mubr.msk.f32.mxu0 %vm4445_vm2, %v4444_v17 }
0x36f5   :  { %4150 = vmatprep.subr.mxu0 %v4444_v17 }
0x36f6   :  { %4151 = vmatpush3.msra.mxu0 %v5108_v26  ;;  %v5159_v43 = vpop.permute.xlu1 %2892 }
0x36f7   :  { %4152 = vmatprep.subr.mxu0 %v4444_v17 }
0x36f8   :  { %4153 = vmatpush3.msra.mxu0 %v5115_v27 }
0x36f9   :  { %4154 = vmatprep.subr.mxu0 %v4444_v17 }
0x36fa   :  { %4155 = vmatpush3.msra.mxu0 %v5122_v30 }
0x36fb   :  { %4157 = vmatmul.mubr.msk.f32.vlgmr.msra.gmra.mxu0 %vm272_vm3, %v5143_v40  ;;  %4159 = vmatprep.subr.mxu0 %v4444_v17 }
0x36fc   :  { %4160 = vmatpush3.msra.mxu0 %v5102_v25  ;;  %4167 = vmatprep.mubr.msk.f32.mxu0 %vm4445_vm2, %v4444_v17 }
0x36fd   :  { %4161 = vmatprep.subr.mxu0 %v4444_v17 }
0x36fe   :  { %4162 = vmatpush3.msra.mxu0 %v5108_v26 }
0x36ff   :  { %4163 = vmatprep.subr.mxu0 %v4444_v17 }
0x3700   :  { %4164 = vmatpush3.msra.mxu0 %v5115_v27 }
0x3701   :  { %4165 = vmatprep.subr.mxu0 %v4444_v17 }
0x3702   :  { %4166 = vmatpush3.msra.mxu0 %v5122_v30 }
0x3703   :  { %4181 = vmatprep.subr.mxu0 %v4444_v17 }
0x37b3   :  { %v2638_v42 = vpop.f32.mrf.mxu0 }
0x37b4   :  { %v2649_v6 = vadd.f32 %v2638_v42, %v4982_v12  ;;  %v2642_v57 = vadd.f32 %v2638_v42, %v4943_v59 }
0x37b5   :  { %v4131_v31 = vpop.f32.mrf.mxu0 }
0x37b6   :  { %v3723_v52 = vmul.f32 -1.442695, %v2642_v57 }
0x37bb   :  { %v2881_v44 = vpop.f32.mrf.mxu0 }
0x37bc   :  { %v2895_v45 = vadd.f32 %v5159_v43, %v2881_v44  ;;  %v2885_v47 = vadd.f32 %v2881_v44, %v2752_v46 }
0x37bd   :  { %v4158_v7 = vpop.f32.mrf.mxu0 }
0x37be   :  { %2897 = vrot.lane.b32.xlu0 %v2895_v45, %s4443_s29  ;;  %v3736_v48 = vmul.f32 -1.442695, %v2885_v47 }
0x37c0   :  { %4395 = vpow2.f32 %v3736_v48 }
0x37cd   :  { %v4396_v49 = vpop.eup %4395 }
0x37ce   :  { %v2889_v21 = vadd.f32 1.0, %v4396_v49 }
0x37d0   :  { %4397 = vrcp.f32 %v2889_v21 }
0x37dd   :  { %v4398_v50 = vpop.eup %4397 }
0x37de   :  { %v2907_v11 = vsub.f32 1.0, %v4398_v50  ;;  %v2913_v36 = vmul.f32 %v4398_v50, %v5095_v23 }
0x3830   :  { %v2898_v37 = vpop.permute.xlu0 %2897 }
0x3831   :  { %v2900_v4 = vmul.f32 %v4398_v50, %v2898_v37 }
0x3833   :  { %2902 = vrot.lane.b32.xlu1 %v2900_v4, %s4443_s29  ;;  %v2762_v4 = vadd.f32 %v4141_v10, %v5083_v41 }
0x38a5   :  { %v2903_v35 = vpop.permute.xlu1 %2902 }
0x38a6   :  { %v2905_v5 = vadd.f32 %v2903_v35, %v2752_v46  ;;  %v5214_v46 = vpop.f32.mrf.mxu1 }
0x38a8   :  { %4399 = vtanh.f32 %v2905_v5  ;;  %v2766_v47 = vpop.f32.mrf.mxu1 }
0x38a9   :  { %4401 = vpow2.f32 %v3723_v52 }
0x38b5   :  { %v4400_v51 = vpop.eup %4399 }
0x38b6   :  { %2909 = vrot.lane.b32.xlu0 %v4400_v51, %s4446_s2  ;;  %v4402_v54 = vpop.eup %4401 }
0x38b7   :  { %v2646_v55 = vadd.f32 1.0, %v4402_v54 }
0x38b9   :  { %4403 = vrcp.f32 %v2646_v55 }
0x38ba   :  { %2651 = vrot.lane.b32.xlu0 %v2649_v6, %s4446_s2 }
0x38c6   :  { %v4404_v58 = vpop.eup %4403 }
0x38c7   :  { %v2661_v0 = vsub.f32 1.0, %v4404_v58  ;;  %v2667_v1 = vmul.f32 %v4404_v58, %v5128_v38 }
0x3928   :  { %v2910_v61 = vpop.permute.xlu0 %2909 }
0x3929   :  { %v2912_v53 = vmul.f32 %v2910_v61, %v2907_v11 }
0x392b   :  { %v2914_v56 = vadd.f32 %v2913_v36, %v2912_v53 }
0x392c   :  { %v2652_v62 = vpop.permute.xlu0 %2651 }
0x392d   :  { %v2654_v60 = vmul.f32 %v4404_v58, %v2652_v62  ;;  %2916 = vrot.lane.b32.xlu1 %v2914_v56, %s4446_s2 }
0x392f   :  { %2656 = vrot.lane.b32.xlu0 %v2654_v60, %s4447_s0 }
0x399f   :  { %v5173_v12 = vpop.permute.xlu1 %2916 }
0x39a0   :  { %4168 = vmatmul.mubr.msk.f32.vlgmr.msra.gmra.mxu0 %vm272_vm3, %v5173_v12 }
0x39a1   :  { %v2657_v2 = vpop.permute.xlu0 %2656  ;;  %4182 = vmatpush3.msra.mxu0 %v5102_v25  ;;  %4189 = vmatprep.mubr.msk.f32.mxu0 %vm4445_vm2, %v4444_v17 }
0x39a2   :  { %v2659_v34 = vadd.f32 %v2657_v2, %v4943_v59  ;;  %4183 = vmatprep.subr.mxu0 %v4444_v17 }
0x39a3   :  { %4184 = vmatpush3.msra.mxu0 %v5108_v26 }
0x39a4   :  { %4405 = vtanh.f32 %v2659_v34  ;;  %4185 = vmatprep.subr.mxu0 %v4444_v17 }
0x39a5   :  { %4186 = vmatpush3.msra.mxu0 %v5115_v27 }
0x39a6   :  { %4187 = vmatprep.subr.mxu0 %v4444_v17 }
0x39a7   :  { %4188 = vmatpush3.msra.mxu0 %v5122_v30 }
0x39a8   :  { %4203 = vmatprep.subr.mxu0 %v4444_v17 }
0x39b1   :  { %v4406_v63 = vpop.eup %4405 }
0x39b2   :  { %2663 = vrot.lane.b32.xlu0 %v4406_v63, %s4448_s7 }
0x3a24   :  { %v2664_v59 = vpop.permute.xlu0 %2663 }
0x3a25   :  { %v2666_v18 = vmul.f32 %v2664_v59, %v2661_v0  ;;  %v2767_v0 = vadd.f32 %v5083_v41, %v2766_v47 }
0x3a27   :  { %v2668_v3 = vadd.f32 %v2667_v1, %v2666_v18 }
0x3a29   :  { %2676 = vrot.lane.b32.xlu0 %v2668_v3, %s4448_s7 }
0x3a60   :  { %v2986_v19 = vpop.f32.mrf.mxu0 }
0x3a61   :  { %v2997_v8 = vadd.f32 %v2986_v19, %v5159_v43  ;;  %v2990_v15 = vadd.f32 %v2986_v19, %v2757_v13 }
0x3a62   :  { %v4169_v9 = vpop.f32.mrf.mxu0 }
0x3a63   :  { %2999 = vrot.lane.b32.xlu1 %v2997_v8, %s4443_s29  ;;  %v3738_v16 = vmul.f32 -1.442695, %v2990_v15 }
0x3a65   :  { %4407 = vpow2.f32 %v3738_v16 }
0x3a72   :  { %v4408_v20 = vpop.eup %4407 }
0x3a73   :  { %v2994_v22 = vadd.f32 1.0, %v4408_v20 }
0x3a75   :  { %4409 = vrcp.f32 %v2994_v22 }
0x3a82   :  { %v4410_v23 = vpop.eup %4409 }
0x3a83   :  { %v3009_v39 = vsub.f32 1.0, %v4410_v23  ;;  %v3015_v31 = vmul.f32 %v4410_v23, %v2914_v56 }
0x3a9b   :  { %v2677_v24 = vpop.permute.xlu0 %2676 }
0x3a9c   :  { %4146 = vmatmul.mubr.msk.f32.gmra.mxu1 %vm1131_vm4, %v2677_v24 }
0x3a9d   :  { %4178 = vmatprep.mubr.msk.f32.mxu1 %vm4445_vm2, %v4444_v17 }
0x3ad5   :  { %v3000_v28 = vpop.permute.xlu1 %2999 }
0x3ad6   :  { %v3002_v29 = vmul.f32 %v4410_v23, %v3000_v28 }
0x3ad8   :  { %3004 = vrot.lane.b32.xlu1 %v3002_v29, %s4443_s29 }
0x3b4a   :  { %v3005_v32 = vpop.permute.xlu1 %3004 }
0x3b4b   :  { %v3007_v14 = vadd.f32 %v3005_v32, %v2757_v13 }
0x3b4d   :  { %4411 = vtanh.f32 %v3007_v14 }
0x3b5a   :  { %v4412_v38 = vpop.eup %4411 }
0x3b5b   :  { %3011 = vrot.lane.b32.xlu1 %v4412_v38, %s4446_s2 }
0x3b5c   :  { %v5216_v48 = vpop.f32.mrf.mxu1 }
0x3b5e   :  { %v5218_v49 = vpop.f32.mrf.mxu1 }
0x3bcd   :  { %v3012_v42 = vpop.permute.xlu1 %3011 }
0x3bce   :  { %v3014_v44 = vmul.f32 %v3012_v42, %v3009_v39 }
0x3bd0   :  { %v3016_v45 = vadd.f32 %v3015_v31, %v3014_v44  ;;  %v94_v44 = vld [vmem:[%s5368_s17 + $0x18] sm:$0xff] }
0x3bd2   :  { %3018 = vrot.lane.b32.xlu1 %v3016_v45, %s4446_s2 }
0x3c44   :  { %v5200_v7 = vpop.permute.xlu1 %3018 }
0x3c45   :  { %4179 = vmatmul.mubr.msk.f32.vlgmr.msra.gmra.mxu1 %vm272_vm3, %v5200_v7 }
0x3c46   :  { %4193 = vmatpush3.msra.mxu1 %v5102_v25  ;;  %4200 = vmatprep.mubr.msk.f32.mxu1 %vm4445_vm2, %v4444_v17 }
0x3c47   :  { %4194 = vmatprep.subr.mxu1 %v4444_v17 }
0x3c48   :  { %4195 = vmatpush3.msra.mxu1 %v5108_v26 }
0x3c49   :  { %4196 = vmatprep.subr.mxu1 %v4444_v17 }
0x3c4a   :  { %4197 = vmatpush3.msra.mxu1 %v5115_v27 }
0x3c4b   :  { %4198 = vmatprep.subr.mxu1 %v4444_v17 }
0x3c4c   :  { %4199 = vmatpush3.msra.mxu1 %v5122_v30 }
0x3c4d   :  { %4214 = vmatprep.subr.mxu1 %v4444_v17 }
0x3d05   :  { %v3088_v21 = vpop.f32.mrf.mxu1 }
0x3d06   :  { %v3099_v50 = vadd.f32 %v3088_v21, %v5159_v43  ;;  %v3092_v35 = vadd.f32 %v3088_v21, %v2762_v4 }
0x3d07   :  { %v4180_v37 = vpop.f32.mrf.mxu1 }
0x3d08   :  { %3101 = vrot.lane.b32.xlu0 %v3099_v50, %s4443_s29  ;;  %v3740_v5 = vmul.f32 -1.442695, %v3092_v35  ;;  %v93_v35 = vld [vmem:[%s5368_s17 + $0x10] sm:$0xff] }
0x3d0a   :  { %4413 = vpow2.f32 %v3740_v5  ;;  %v92_v5 = vld [vmem:[%s5368_s17 + $0x8] sm:$0xff] }
0x3d17   :  { %v4414_v51 = vpop.eup %4413 }
0x3d18   :  { %v3096_v6 = vadd.f32 1.0, %v4414_v51  ;;  %v91_v51 = vld [vmem:[%s5368_s17] sm:$0xff] }
0x3d1a   :  { %4415 = vrcp.f32 %v3096_v6 }
0x3d27   :  { %v4416_v57 = vpop.eup %4415 }
0x3d28   :  { %v3111_v36 = vsub.f32 1.0, %v4416_v57  ;;  %v3117_v56 = vmul.f32 %v4416_v57, %v3016_v45 }
0x3d7a   :  { %v3102_v52 = vpop.permute.xlu0 %3101 }
0x3d7b   :  { %v3104_v54 = vmul.f32 %v4416_v57, %v3102_v52 }
0x3d7d   :  { %3106 = vrot.lane.b32.xlu1 %v3104_v54, %s4443_s29 }
0x3def   :  { %v3107_v55 = vpop.permute.xlu1 %3106 }
0x3df0   :  { %v3109_v11 = vadd.f32 %v3107_v55, %v2762_v4 }
0x3df2   :  { %4417 = vtanh.f32 %v3109_v11 }
0x3dff   :  { %v4418_v61 = vpop.eup %4417 }
0x3e00   :  { %3113 = vrot.lane.b32.xlu0 %v4418_v61, %s4446_s2 }
0x3e72   :  { %v3114_v53 = vpop.permute.xlu0 %3113 }
0x3e73   :  { %v3116_v58 = vmul.f32 %v3114_v53, %v3111_v36 }
0x3e75   :  { %v3118_v62 = vadd.f32 %v3117_v56, %v3116_v58 }
0x3e77   :  { %3120 = vrot.lane.b32.xlu1 %v3118_v62, %s4446_s2 }
0x3ee9   :  { %v5226_v60 = vpop.permute.xlu1 %3120 }
0x3eea   :  { %4190 = vmatmul.mubr.msk.f32.vlgmr.msra.gmra.mxu0 %vm272_vm3, %v5226_v60 }
0x3eeb   :  { %4204 = vmatpush3.msra.mxu0 %v5102_v25  ;;  %4211 = vmatprep.mubr.msk.f32.mxu0 %vm4445_vm2, %v4444_v17 }
0x3eec   :  { %4205 = vmatprep.subr.mxu0 %v4444_v17 }
0x3eed   :  { %4206 = vmatpush3.msra.mxu0 %v5108_v26 }
0x3eee   :  { %4207 = vmatprep.subr.mxu0 %v4444_v17 }
0x3eef   :  { %4208 = vmatpush3.msra.mxu0 %v5115_v27 }
0x3ef0   :  { %4209 = vmatprep.subr.mxu0 %v4444_v17 }
0x3ef1   :  { %4210 = vmatpush3.msra.mxu0 %v5122_v30 }
0x3ef2   :  { %4225 = vmatprep.subr.mxu0 %v94_v44 }
0x3faa   :  { %v3190_v2 = vpop.f32.mrf.mxu0 }
0x3fab   :  { %v3201_v34 = vadd.f32 %v3190_v2, %v5159_v43  ;;  %v3194_v59 = vadd.f32 %v3190_v2, %v2767_v0  ;;  %v2777_v2 = vadd.f32 %v5083_v41, %v5218_v49 }
0x3fac   :  { %v4191_v63 = vpop.f32.mrf.mxu0 }
0x3fad   :  { %3203 = vrot.lane.b32.xlu0 %v3201_v34, %s4443_s29  ;;  %v3742_v1 = vmul.f32 -1.442695, %v3194_v59 }
0x3faf   :  { %4419 = vpow2.f32 %v3742_v1 }
0x3fbc   :  { %v4420_v18 = vpop.eup %4419 }
0x3fbd   :  { %v3198_v3 = vadd.f32 1.0, %v4420_v18 }
0x3fbf   :  { %4421 = vrcp.f32 %v3198_v3 }
0x3fcc   :  { %v4422_v19 = vpop.eup %4421 }
0x3fcd   :  { %v3213_v13 = vsub.f32 1.0, %v4422_v19  ;;  %v3219_v16 = vmul.f32 %v4422_v19, %v3118_v62 }
0x401f   :  { %v3204_v8 = vpop.permute.xlu0 %3203 }
0x4020   :  { %v3206_v9 = vmul.f32 %v4422_v19, %v3204_v8 }
0x4022   :  { %3208 = vrot.lane.b32.xlu1 %v3206_v9, %s4443_s29 }
0x4094   :  { %v3209_v24 = vpop.permute.xlu1 %3208 }
0x4095   :  { %v3211_v10 = vadd.f32 %v3209_v24, %v2767_v0 }
0x4097   :  { %4423 = vtanh.f32 %v3211_v10 }
0x40a4   :  { %v4424_v33 = vpop.eup %4423 }
0x40a5   :  { %3215 = vrot.lane.b32.xlu0 %v4424_v33, %s4446_s2 }
0x4117   :  { %v3216_v15 = vpop.permute.xlu0 %3215 }
0x4118   :  { %v3218_v20 = vmul.f32 %v3216_v15, %v3213_v13 }
0x411a   :  { %v3220_v22 = vadd.f32 %v3219_v16, %v3218_v20 }
0x411c   :  { %3222 = vrot.lane.b32.xlu1 %v3220_v22, %s4446_s2 }
0x418e   :  { %v3223_v23 = vpop.permute.xlu1 %3222 }
0x418f   :  { %4201 = vmatmul.mubr.msk.f32.vlgmr.msra.gmra.mxu1 %vm272_vm3, %v3223_v23 }
0x4190   :  { %4215 = vmatpush3.msra.mxu1 %v5102_v25  ;;  %4222 = vmatprep.mubr.msk.f32.mxu1 %vm4445_vm2, %v4444_v17  ;;  %v2772_v25 = vadd.f32 %v5214_v46, %v5083_v41 }
0x4191   :  { %4216 = vmatprep.subr.mxu1 %v4444_v17 }
0x4192   :  { %4217 = vmatpush3.msra.mxu1 %v5108_v26 }
0x4193   :  { %4218 = vmatprep.subr.mxu1 %v4444_v17 }
0x4194   :  { %4219 = vmatpush3.msra.mxu1 %v5115_v27 }
0x4195   :  { %4220 = vmatprep.subr.mxu1 %v4444_v17 }
0x4196   :  { %4221 = vmatpush3.msra.mxu1 %v5122_v30 }
0x424f   :  { %v3292_v28 = vpop.f32.mrf.mxu1 }
0x4250   :  { %v3303_v29 = vadd.f32 %v3292_v28, %v5159_v43  ;;  %v3296_v14 = vadd.f32 %v3292_v28, %v2772_v25 }
0x4251   :  { %v4202_v32 = vpop.f32.mrf.mxu1 }
0x4252   :  { %3305 = vrot.lane.b32.xlu0 %v3303_v29, %s4443_s29  ;;  %v3744_v38 = vmul.f32 -1.442695, %v3296_v14 }
0x4254   :  { %4425 = vpow2.f32 %v3744_v38 }
0x4261   :  { %v4426_v26 = vpop.eup %4425 }
0x4262   :  { %v3300_v39 = vadd.f32 1.0, %v4426_v26 }
0x4264   :  { %4427 = vrcp.f32 %v3300_v39 }
0x4271   :  { %v4428_v27 = vpop.eup %4427 }
0x4272   :  { %v3315_v46 = vsub.f32 1.0, %v4428_v27  ;;  %v3321_v21 = vmul.f32 %v4428_v27, %v3220_v22 }
0x42c4   :  { %v3306_v42 = vpop.permute.xlu0 %3305 }
0x42c5   :  { %v3308_v17 = vmul.f32 %v4428_v27, %v3306_v42 }
0x42c7   :  { %3310 = vrot.lane.b32.xlu1 %v3308_v17, %s4443_s29 }
0x4339   :  { %v3311_v30 = vpop.permute.xlu1 %3310 }
0x433a   :  { %v3313_v31 = vadd.f32 %v3311_v30, %v2772_v25 }
0x433c   :  { %4429 = vtanh.f32 %v3313_v31 }
0x4349   :  { %v4430_v45 = vpop.eup %4429 }
0x434a   :  { %3317 = vrot.lane.b32.xlu0 %v4430_v45, %s4446_s2 }
0x43bc   :  { %v3318_v47 = vpop.permute.xlu0 %3317 }
0x43bd   :  { %v3320_v50 = vmul.f32 %v3318_v47, %v3315_v46 }
0x43bf   :  { %v5264_v37 = vadd.f32 %v3321_v21, %v3320_v50 }
0x43c1   :  { %3324 = vrot.lane.b32.xlu1 %v5264_v37, %s4446_s2 }
0x4433   :  { %v3325_v4 = vpop.permute.xlu1 %3324 }
0x4434   :  { %4212 = vmatmul.mubr.msk.f32.vlgmr.msra.gmra.mxu0 %vm272_vm3, %v3325_v4 }
0x4435   :  { %4226 = vmatpush3.msra.mxu0 %v94_v44  ;;  %4233 = vmatprep.mubr.msk.f32.mxu0 %vm272_vm3, %v5143_v40 }
0x4436   :  { %4227 = vmatprep.subr.mxu0 %v93_v35 }
0x4437   :  { %4228 = vmatpush3.msra.mxu0 %v93_v35 }
0x4438   :  { %4229 = vmatprep.subr.mxu0 %v92_v5 }
0x4439   :  { %4230 = vmatpush3.msra.mxu0 %v92_v5 }
0x443a   :  { %4231 = vmatprep.subr.mxu0 %v91_v51 }
0x443b   :  { %4232 = vmatpush3.msra.mxu0 %v91_v51 }
0x443c   :  { %4234 = vmatmul.mubr.msk.f32.vlgmr.msra.gmra.mxu0 %vm272_vm3, %v5173_v12  ;;  %v5293_v12 = vld [vmem:[%s5369_s18] ss:$0 sm:$0xff] }
0x443d   :  { %4236 = vmatprep.mubr.msk.f32.mxu0 %vm272_vm3, %v5200_v7 }
0x4440   :  { %4237 = vmatmul.mubr.msk.f32.gmra.mxu0 %vm272_vm3, %v5226_v60 }
0x4441   :  { %4239 = vmatprep.mubr.msk.f32.mxu0 %vm272_vm3, %v3223_v23  ;;  %v2782_v23 = vadd.f32 %v5216_v48, %v5083_v41 }
0x4444   :  { %4240 = vmatmul.mubr.msk.f32.gmra.mxu0 %vm272_vm3, %v3325_v4 }
0x44f4   :  { %v3394_v40 = vpop.f32.mrf.mxu0 }
0x44f5   :  { %v3405_v6 = vadd.f32 %v3394_v40, %v5159_v43  ;;  %v3398_v34 = vadd.f32 %v3394_v40, %v2777_v2 }
0x44f6   :  { %v4213_v57 = vpop.f32.mrf.mxu0 }
0x44f7   :  { %3407 = vrot.lane.b32.xlu0 %v3405_v6, %s4443_s29  ;;  %v3746_v63 = vmul.f32 -1.442695, %v3398_v34 }
0x44f9   :  { %4431 = vpow2.f32 %v3746_v63 }
0x44fc   :  { %v4235_v52 = vpop.f32.mrf.mxu0 }
0x44fd   :  { %v3610_v7 = vadd.f32 %v4235_v52, %v5293_v12 }
0x44fe   :  { %v3604_v54 = vpop.f32.mrf.mxu0 }
0x44ff   :  { %3644 = vst.msk [vmem:[%s5370_s19 + $0x8] sm:$0xff] %vm110_vm1, %v3610_v7  ;;  %v3605_v55 = vadd.f32 %v5293_v12, %v3604_v54 }
0x4500   :  { %v4238_v11 = vpop.f32.mrf.mxu0 }
0x4501   :  { %3643 = vst.msk [vmem:[%s5370_s19] sm:$0xff] %vm110_vm1, %v3605_v55  ;;  %v3620_v61 = vadd.f32 %v4238_v11, %v5293_v12 }
0x4502   :  { %v3614_v36 = vpop.f32.mrf.mxu0 }
0x4503   :  { %3646 = vst.msk [vmem:[%s5370_s19 + $0x18] sm:$0xff] %vm110_vm1, %v3620_v61  ;;  %v3615_v53 = vadd.f32 %v5293_v12, %v3614_v36 }
0x4504   :  { %v4241_v56 = vpop.f32.mrf.mxu0 }
0x4505   :  { %3645 = vst.msk [vmem:[%s5370_s19 + $0x10] sm:$0xff] %vm110_vm1, %v3615_v53  ;;  %v3630_v58 = vadd.f32 %v4241_v56, %v5293_v12 }
0x4506   :  { %v3624_v62 = vpop.f32.mrf.mxu0  ;;  %v4432_v0 = vpop.eup %4431 }
0x4507   :  { %3648 = vst.msk [vmem:[%s5370_s19 + $0x28] sm:$0xff] %vm110_vm1, %v3630_v58  ;;  %v3625_v60 = vadd.f32 %v5293_v12, %v3624_v62  ;;  %v3402_v59 = vadd.f32 1.0, %v4432_v0 }
0x4509   :  { %3647 = vst.msk [vmem:[%s5370_s19 + $0x20] sm:$0xff] %vm110_vm1, %v3625_v60  ;;  %4433 = vrcp.f32 %v3402_v59 }
0x4516   :  { %v4434_v1 = vpop.eup %4433 }
0x4517   :  { %v3417_v24 = vsub.f32 1.0, %v4434_v1  ;;  %v3423_v49 = vmul.f32 %v4434_v1, %v5264_v37 }
0x4569   :  { %v3408_v18 = vpop.permute.xlu0 %3407 }
0x456a   :  { %v3410_v3 = vmul.f32 %v4434_v1, %v3408_v18 }
0x456c   :  { %3412 = vrot.lane.b32.xlu1 %v3410_v3, %s4443_s29 }
0x45de   :  { %v3413_v19 = vpop.permute.xlu1 %3412 }
0x45df   :  { %v3415_v8 = vadd.f32 %v3413_v19, %v2777_v2 }
0x45e1   :  { %4435 = vtanh.f32 %v3415_v8 }
0x45ee   :  { %v4436_v9 = vpop.eup %4435 }
0x45ef   :  { %3419 = vrot.lane.b32.xlu0 %v4436_v9, %s4446_s2 }
0x4661   :  { %v3420_v10 = vpop.permute.xlu0 %3419 }
0x4662   :  { %v3422_v33 = vmul.f32 %v3420_v10, %v3417_v24 }
0x4664   :  { %v3424_v13 = vadd.f32 %v3423_v49, %v3422_v33 }
0x4666   :  { %3426 = vrot.lane.b32.xlu1 %v3424_v13, %s4446_s2 }
0x46d8   :  { %v3427_v15 = vpop.permute.xlu1 %3426 }
0x46d9   :  { %4223 = vmatmul.mubr.msk.f32.vlgmr.msra.gmra.mxu1 %vm272_vm3, %v3427_v15  ;;  %4242 = vmatprep.mubr.msk.f32.mxu0 %vm272_vm3, %v3427_v15 }
0x4799   :  { %v3496_v16 = vpop.f32.mrf.mxu1 }
0x479a   :  { %v3507_v20 = vadd.f32 %v3496_v16, %v5159_v43  ;;  %v3500_v28 = vadd.f32 %v3496_v16, %v2782_v23 }
0x479b   :  { %v4224_v22 = vpop.f32.mrf.mxu1 }
0x479c   :  { %3509 = vrot.lane.b32.xlu0 %v3507_v20, %s4443_s29  ;;  %v3748_v29 = vmul.f32 -1.442695, %v3500_v28 }
0x479e   :  { %4437 = vpow2.f32 %v3748_v29 }
0x47ab   :  { %v4438_v32 = vpop.eup %4437 }
0x47ac   :  { %v3504_v25 = vadd.f32 1.0, %v4438_v32 }
0x47ae   :  { %4439 = vrcp.f32 %v3504_v25 }
0x47bb   :  { %v4440_v14 = vpop.eup %4439 }
0x47bc   :  { %v3519_v42 = vsub.f32 1.0, %v4440_v14  ;;  %v3525_v41 = vmul.f32 %v4440_v14, %v3424_v13 }
0x480e   :  { %v3510_v38 = vpop.permute.xlu0 %3509 }
0x480f   :  { %v3512_v26 = vmul.f32 %v4440_v14, %v3510_v38 }
0x4811   :  { %3514 = vrot.lane.b32.xlu1 %v3512_v26, %s4443_s29 }
0x4883   :  { %v3515_v39 = vpop.permute.xlu1 %3514 }
0x4884   :  { %v3517_v27 = vadd.f32 %v3515_v39, %v2782_v23 }
0x4886   :  { %4441 = vtanh.f32 %v3517_v27 }
0x4893   :  { %v4442_v43 = vpop.eup %4441 }
0x4894   :  { %3521 = vrot.lane.b32.xlu0 %v4442_v43, %s4446_s2 }
0x4906   :  { %v3522_v17 = vpop.permute.xlu0 %3521 }
0x4907   :  { %v3524_v48 = vmul.f32 %v3522_v17, %v3519_v42 }
0x4909   :  { %v3526_v30 = vadd.f32 %v3525_v41, %v3524_v48 }
0x490b   :  { %3534 = vrot.lane.b32.xlu1 %v3526_v30, %s4446_s2 }
0x497d   :  { %v3535_v31 = vpop.permute.xlu1 %3534 }
0x497e   :  { %4243 = vmatmul.mubr.msk.f32.gmra.mxu0 %vm272_vm3, %v3535_v31 }
0x4a3e   :  { %v4244_v44 = vpop.f32.mrf.mxu0 }
0x4a3f   :  { %v3640_v45 = vadd.f32 %v4244_v44, %v5293_v12 }
0x4a40   :  { %v3634_v46 = vpop.f32.mrf.mxu0 }
0x4a41   :  { %3650 = vst.msk [vmem:[%s5370_s19 + $0x38] sm:$0xff] %vm110_vm1, %v3640_v45  ;;  %v3635_v47 = vadd.f32 %v5293_v12, %v3634_v46 }
0x4a43   :  { %3649 = vst.msk [vmem:[%s5370_s19 + $0x30] sm:$0xff] %vm110_vm1, %v3635_v47 }

</bundles_post_ra>
